<compile_context>
chip_gen: v6e
topology: v6e:2x2x1
jax: 0.10.0
libtpu: 0.0.40
codegen_flags: <defaults>
</compile_context>

<pallas_src>
import math

import jax
import jax.numpy as jnp
from jax.experimental import pallas as pl
from jax.experimental.pallas import tpu as pltpu


def _gelu_tanh(x):
    # GELU with tanh approximation (matches torch nn.GELU(approximate='tanh')).
    c = math.sqrt(2.0 / math.pi)
    return 0.5 * x * (1.0 + jnp.tanh(c * (x + 0.044715 * x * x * x)))


def _round_up(x, m):
    return (x + m - 1) // m * m


def _make_ffn_kernel(tile_h, resident):
    def kernel(x_ref, w1_ref, b1_ref, w2_ref, b2_ref, o_ref, acc_ref):
        # x_ref: (TM, E); o_ref: (TM, E); acc_ref: (TM, E) f32 scratch.
        # resident: w1_ref (E, Hp), b1_ref (1, Hp), w2_ref (Hp, E)
        # streamed: w1_ref (E, TH), b1_ref (1, TH), w2_ref (TH, E)
        h_idx = pl.program_id(1)

        @pl.when(h_idx == 0)
        def _():
            # Fold b2 into the accumulator init (saves a (TM, E) add in the
            # epilogue of the last h step).
            acc_ref[...] = jnp.broadcast_to(
                b2_ref[...].astype(jnp.float32), acc_ref.shape)

        if resident:
            # Weights are fully VMEM-resident; slice the current hidden chunk.
            h0 = pl.multiple_of(h_idx * tile_h, tile_h)
            w1 = w1_ref[:, pl.ds(h0, tile_h)]
            b1 = b1_ref[:, pl.ds(h0, tile_h)]
            w2 = w2_ref[pl.ds(h0, tile_h), :]
        else:
            w1 = w1_ref[...]
            b1 = b1_ref[...]
            w2 = w2_ref[...]

        # First matmul: native-dtype operands straight into the MXU, f32 acc.
        h = jnp.dot(x_ref[...], w1, preferred_element_type=jnp.float32)
        h = _gelu_tanh(h + b1.astype(jnp.float32))

        # Second matmul: contract the GELU'd slice against the matching W2
        # rows and accumulate into the f32 scratch.
        acc_ref[...] += jnp.dot(h.astype(w2.dtype), w2,
                                preferred_element_type=jnp.float32)

        @pl.when(h_idx == pl.num_programs(1) - 1)
        def _():
            o_ref[...] = acc_ref[...].astype(o_ref.dtype)

    return kernel


def _select_config(N, E, H, dtype, tile_m, tile_h, resident):
    itemsize = jnp.dtype(dtype).itemsize
    # Dtype-aware sublane packing: 8 rows f32, 16 bf16, 32 int8/fp8.
    sub = 8 * max(1, 4 // itemsize)

    # Generation-aware VMEM budget (128 MiB on v5e/v6e, 64 MiB per TC on v7x).
    try:
        vmem_cap = int(getattr(pltpu.get_tpu_info(), "vmem_capacity_bytes", 0))
    except Exception:
        vmem_cap = 0
    if vmem_cap <= 0:
        vmem_cap = 64 << 20          # conservative fallback, safe on all gens
    vmem_limit = (vmem_cap * 3) // 4  # ~96 MiB on v5e/v6e, ~48 MiB on v7x

    # Hidden tiling: never fall back to a full-H block; pad H up instead.
    if tile_h is None:
        tile_h = min(512, _round_up(H, 128))
    tile_h = _round_up(tile_h, 128)
    H_pad = _round_up(H, tile_h)

    # Weight residency: keep W1/W2 in VMEM across all token tiles if both
    # (double-buffered) fit in half of the budget.
    if resident is None:
        resident = 4 * E * H_pad * itemsize <= vmem_limit // 2

    def vmem_usage(tm):
        xo = 2 * 2 * tm * E * itemsize           # x + out tiles, double buffered
        acc = tm * E * 4                         # f32 accumulator scratch
        inter = 2 * tm * tile_h * 4              # f32 GELU intermediate headroom
        if resident:
            w = 4 * E * H_pad * itemsize         # W1 + W2 full, double buffered
            inter += E * tile_h * itemsize       # possible in-kernel slice copy
            b1_len = H_pad
        else:
            w = 4 * E * tile_h * itemsize        # W1/W2 slabs, double buffered
            b1_len = tile_h
        small = 2 * (b1_len + E) * itemsize      # biases
        return xo + acc + inter + w + small

    if tile_m is None:
        # Keep >= 2 token tiles whenever N allows it (v7x: 2 TCs per chip).
        if N > sub:
            max_tm = _round_up(max((N + 1) // 2, sub), sub)
        else:
            max_tm = _round_up(max(N, 1), sub)
        tile_m = sub
        for cand in (1024, 768, 512, 384, 256, 192, 128, 96, 64, 48, 32, 16, 8):
            if cand % sub or cand > max_tm:
                continue
            if vmem_usage(cand) <= vmem_limit:
                tile_m = cand
                break
    tile_m = _round_up(tile_m, sub)

    return tile_m, tile_h, H_pad, resident, vmem_limit


def transformer_feed_forward(x, w1, b1, w2, b2, *, tile_m=None, tile_h=None,
                             resident=None):
    """Forward of TransformerFeedFoward.

    x: [..., E]; w1: [E, H]; b1: [H]; w2: [H, E]; b2: [E]   (H = 4*E).
    """
    orig_shape = x.shape
    E = x.shape[-1]
    H = w1.shape[1]
    N = math.prod(x.shape[:-1])

    tile_m, tile_h, H_pad, resident, vmem_limit = _select_config(
        N, E, H, x.dtype, tile_m, tile_h, resident)

    N_pad = _round_up(N, tile_m)

    x2d = x.reshape(N, E)
    if N_pad != N:
        x2d = jnp.pad(x2d, ((0, N_pad - N), (0, 0)))

    w1p, b1p, w2p = w1, b1, w2
    if H_pad != H:
        # Zero-padding the hidden dim is exact: gelu(0 + 0) == 0 contributes 0.
        w1p = jnp.pad(w1, ((0, 0), (0, H_pad - H)))
        b1p = jnp.pad(b1, ((0, H_pad - H),))
        w2p = jnp.pad(w2, ((0, H_pad - H), (0, 0)))
    b1_2d = b1p.reshape(1, H_pad)
    b2_2d = b2.reshape(1, E)

    grid = (N_pad // tile_m, H_pad // tile_h)
    n_i = grid[0]

    if resident:
        w1_spec = pl.BlockSpec((E, H_pad), lambda i, h: (0, 0))
        b1_spec = pl.BlockSpec((1, H_pad), lambda i, h: (0, 0))
        w2_spec = pl.BlockSpec((H_pad, E), lambda i, h: (0, 0))
        weight_reads = 1                        # DMA'd once, stay resident
    else:
        w1_spec = pl.BlockSpec((E, tile_h), lambda i, h: (0, h))
        b1_spec = pl.BlockSpec((1, tile_h), lambda i, h: (0, h))
        w2_spec = pl.BlockSpec((tile_h, E), lambda i, h: (h, 0))
        weight_reads = n_i                      # re-streamed per token tile

    x_item = jnp.dtype(x.dtype).itemsize
    w_item = jnp.dtype(w1.dtype).itemsize
    cost = pl.CostEstimate(
        flops=4 * N_pad * E * H_pad + 2 * N_pad * (E + H_pad),
        transcendentals=N_pad * H_pad,
        bytes_accessed=(x2d.size * x_item
                        + weight_reads * (w1p.size + w2p.size) * w_item
                        + (b1p.size + b2.size) * w_item
                        + N_pad * E * x_item),
    )

    kernel = _make_ffn_kernel(tile_h, resident)

    out2d = pl.pallas_call(
        kernel,
        out_shape=jax.ShapeDtypeStruct((N_pad, E), x.dtype),
        grid_spec=pltpu.PrefetchScalarGridSpec(
            num_scalar_prefetch=0,
            grid=grid,
            in_specs=[
                pl.BlockSpec((tile_m, E), lambda i, h: (i, 0)),   # x tile
                w1_spec,                                          # W1
                b1_spec,                                          # b1
                w2_spec,                                          # W2
                pl.BlockSpec((1, E), lambda i, h: (0, 0)),        # b2 (tiny)
            ],
            out_specs=pl.BlockSpec((tile_m, E), lambda i, h: (i, 0)),
            scratch_shapes=[pltpu.VMEM((tile_m, E), jnp.float32)],
        ),
        compiler_params=pltpu.CompilerParams(
            # token axis sharded across TensorCores, hidden axis is a reduction
            dimension_semantics=("parallel", "arbitrary"),
            vmem_limit_bytes=vmem_limit,
        ),
        cost_estimate=cost,
    )(x2d, w1p, b1_2d, w2p, b2_2d)

    return out2d[:N].reshape(orig_shape)


def init_params(key, emb_dim, dtype=jnp.float32):
    """Deterministic init mirroring nn.Linear's U(-1/sqrt(fan_in), 1/sqrt(fan_in))."""
    hid = 4 * emb_dim
    k1, k2, k3, k4 = jax.random.split(key, 4)
    bound1 = 1.0 / math.sqrt(emb_dim)
    bound2 = 1.0 / math.sqrt(hid)
    w1 = jax.random.uniform(k1, (emb_dim, hid), dtype, -bound1, bound1)
    b1 = jax.random.uniform(k2, (hid,), dtype, -bound1, bound1)
    w2 = jax.random.uniform(k3, (hid, emb_dim), dtype, -bound2, bound2)
    b2 = jax.random.uniform(k4, (emb_dim,), dtype, -bound2, bound2)
    return w1, b1, w2, b2


def reference_ffn(x, w1, b1, w2, b2):
    h = _gelu_tanh(x @ w1 + b1)
    return h @ w2 + b2


if __name__ == "__main__":
    # E=256 -> H=1024: auto config gives 2 token tiles x 2 hidden steps, so the
    # accumulator init/accumulate/finalize path and the resident pl.ds slicing
    # are both exercised.
    batch, seq, emb_dim = 2, 128, 256
    dropout = 0.0  # falsy -> no Dropout layer appended (matches PyTorch module)

    key = jax.random.PRNGKey(0)
    kx, kp = jax.random.split(key)
    x = jax.random.normal(kx, (batch, seq, emb_dim), dtype=jnp.float32)
    w1, b1, w2, b2 = init_params(kp, emb_dim)

    ref = reference_ffn(x, w1, b1, w2, b2)

    # Auto config (weight-resident path at this size).
    out = jax.block_until_ready(transformer_feed_forward(x, w1, b1, w2, b2))
    assert out.shape == (batch, seq, emb_dim)
    assert jnp.allclose(out, ref, atol=1e-3, rtol=1e-3), "mismatch (resident path)"

    # Forced streaming-weights path — same numerics expected.
    out_s = jax.block_until_ready(
        transformer_feed_forward(x, w1, b1, w2, b2, resident=False))
    assert jnp.allclose(out_s, ref, atol=1e-3, rtol=1e-3), "mismatch (streamed path)"

    print("KERNEL_OK")
</pallas_src>

<mosaic_0001>
module attributes {stable_mosaic.version = 11 : i64} {
  func.func @kernel(%arg0: i32, %arg1: i32, %arg2: memref<128x256xf32, #tpu.memory_space<vmem>>, %arg3: memref<256x1024xf32, #tpu.memory_space<vmem>>, %arg4: memref<1x1024xf32, #tpu.memory_space<vmem>>, %arg5: memref<1024x256xf32, #tpu.memory_space<vmem>>, %arg6: memref<1x256xf32, #tpu.memory_space<vmem>>, %arg7: memref<128x256xf32, #tpu.memory_space<vmem>>, %arg8: memref<128x256xf32, #tpu.memory_space<vmem>>) attributes {dimension_semantics = [#tpu.dimension_semantics<parallel>, #tpu.dimension_semantics<arbitrary>], iteration_bounds = array<i64: 2, 2>, scalar_prefetch = 0 : i64, scratch_operands = 1 : i64, tpu.core_type = #tpu.core_type<tc>, window_params = [{transform_indices = @transform_0, window_bounds = array<i64: 128, 256>}, {pipeline_mode = #tpu.pipeline_mode<synchronous>, transform_indices = @transform_1, window_bounds = array<i64: 256, 1024>}, {pipeline_mode = #tpu.pipeline_mode<synchronous>, transform_indices = @transform_2, window_bounds = array<i64: 1, 1024>}, {pipeline_mode = #tpu.pipeline_mode<synchronous>, transform_indices = @transform_3, window_bounds = array<i64: 1024, 256>}, {pipeline_mode = #tpu.pipeline_mode<synchronous>, transform_indices = @transform_4, window_bounds = array<i64: 1, 256>}, {transform_indices = @transform_5, window_bounds = array<i64: 128, 256>}]} {
    %c0_i32 = arith.constant 0 : i32
    %0 = arith.cmpi eq, %arg1, %c0_i32 : i32
    %1 = arith.extui %0 : i1 to i32
    %c0_i32_0 = arith.constant 0 : i32
    %2 = arith.cmpi ne, %1, %c0_i32_0 : i32
    scf.if %2 {
      %c0_15 = arith.constant 0 : index
      %c0_16 = arith.constant 0 : index
      %35 = vector.load %arg6[%c0_15, %c0_16] : memref<1x256xf32, #tpu.memory_space<vmem>>, vector<1x256xf32>
      %36 = vector.shape_cast %35 : vector<1x256xf32> to vector<1x256xf32>
      %37 = vector.broadcast %36 : vector<1x256xf32> to vector<128x256xf32>
      %c0_17 = arith.constant 0 : index
      %c0_18 = arith.constant 0 : index
      %38 = vector.load %arg8[%c0_17, %c0_18] : memref<128x256xf32, #tpu.memory_space<vmem>>, vector<128x256xf32>
      tpu.vector_store %arg8[%c0_17, %c0_18], %37 {strides = array<i32>} : memref<128x256xf32, #tpu.memory_space<vmem>>, vector<128x256xf32>,
    } else {
    }
    %c512_i32 = arith.constant 512 : i32
    %3 = arith.muli %arg1, %c512_i32 : i32
    %4 = tpu.assume_multiple %3, 512 : i32
    %c0 = arith.constant 0 : index
    %5 = arith.index_cast %4 : i32 to index
    %6 = vector.load %arg3[%c0, %5] : memref<256x1024xf32, #tpu.memory_space<vmem>>, vector<256x512xf32>
    %c0_1 = arith.constant 0 : index
    %7 = arith.index_cast %4 : i32 to index
    %8 = vector.load %arg4[%c0_1, %7] : memref<1x1024xf32, #tpu.memory_space<vmem>>, vector<1x512xf32>
    %9 = arith.index_cast %4 : i32 to index
    %c0_2 = arith.constant 0 : index
    %10 = vector.load %arg5[%9, %c0_2] : memref<1024x256xf32, #tpu.memory_space<vmem>>, vector<512x256xf32>
    %c0_3 = arith.constant 0 : index
    %c0_4 = arith.constant 0 : index
    %11 = vector.load %arg2[%c0_3, %c0_4] : memref<128x256xf32, #tpu.memory_space<vmem>>, vector<128x256xf32>
    %cst = arith.constant dense<0.000000e+00> : vector<128x512xf32>
    %12 = tpu.matmul %11, %6, %cst {dimension_numbers = #tpu.dot_dimension_numbers<[1], [0], [0], [1], [0, 0, 1, 1], [], []>} : vector<128x256xf32>, vector<256x512xf32>, vector<128x512xf32> -> vector<128x512xf32>
    %13 = vector.broadcast %8 : vector<1x512xf32> to vector<128x512xf32>
    %14 = arith.addf %12, %13 : vector<128x512xf32>
    %cst_5 = arith.constant 5.000000e-01 : f32
    %15 = vector.broadcast %cst_5 : f32 to vector<128x512xf32>
    %16 = arith.mulf %15, %14 : vector<128x512xf32>
    %cst_6 = arith.constant 4.471500e-02 : f32
    %17 = vector.broadcast %cst_6 : f32 to vector<128x512xf32>
    %18 = arith.mulf %17, %14 : vector<128x512xf32>
    %19 = arith.mulf %18, %14 : vector<128x512xf32>
    %20 = arith.mulf %19, %14 : vector<128x512xf32>
    %21 = arith.addf %14, %20 : vector<128x512xf32>
    %cst_7 = arith.constant 0.797884583 : f32
    %22 = vector.broadcast %cst_7 : f32 to vector<128x512xf32>
    %23 = arith.mulf %22, %21 : vector<128x512xf32>
    %24 = math.tanh %23 : vector<128x512xf32>
    %cst_8 = arith.constant 1.000000e+00 : f32
    %25 = vector.broadcast %cst_8 : f32 to vector<128x512xf32>
    %26 = arith.addf %25, %24 : vector<128x512xf32>
    %27 = arith.mulf %16, %26 : vector<128x512xf32>
    %c0_9 = arith.constant 0 : index
    %c0_10 = arith.constant 0 : index
    %28 = vector.load %arg8[%c0_9, %c0_10] : memref<128x256xf32, #tpu.memory_space<vmem>>, vector<128x256xf32>
    %cst_11 = arith.constant dense<0.000000e+00> : vector<128x256xf32>
    %29 = tpu.matmul %27, %10, %cst_11 {dimension_numbers = #tpu.dot_dimension_numbers<[1], [0], [0], [1], [0, 0, 1, 1], [], []>} : vector<128x512xf32>, vector<512x256xf32>, vector<128x256xf32> -> vector<128x256xf32>
    %30 = arith.addf %28, %29 : vector<128x256xf32>
    %c0_12 = arith.constant 0 : index
    %c0_13 = arith.constant 0 : index
    %31 = vector.load %arg8[%c0_12, %c0_13] : memref<128x256xf32, #tpu.memory_space<vmem>>, vector<128x256xf32>
    tpu.vector_store %arg8[%c0_12, %c0_13], %30 {strides = array<i32>} : memref<128x256xf32, #tpu.memory_space<vmem>>, vector<128x256xf32>,
    %c1_i32 = arith.constant 1 : i32
    %32 = arith.cmpi eq, %arg1, %c1_i32 : i32
    %33 = arith.extui %32 : i1 to i32
    %c0_i32_14 = arith.constant 0 : i32
    %34 = arith.cmpi ne, %33, %c0_i32_14 : i32
    scf.if %34 {
      %c0_15 = arith.constant 0 : index
      %c0_16 = arith.constant 0 : index
      %35 = vector.load %arg8[%c0_15, %c0_16] : memref<128x256xf32, #tpu.memory_space<vmem>>, vector<128x256xf32>
      %c0_17 = arith.constant 0 : index
      %c0_18 = arith.constant 0 : index
      %36 = vector.load %arg7[%c0_17, %c0_18] : memref<128x256xf32, #tpu.memory_space<vmem>>, vector<128x256xf32>
      tpu.vector_store %arg7[%c0_17, %c0_18], %35 {strides = array<i32>} : memref<128x256xf32, #tpu.memory_space<vmem>>, vector<128x256xf32>,
    } else {
    }
    return
  }
  func.func @transform_0(%arg0: i32, %arg1: i32) -> (i32, i32) {
    %c0_i32 = arith.constant 0 : i32
    %c0_i32_0 = arith.constant 0 : i32
    return %arg0, %c0_i32 : i32, i32
  }
  func.func @transform_1(%arg0: i32, %arg1: i32) -> (i32, i32) {
    %c0_i32 = arith.constant 0 : i32
    %c0_i32_0 = arith.constant 0 : i32
    %c0_i32_1 = arith.constant 0 : i32
    return %c0_i32, %c0_i32_0 : i32, i32
  }
  func.func @transform_2(%arg0: i32, %arg1: i32) -> (i32, i32) {
    %c0_i32 = arith.constant 0 : i32
    %c0_i32_0 = arith.constant 0 : i32
    %c0_i32_1 = arith.constant 0 : i32
    return %c0_i32, %c0_i32_0 : i32, i32
  }
  func.func @transform_3(%arg0: i32, %arg1: i32) -> (i32, i32) {
    %c0_i32 = arith.constant 0 : i32
    %c0_i32_0 = arith.constant 0 : i32
    %c0_i32_1 = arith.constant 0 : i32
    return %c0_i32, %c0_i32_0 : i32, i32
  }
  func.func @transform_4(%arg0: i32, %arg1: i32) -> (i32, i32) {
    %c0_i32 = arith.constant 0 : i32
    %c0_i32_0 = arith.constant 0 : i32
    %c0_i32_1 = arith.constant 0 : i32
    return %c0_i32, %c0_i32_0 : i32, i32
  }
  func.func @transform_5(%arg0: i32, %arg1: i32) -> (i32, i32) {
    %c0_i32 = arith.constant 0 : i32
    %c0_i32_0 = arith.constant 0 : i32
    return %arg0, %c0_i32 : i32, i32
  }
}

</mosaic_0001>

<bundles_post_ra>
// kernel: tpu_custom_call.1
= control target key start
LH: loop header
LB: loop body
LE: loop exit
PB: predicated region body
PF: predicated region fallthrough
CT: control target
= control target key end

     0   :  { %s4056_s0 = inlined_call_operand.hbm [shape: f32[256,256], index: 0, kind: input, shape index: {}]   ;;  %s4057_s1 = inlined_call_operand.hbm [shape: f32[256,1024], index: 1, kind: input, shape index: {}]   ;;  %s4058_s2 = inlined_call_operand.hbm [shape: f32[1,1024], index: 2, kind: input, shape index: {}]   ;;  %s4059_s3 = inlined_call_operand.hbm [shape: f32[1024,256], index: 3, kind: input, shape index: {}]   ;;  %s4060_s4 = inlined_call_operand.vmem [shape: f32[1,256], index: 4, kind: input, shape index: {}]   ;;  %s4061_s5 = inlined_call_operand.hbm [shape: f32[256,256], index: 5, kind: output, shape index: {}]  }
   0x1   :  { %4108 = sst [smem:[#allocation50_spill]] %s4057_s1 }
   0x2   :  { %4109 = sst [smem:[#allocation51_spill]] %s4058_s2 }
   0x3   :  { %4110 = sst [smem:[#allocation52_spill]] %s4059_s3 }
   0x4   :  { %10 = vsyncpa [#allocation4], 0 }
   0x5   :  { %12 = vsyncpa [#allocation4 + $0x1], 0 }
   0x6   :  { %13 = vsyncpa [#allocation7], 0 }
   0x7   :  { %14 = vsyncpa [#allocation10], 0 }
   0x8   :  { %15 = vsyncpa [#allocation5], 0 }
   0x9   :  { %17 = vsyncpa [#allocation5 + $0x1], 0  ;;  %s2716_s18 = smov 0   ;;  %s2718_s19 = smov 0  }
   0xa   :  { %s2720_s20 = smov 0   ;;  %s2722_s21 = smov 0  }
   0xb   :  { %s2724_s22 = smov 0   ;;  %s2726_s23 = smov 0  }
   0xc   :  { %s2728_s24 = smov 0   ;;  %s2730_s25 = smov 0  }
   0xd LB: > { %s2186_s26 = sadd.s32 4294967295, %s2673_s25   ;;  %s2187_s27 = sadd.s32 4294967294, %s2673_s25   ;;  %s2673_s25 = sphi %s2730_s25, %s23_s25   ;;  %s2669_s24 = sphi %s2728_s24, %s4226_s24   ;;  %s2665_s23 = sphi %s2726_s23, %s4225_s23   ;;  %s2661_s22 = sphi %s2724_s22, %s4224_s22   ;;  %s2657_s21 = sphi %s2722_s21, %s4223_s21   ;;  %s2653_s20 = sphi %s2720_s20, %s4222_s20   ;;  %s2649_s19 = sphi %s2718_s19, %s4221_s19   ;;  %s2645_s18 = sphi %s2716_s18, %s4220_s18  }
   0xe   : > { %p55_p0 = scmp.ne.s32.totalorder %s2649_s19, %s2645_s18  ;;  %p2760_p1 = scmp.eq.s32.totalorder %s2186_s26, 0 }
   0xf   : > { %p2764_p2 = scmp.eq.s32.totalorder %s2186_s26, 3  ;;  %p169_p3 = scmp.eq.s32.totalorder %s2187_s27, 3 }
  0x10   : > { %s4111_s28 = scalar_select %p2760_p1, 1, 0 }
  0x11   : > { %p2770_p4 = por %p2760_p1, %p55_p0  ;;  %p2188_p5 = scmp.ge.s32.totalorder %s2673_s25, 1 }
  0x12   : > { %p2775_p6 = por %p169_p3, %p55_p0  ;;  %p176_p7 = scmp.lt.s32.totalorder %s2673_s25, 5 }
  0x13   : > { %s4113_s30 = scalar_select %p2770_p4, 1, 0 }
  0x14   : > { %s4114_s6 = scalar_select %p2775_p6, 1, 0 }
  0x15   : > { %p2780_p8 = pnand %p2188_p5, %p176_p7  ;;  %s2675_s8 = smov [#allocation6]  }
  0x16   : > { %s188_s9 = sshll.u32 %s2675_s8, 4  ;;  %s2676_s11 = smov [#allocation8]   ;;  %s189_s9 = int_to_ptr.vmem [resolvable:$true] %s188_s9 }
  0x17   : > { %s4115_s7 = scalar_select %p2780_p8, 1, 0 }
  0x18   : > { %p2236_p9 = pneg %p2780_p8  ;;  %s202_s12 = sshll.u32 %s2676_s11, 4  ;;  %s203_s12 = int_to_ptr.vmem [resolvable:$true] %s202_s12 }
  0x19   : > { %s2677_s13 = smov [#allocation9]   ;;  %s2474_s15 = scalar_lea.vmem %s189_s9, 32768 }
  0x1a   : > { %p2788_p10 = pnand %p2236_p9, %p2760_p1  ;;  %s212_s14 = sshll.u32 %s2677_s13, 4  ;;  %s213_s14 = int_to_ptr.vmem [resolvable:$true] %s212_s14 }
  0x1b   : > { %p2475_p12 = scmp.ne.s32.totalorder %s189_s9, %s2474_s15  ;;  %p2482_p3 = scmp.lt.s32.totalorder %s189_s9, %s189_s9 }
  0x1c   : > { %p2465_p11 = pneg %p2788_p10  ;;  %p2483_p5 = scmp.lt.s32.totalorder %s2474_s15, %s2474_s15 }
  0x1e   : > { %p2477_p13 = pnand %p2475_p12, %p2465_p11  ;;  %p2484_p7 = por %p2483_p5, %p2482_p3 }
  0x20   : > { %p2478_p0 = pneg %p2477_p13 }
  0x22   : > { %p2485_p9 = pnand %p2484_p7, %p2478_p0 }
  0x24   : > { %2488 = shalt.err (!%p2485_p9)
}
  0x25   : > { %s2678_s16 = smov 1024   ;;  %s2679_s17 = smov 64  }
  0x26   : > { %s4117_s1 = sld [smem:[#allocation50_spill]]  ;;  %s2500_s8 = scalar_lea.vmem %s203_s12, 128 }
  0x27   : > { %p2501_p6 = scmp.ne.s32.totalorder %s203_s12, %s2500_s8  ;;  %p2508_p1 = scmp.lt.s32.totalorder %s203_s12, %s203_s12 }
  0x28   : > { %p2509_p4 = scmp.lt.s32.totalorder %s2500_s8, %s2500_s8 }
  0x29   : > { %p2503_p12 = pnand %p2501_p6, %p2465_p11 }
  0x2a   : > { %p2510_p3 = por %p2509_p4, %p2508_p1 }
  0x2b   : > { %p2504_p13 = pneg %p2503_p12 }
  0x2c   : > { %2239 = dma.hbm_to_vmem [thread:$0]  (!%p2788_p10), %s4117_s1, 32768, %s189_s9, [#allocation7], %s2678_s16, %s2678_s16, %s2679_s17  }
  0x2d   : > { %p2511_p0 = pnand %p2510_p3, %p2504_p13 }
  0x2f   : > { %2514 = shalt.err (!%p2511_p0)
}
  0x30   : > { %s4118_s2 = sld [smem:[#allocation51_spill]]  ;;  %s2526_s9 = scalar_lea.vmem %s213_s14, 32768 }
  0x31   : > { %p2527_p5 = scmp.ne.s32.totalorder %s213_s14, %s2526_s9  ;;  %p2534_p9 = scmp.lt.s32.totalorder %s213_s14, %s213_s14 }
  0x32   : > { %p2535_p12 = scmp.lt.s32.totalorder %s2526_s9, %s2526_s9 }
  0x33   : > { %p2529_p7 = pnand %p2527_p5, %p2465_p11 }
  0x34   : > { %p2536_p8 = por %p2535_p12, %p2534_p9 }
  0x35   : > { %p2530_p6 = pneg %p2529_p7 }
  0x36   : > { %2242 = dma.hbm_to_vmem [thread:$0]  (!%p2788_p10), %s4118_s2, 128, %s203_s12, [#allocation7]  }
  0x37   : > { %p2537_p1 = pnand %p2536_p8, %p2530_p6 }
  0x39   : > { %2540 = shalt.err (!%p2537_p1)
}
  0x3a   : > { %s4066_s15 = smov 256   ;;  %s4067_s12 = smov 16  }
  0x3b   : > { %s4119_s3 = sld [smem:[#allocation52_spill]]  ;;  %s32_s26 = sadd.s32 1, %s2665_s23 }
  0x3c   : > { %p33_p4 = scmp.ge.s32.totalorder %s32_s26, 2  ;;  %s35_s27 = sadd.s32 1, %s2669_s24 }
  0x3d   : > { %s42_s8 = sadd.s32 1, %s2653_s20  ;;  %p49_p8 = scmp.ne.s32.totalorder %s2653_s20, %s2649_s19 }
  0x3e   : > { %s4228_s26 = smov (%p33_p4, %s32_s26), 0  ;;  %s4230_s27 = smov (!%p33_p4, %s35_s27), %s2669_s24 }
  0x3f   : > { %p50_p11 = scmp.eq.s32.totalorder %s2673_s25, 0  ;;  %p2832_p13 = por %p2764_p2, %p49_p8 }
  0x40   : > { %p37_p3 = scmp.ge.s32.totalorder %s4230_s27, 2  ;;  %s2216_s9 = sshll.u32 %s2669_s24, 12 }
  0x41   : > { %2245 = dma.hbm_to_vmem [thread:$0]  (!%p2788_p10), %s4119_s3, 32768, %s213_s14, [#allocation10], %s4066_s15, %s4066_s15, %s4067_s12  }
  0x42   : > { %p2257_p10 = scmp.lt.s32.totalorder %s2673_s25, 4  ;;  %p51_p0 = por %p50_p11, %p49_p8 }
  0x43   : > { %s229_s14 = sand.u32 1, %s2653_s20   ;;  %s4232_s27 = smov (%p37_p3, %s4230_s27), 0 }
  0x44   : > { %s2193_s11 = sshll.u32 %s229_s14, 8  ;;  %s39_s13 = ssub.s32 %s2669_s24, %s4232_s27 }
  0x45   : > { %p40_p5 = scmp.eq.s32.totalorder %s39_s13, 0  ;;  %s240_s29 = scalar_lea.hbm %s4056_s0, %s2216_s9 }
  0x46   : > { %s233_s15 = scalar_lea.vmem [#allocation3], %s2193_s11  ;;  %p2851_p2 = pnand %p2257_p10, %p51_p0 }
  0x47   : > { %s241_s12 = sshll.u32 %s233_s15, 4  ;;  %s230_s3 = scalar_lea.sflag [#allocation4], %s229_s14  ;;  %s242_s12 = int_to_ptr.vmem [resolvable:$true] %s241_s12 }
  0x48   : > { %s2847_s1 = scalar_select %p40_p5, %s2653_s20, %s42_s8  }
  0x49   : > { %p2543_p7 = pneg %p2851_p2  ;;  %s2554_s13 = scalar_lea.vmem %s242_s12, 4096 }
  0x4a   : > { %p2555_p6 = scmp.ne.s32.totalorder %s242_s12, %s2554_s13  ;;  %s2682_s16 = smov [#allocation3]  }
  0x4b   : > { %s2559_s9 = sshll.u32 %s2682_s16, 4  ;;  %s2560_s9 = int_to_ptr.vmem [resolvable:$false] %s2559_s9 }
  0x4c   : > { %p2557_p9 = pnand %p2555_p6, %p2543_p7  ;;  %s2561_s15 = scalar_lea.vmem %s2560_s9, 8192 }
  0x4d   : > { %p2562_p1 = scmp.lt.s32.totalorder %s242_s12, %s2560_s9  ;;  %p2563_p4 = scmp.lt.s32.totalorder %s2561_s15, %s2554_s13 }
  0x4e   : > { %p2558_p12 = pneg %p2557_p9 }
  0x4f   : > { %p2564_p8 = por %p2563_p4, %p2562_p1 }
  0x51   : > { %p2565_p11 = pnand %p2564_p8, %p2558_p12 }
  0x53   : > { %2568 = shalt.err (!%p2565_p11)
}
  0x54   : > { %s4122_s8 = smov 16   ;;  %s4123_s11 = smov 256  }
  0x55   : > { %2249 = dma.hbm_to_vmem [thread:$0]  (!%p2851_p2), %s240_s29, 4096, %s242_s12, %s230_s3, %s4123_s11, %s4123_s11, %s4122_s8  }
  0x56   : > { %p4124_p3 = scmp.ne.s32.totalorder %s4115_s7, 0 }
  0x58   : > { %253 = sbr.rel (%p4124_p3) target bundleno = 810 (0x32a), region = 40 }
  0x5d   : > { %s2865_s14 = sand.u32 1, %s2649_s19   ;;  %p4125_p10 = scmp.ne.s32.totalorder %s4113_s30, 0 }
  0x5e   : > { %s2198_s17 = sshll.u32 %s2865_s14, 8  ;;  %s256_s13 = scalar_lea.sflag [#allocation4], %s2865_s14 }
  0x5f   : > { %s2869_s16 = scalar_lea.vmem [#allocation3], %s2198_s17 }
  0x60   : > { %2628 = dma.done.wait (%p4125_p10), %s256_s13, 4096  }
  0x61   : > { %2630 = vsyncadd (%p4125_p10), %s256_s13, 4294963200  ;;  %p4126_p0 = scmp.ne.s32.totalorder %s4111_s28, 0 }
  0x63   : > { %2632 = dma.done.wait (%p4126_p0), [#allocation7], 32896  }
  0x64   : > { %2634 = vsyncadd (%p4126_p0), [#allocation7], 4294934400 }
  0x65   : > { %2636 = dma.done.wait (%p4126_p0), [#allocation10], 32768  }
  0x66   : > { %2638 = vsyncadd (%p4126_p0), [#allocation10], 4294934528  ;;  %s2883_s2 = scalar_lea.vmem [#allocation11], %s2198_s17  ;;  %p2203_p5 = scmp.ne.s32.totalorder %s2657_s21, 0 }
  0x68   : > { %303 = sbr.rel (%p2203_p5) target bundleno = 133 (0x85), region = 60 }
  0x6d   : > { %v306_v0 = vlaneseq  ;;  %v304_v2 = vld [vmem:[%s4060_s4] sm:$0x3] }
  0x6f   : > { %v307_v1 = vshrl.u32 %v306_v0, 7 }
  0x71   : > { %v308_v3 = vsub.s32 0, %v307_v1  ;;  %v312_v4 = vsub.s32 1, %v307_v1 }
  0x73   : > { %v309_v5 = vrot.slane %v304_v2, %v308_v3  ;;  %v313_v6 = vrot.slane %v304_v2, %v312_v4 }
  0x75   : > { %316 = vst [vmem:[#allocation2 + $0xb0] sm:$0xff] %v309_v5  ;;  %318 = vst [vmem:[#allocation2 + $0xd8] sm:$0xff] %v309_v5 }
  0x76   : > { %320 = vst [vmem:[#allocation2 + $0x50] sm:$0xff] %v309_v5  ;;  %322 = vst [vmem:[#allocation2 + $0x30] sm:$0xff] %v309_v5 }
  0x77   : > { %324 = vst [vmem:[#allocation2 + $0x80] sm:$0xff] %v309_v5  ;;  %326 = vst [vmem:[#allocation2 + $0xe8] sm:$0xff] %v309_v5 }
  0x78   : > { %328 = vst [vmem:[#allocation2 + $0x60] sm:$0xff] %v309_v5  ;;  %330 = vst [vmem:[#allocation2 + $0x8] sm:$0xff] %v309_v5 }
  0x79   : > { %332 = vst [vmem:[#allocation2 + $0x38] sm:$0xff] %v309_v5  ;;  %334 = vst [vmem:[#allocation2 + $0x40] sm:$0xff] %v309_v5 }
  0x7a   : > { %336 = vst [vmem:[#allocation2 + $0xe0] sm:$0xff] %v309_v5  ;;  %338 = vst [vmem:[#allocation2 + $0x70] sm:$0xff] %v309_v5 }
  0x7b   : > { %340 = vst [vmem:[#allocation2 + $0xa8] sm:$0xff] %v309_v5  ;;  %342 = vst [vmem:[#allocation2 + $0x10] sm:$0xff] %v309_v5 }
  0x7c   : > { %344 = vst [vmem:[#allocation2 + $0xa0] sm:$0xff] %v309_v5  ;;  %346 = vst [vmem:[#allocation2 + $0x20] sm:$0xff] %v309_v5 }
  0x7d   : > { %317 = vst [vmem:[#allocation2] sm:$0xff] %v313_v6  ;;  %319 = vst [vmem:[#allocation2 + $0x18] sm:$0xff] %v313_v6 }
  0x7e   : > { %321 = vst [vmem:[#allocation2 + $0x68] sm:$0xff] %v313_v6  ;;  %323 = vst [vmem:[#allocation2 + $0x48] sm:$0xff] %v313_v6 }
  0x7f   : > { %325 = vst [vmem:[#allocation2 + $0x88] sm:$0xff] %v313_v6  ;;  %327 = vst [vmem:[#allocation2 + $0xb8] sm:$0xff] %v313_v6 }
  0x80   : > { %329 = vst [vmem:[#allocation2 + $0xf0] sm:$0xff] %v313_v6  ;;  %331 = vst [vmem:[#allocation2 + $0x78] sm:$0xff] %v313_v6 }
  0x81   : > { %333 = vst [vmem:[#allocation2 + $0x58] sm:$0xff] %v313_v6  ;;  %335 = vst [vmem:[#allocation2 + $0xc8] sm:$0xff] %v313_v6 }
  0x82   : > { %337 = vst [vmem:[#allocation2 + $0x90] sm:$0xff] %v313_v6  ;;  %339 = vst [vmem:[#allocation2 + $0xc0] sm:$0xff] %v313_v6 }
  0x83   : > { %341 = vst [vmem:[#allocation2 + $0xd0] sm:$0xff] %v313_v6  ;;  %343 = vst [vmem:[#allocation2 + $0x28] sm:$0xff] %v313_v6 }
  0x84   : > { %345 = vst [vmem:[#allocation2 + $0xf8] sm:$0xff] %v313_v6  ;;  %347 = vst [vmem:[#allocation2 + $0x98] sm:$0xff] %v313_v6 }
  0x85 PF: > { %s2204_s28 = sshll.u32 %s2657_s21, 9  ;;  %v617_v7 = vld [vmem:[%s2869_s16 + $0x8] sm:$0xff]  ;;  %p2208_p2 = scmp.ne.s32.totalorder %s2657_s21, 1 }
  0x86   : > { %s2893_s7 = sshra.s32 %s2204_s28, 7  ;;  %733 = vmatprep.mubr.f32.mxu0 %v617_v7  ;;  %894 = vmatprep.mubr.f32.mxu1 %v617_v7  ;;  %s3016_s9 = sshra.s32 %s2204_s28, 3 }
  0x87   : > { %s2205_s12 = sshll.u32 %s2893_s7, 3  ;;  %s2217_s15 = sshll.u32 %s3016_s9, 4 }
  0x88   : > { %s2896_s29 = scalar_lea.vmem [#allocation6], %s2205_s12  ;;  %s3033_s8 = scalar_lea.vmem [#allocation9], %s2217_s15 }
  0x89   : > { %v414_v8 = vld [vmem:[%s2896_s29 + $0x3c8] sm:$0xff]  ;;  %v416_v9 = vld [vmem:[%s2896_s29 + $0x3d8] sm:$0xff]  ;;  %v413_v10 = vld [vmem:[%s2896_s29 + $0x3c0] sm:$0xff]  ;;  %s481_s11 = scalar_lea.vmem [#allocation8], %s2893_s7 }
  0x8a   : > { %669 = vmatprep.subr.mxu0 %v414_v8  ;;  %830 = vmatprep.subr.mxu1 %v416_v9  ;;  %v415_v11 = vld [vmem:[%s2896_s29 + $0x3d0] sm:$0xff]  ;;  %v410_v12 = vld [vmem:[%s2896_s29 + $0x388] sm:$0xff]  ;;  %v412_v13 = vld [vmem:[%s2896_s29 + $0x398] sm:$0xff] }
  0x8b   : > { %670 = vmatpush1.msra.mxu0 %v413_v10  ;;  %831 = vmatpush1.msra.mxu1 %v415_v11  ;;  %v409_v14 = vld [vmem:[%s2896_s29 + $0x380] sm:$0xff]  ;;  %v411_v15 = vld [vmem:[%s2896_s29 + $0x390] sm:$0xff]  ;;  %v406_v16 = vld [vmem:[%s2896_s29 + $0x348] sm:$0xff] }
  0x8c   : > { %671 = vmatprep.subr.mxu0 %v410_v12  ;;  %832 = vmatprep.subr.mxu1 %v412_v13  ;;  %v408_v17 = vld [vmem:[%s2896_s29 + $0x358] sm:$0xff]  ;;  %v405_v18 = vld [vmem:[%s2896_s29 + $0x340] sm:$0xff]  ;;  %v407_v19 = vld [vmem:[%s2896_s29 + $0x350] sm:$0xff] }
  0x8d   : > { %672 = vmatpush1.msra.mxu0 %v409_v14  ;;  %833 = vmatpush1.msra.mxu1 %v411_v15  ;;  %v402_v20 = vld [vmem:[%s2896_s29 + $0x308] sm:$0xff]  ;;  %v404_v21 = vld [vmem:[%s2896_s29 + $0x318] sm:$0xff]  ;;  %v401_v22 = vld [vmem:[%s2896_s29 + $0x300] sm:$0xff] }
  0x8e   : > { %673 = vmatprep.subr.mxu0 %v406_v16  ;;  %834 = vmatprep.subr.mxu1 %v408_v17  ;;  %v403_v23 = vld [vmem:[%s2896_s29 + $0x310] sm:$0xff]  ;;  %v398_v24 = vld [vmem:[%s2896_s29 + $0x2c8] sm:$0xff]  ;;  %v400_v25 = vld [vmem:[%s2896_s29 + $0x2d8] sm:$0xff] }
  0x8f   : > { %674 = vmatpush1.msra.mxu0 %v405_v18  ;;  %835 = vmatpush1.msra.mxu1 %v407_v19  ;;  %v397_v26 = vld [vmem:[%s2896_s29 + $0x2c0] sm:$0xff]  ;;  %v399_v27 = vld [vmem:[%s2896_s29 + $0x2d0] sm:$0xff]  ;;  %v394_v28 = vld [vmem:[%s2896_s29 + $0x288] sm:$0xff] }
  0x90   : > { %675 = vmatprep.subr.mxu0 %v402_v20  ;;  %836 = vmatprep.subr.mxu1 %v404_v21  ;;  %v396_v29 = vld [vmem:[%s2896_s29 + $0x298] sm:$0xff]  ;;  %v393_v30 = vld [vmem:[%s2896_s29 + $0x280] sm:$0xff]  ;;  %v395_v31 = vld [vmem:[%s2896_s29 + $0x290] sm:$0xff] }
  0x91   : > { %676 = vmatpush1.msra.mxu0 %v401_v22  ;;  %837 = vmatpush1.msra.mxu1 %v403_v23  ;;  %v390_v32 = vld [vmem:[%s2896_s29 + $0x248] sm:$0xff]  ;;  %v392_v33 = vld [vmem:[%s2896_s29 + $0x258] sm:$0xff]  ;;  %v389_v34 = vld [vmem:[%s2896_s29 + $0x240] sm:$0xff] }
  0x92   : > { %677 = vmatprep.subr.mxu0 %v398_v24  ;;  %838 = vmatprep.subr.mxu1 %v400_v25  ;;  %v391_v35 = vld [vmem:[%s2896_s29 + $0x250] sm:$0xff]  ;;  %v386_v36 = vld [vmem:[%s2896_s29 + $0x208] sm:$0xff]  ;;  %v388_v37 = vld [vmem:[%s2896_s29 + $0x218] sm:$0xff] }
  0x93   : > { %678 = vmatpush1.msra.mxu0 %v397_v26  ;;  %839 = vmatpush1.msra.mxu1 %v399_v27  ;;  %v385_v38 = vld [vmem:[%s2896_s29 + $0x200] sm:$0xff]  ;;  %v387_v39 = vld [vmem:[%s2896_s29 + $0x210] sm:$0xff]  ;;  %v382_v40 = vld [vmem:[%s2896_s29 + $0x1c8] sm:$0xff] }
  0x94   : > { %679 = vmatprep.subr.mxu0 %v394_v28  ;;  %840 = vmatprep.subr.mxu1 %v396_v29  ;;  %v384_v41 = vld [vmem:[%s2896_s29 + $0x1d8] sm:$0xff]  ;;  %v381_v42 = vld [vmem:[%s2896_s29 + $0x1c0] sm:$0xff]  ;;  %v383_v43 = vld [vmem:[%s2896_s29 + $0x1d0] sm:$0xff] }
  0x95   : > { %680 = vmatpush1.msra.mxu0 %v393_v30  ;;  %841 = vmatpush1.msra.mxu1 %v395_v31  ;;  %v378_v44 = vld [vmem:[%s2896_s29 + $0x188] sm:$0xff]  ;;  %v380_v45 = vld [vmem:[%s2896_s29 + $0x198] sm:$0xff]  ;;  %v377_v46 = vld [vmem:[%s2896_s29 + $0x180] sm:$0xff] }
  0x96   : > { %681 = vmatprep.subr.mxu0 %v390_v32  ;;  %842 = vmatprep.subr.mxu1 %v392_v33  ;;  %v379_v47 = vld [vmem:[%s2896_s29 + $0x190] sm:$0xff]  ;;  %v374_v48 = vld [vmem:[%s2896_s29 + $0x148] sm:$0xff]  ;;  %v376_v49 = vld [vmem:[%s2896_s29 + $0x158] sm:$0xff] }
  0x97   : > { %682 = vmatpush1.msra.mxu0 %v389_v34  ;;  %843 = vmatpush1.msra.mxu1 %v391_v35  ;;  %v373_v50 = vld [vmem:[%s2896_s29 + $0x140] sm:$0xff]  ;;  %v375_v51 = vld [vmem:[%s2896_s29 + $0x150] sm:$0xff]  ;;  %v370_v52 = vld [vmem:[%s2896_s29 + $0x108] sm:$0xff] }
  0x98   : > { %683 = vmatprep.subr.mxu0 %v386_v36  ;;  %844 = vmatprep.subr.mxu1 %v388_v37  ;;  %v372_v53 = vld [vmem:[%s2896_s29 + $0x118] sm:$0xff]  ;;  %v369_v54 = vld [vmem:[%s2896_s29 + $0x100] sm:$0xff]  ;;  %v371_v55 = vld [vmem:[%s2896_s29 + $0x110] sm:$0xff] }
  0x99   : > { %684 = vmatpush1.msra.mxu0 %v385_v38  ;;  %845 = vmatpush1.msra.mxu1 %v387_v39  ;;  %v366_v56 = vld [vmem:[%s2896_s29 + $0xc8] sm:$0xff]  ;;  %v368_v57 = vld [vmem:[%s2896_s29 + $0xd8] sm:$0xff]  ;;  %v365_v58 = vld [vmem:[%s2896_s29 + $0xc0] sm:$0xff] }
  0x9a   : > { %685 = vmatprep.subr.mxu0 %v382_v40  ;;  %846 = vmatprep.subr.mxu1 %v384_v41  ;;  %v367_v59 = vld [vmem:[%s2896_s29 + $0xd0] sm:$0xff]  ;;  %v362_v60 = vld [vmem:[%s2896_s29 + $0x88] sm:$0xff]  ;;  %v364_v61 = vld [vmem:[%s2896_s29 + $0x98] sm:$0xff] }
  0x9b   : > { %686 = vmatpush1.msra.mxu0 %v381_v42  ;;  %847 = vmatpush1.msra.mxu1 %v383_v43  ;;  %v361_v62 = vld [vmem:[%s2896_s29 + $0x80] sm:$0xff]  ;;  %v363_v63 = vld [vmem:[%s2896_s29 + $0x90] sm:$0xff]  ;;  %v358_v0 = vld [vmem:[%s2896_s29 + $0x48] sm:$0xff] }
  0x9c   : > { %687 = vmatprep.subr.mxu0 %v378_v44  ;;  %848 = vmatprep.subr.mxu1 %v380_v45  ;;  %v360_v1 = vld [vmem:[%s2896_s29 + $0x58] sm:$0xff]  ;;  %v357_v2 = vld [vmem:[%s2896_s29 + $0x40] sm:$0xff]  ;;  %v359_v3 = vld [vmem:[%s2896_s29 + $0x50] sm:$0xff] }
  0x9d   : > { %688 = vmatpush1.msra.mxu0 %v377_v46  ;;  %849 = vmatpush1.msra.mxu1 %v379_v47  ;;  %v354_v4 = vld [vmem:[%s2896_s29 + $0x8] sm:$0xff]  ;;  %v356_v5 = vld [vmem:[%s2896_s29 + $0x18] sm:$0xff]  ;;  %v353_v6 = vld [vmem:[%s2896_s29] sm:$0xff] }
  0x9e   : > { %689 = vmatprep.subr.mxu0 %v374_v48  ;;  %850 = vmatprep.subr.mxu1 %v376_v49  ;;  %v355_v7 = vld [vmem:[%s2896_s29 + $0x10] sm:$0xff]  ;;  %v478_v8 = vld [vmem:[%s2896_s29 + $0x7c8] sm:$0xff]  ;;  %v480_v9 = vld [vmem:[%s2896_s29 + $0x7d8] sm:$0xff] }
  0x9f   : > { %690 = vmatpush1.msra.mxu0 %v373_v50  ;;  %851 = vmatpush1.msra.mxu1 %v375_v51  ;;  %v477_v10 = vld [vmem:[%s2896_s29 + $0x7c0] sm:$0xff]  ;;  %v479_v11 = vld [vmem:[%s2896_s29 + $0x7d0] sm:$0xff]  ;;  %v474_v12 = vld [vmem:[%s2896_s29 + $0x788] sm:$0xff] }
  0xa0   : > { %691 = vmatprep.subr.mxu0 %v370_v52  ;;  %852 = vmatprep.subr.mxu1 %v372_v53  ;;  %v476_v13 = vld [vmem:[%s2896_s29 + $0x798] sm:$0xff]  ;;  %v473_v14 = vld [vmem:[%s2896_s29 + $0x780] sm:$0xff]  ;;  %v475_v15 = vld [vmem:[%s2896_s29 + $0x790] sm:$0xff] }
  0xa1   : > { %692 = vmatpush1.msra.mxu0 %v369_v54  ;;  %853 = vmatpush1.msra.mxu1 %v371_v55  ;;  %v470_v16 = vld [vmem:[%s2896_s29 + $0x748] sm:$0xff]  ;;  %v472_v17 = vld [vmem:[%s2896_s29 + $0x758] sm:$0xff]  ;;  %v469_v18 = vld [vmem:[%s2896_s29 + $0x740] sm:$0xff] }
  0xa2   : > { %693 = vmatprep.subr.mxu0 %v366_v56  ;;  %854 = vmatprep.subr.mxu1 %v368_v57  ;;  %v471_v19 = vld [vmem:[%s2896_s29 + $0x750] sm:$0xff]  ;;  %v466_v20 = vld [vmem:[%s2896_s29 + $0x708] sm:$0xff]  ;;  %v468_v21 = vld [vmem:[%s2896_s29 + $0x718] sm:$0xff] }
  0xa3   : > { %694 = vmatpush1.msra.mxu0 %v365_v58  ;;  %855 = vmatpush1.msra.mxu1 %v367_v59  ;;  %v465_v22 = vld [vmem:[%s2896_s29 + $0x700] sm:$0xff]  ;;  %v467_v23 = vld [vmem:[%s2896_s29 + $0x710] sm:$0xff]  ;;  %v462_v24 = vld [vmem:[%s2896_s29 + $0x6c8] sm:$0xff] }
  0xa4   : > { %695 = vmatprep.subr.mxu0 %v362_v60  ;;  %856 = vmatprep.subr.mxu1 %v364_v61  ;;  %v464_v25 = vld [vmem:[%s2896_s29 + $0x6d8] sm:$0xff]  ;;  %v461_v26 = vld [vmem:[%s2896_s29 + $0x6c0] sm:$0xff]  ;;  %v463_v27 = vld [vmem:[%s2896_s29 + $0x6d0] sm:$0xff] }
  0xa5   : > { %696 = vmatpush1.msra.mxu0 %v361_v62  ;;  %857 = vmatpush1.msra.mxu1 %v363_v63  ;;  %v458_v28 = vld [vmem:[%s2896_s29 + $0x688] sm:$0xff]  ;;  %v460_v29 = vld [vmem:[%s2896_s29 + $0x698] sm:$0xff]  ;;  %v457_v30 = vld [vmem:[%s2896_s29 + $0x680] sm:$0xff] }
  0xa6   : > { %697 = vmatprep.subr.mxu0 %v358_v0  ;;  %858 = vmatprep.subr.mxu1 %v360_v1  ;;  %v459_v31 = vld [vmem:[%s2896_s29 + $0x690] sm:$0xff]  ;;  %v454_v32 = vld [vmem:[%s2896_s29 + $0x648] sm:$0xff]  ;;  %v456_v33 = vld [vmem:[%s2896_s29 + $0x658] sm:$0xff] }
  0xa7   : > { %698 = vmatpush1.msra.mxu0 %v357_v2  ;;  %859 = vmatpush1.msra.mxu1 %v359_v3  ;;  %v453_v34 = vld [vmem:[%s2896_s29 + $0x640] sm:$0xff]  ;;  %v455_v35 = vld [vmem:[%s2896_s29 + $0x650] sm:$0xff]  ;;  %v450_v36 = vld [vmem:[%s2896_s29 + $0x608] sm:$0xff] }
  0xa8   : > { %699 = vmatprep.subr.mxu0 %v354_v4  ;;  %860 = vmatprep.subr.mxu1 %v356_v5  ;;  %v452_v37 = vld [vmem:[%s2896_s29 + $0x618] sm:$0xff]  ;;  %v449_v38 = vld [vmem:[%s2896_s29 + $0x600] sm:$0xff]  ;;  %v451_v39 = vld [vmem:[%s2896_s29 + $0x610] sm:$0xff] }
  0xa9   : > { %700 = vmatpush1.msra.mxu0 %v353_v6  ;;  %861 = vmatpush1.msra.mxu1 %v355_v7  ;;  %v446_v40 = vld [vmem:[%s2896_s29 + $0x5c8] sm:$0xff]  ;;  %v448_v41 = vld [vmem:[%s2896_s29 + $0x5d8] sm:$0xff]  ;;  %v445_v42 = vld [vmem:[%s2896_s29 + $0x5c0] sm:$0xff] }
  0xaa   : > { %701 = vmatprep.subr.mxu0 %v478_v8  ;;  %862 = vmatprep.subr.mxu1 %v480_v9  ;;  %v447_v43 = vld [vmem:[%s2896_s29 + $0x5d0] sm:$0xff]  ;;  %v442_v44 = vld [vmem:[%s2896_s29 + $0x588] sm:$0xff]  ;;  %v444_v45 = vld [vmem:[%s2896_s29 + $0x598] sm:$0xff] }
  0xab   : > { %702 = vmatpush2.msra.mxu0 %v477_v10  ;;  %863 = vmatpush2.msra.mxu1 %v479_v11  ;;  %v441_v46 = vld [vmem:[%s2896_s29 + $0x580] sm:$0xff]  ;;  %v443_v47 = vld [vmem:[%s2896_s29 + $0x590] sm:$0xff]  ;;  %v438_v48 = vld [vmem:[%s2896_s29 + $0x548] sm:$0xff] }
  0xac   : > { %703 = vmatprep.subr.mxu0 %v474_v12  ;;  %864 = vmatprep.subr.mxu1 %v476_v13  ;;  %v440_v49 = vld [vmem:[%s2896_s29 + $0x558] sm:$0xff]  ;;  %v437_v50 = vld [vmem:[%s2896_s29 + $0x540] sm:$0xff]  ;;  %v439_v51 = vld [vmem:[%s2896_s29 + $0x550] sm:$0xff] }
  0xad   : > { %704 = vmatpush2.msra.mxu0 %v473_v14  ;;  %865 = vmatpush2.msra.mxu1 %v475_v15  ;;  %v434_v52 = vld [vmem:[%s2896_s29 + $0x508] sm:$0xff]  ;;  %v436_v53 = vld [vmem:[%s2896_s29 + $0x518] sm:$0xff]  ;;  %v433_v54 = vld [vmem:[%s2896_s29 + $0x500] sm:$0xff] }
  0xae   : > { %705 = vmatprep.subr.mxu0 %v470_v16  ;;  %866 = vmatprep.subr.mxu1 %v472_v17  ;;  %v435_v55 = vld [vmem:[%s2896_s29 + $0x510] sm:$0xff]  ;;  %v430_v56 = vld [vmem:[%s2896_s29 + $0x4c8] sm:$0xff]  ;;  %v432_v57 = vld [vmem:[%s2896_s29 + $0x4d8] sm:$0xff] }
  0xaf   : > { %706 = vmatpush2.msra.mxu0 %v469_v18  ;;  %867 = vmatpush2.msra.mxu1 %v471_v19  ;;  %v429_v58 = vld [vmem:[%s2896_s29 + $0x4c0] sm:$0xff]  ;;  %v431_v59 = vld [vmem:[%s2896_s29 + $0x4d0] sm:$0xff]  ;;  %v426_v60 = vld [vmem:[%s2896_s29 + $0x488] sm:$0xff] }
  0xb0   : > { %707 = vmatprep.subr.mxu0 %v466_v20  ;;  %868 = vmatprep.subr.mxu1 %v468_v21  ;;  %v428_v61 = vld [vmem:[%s2896_s29 + $0x498] sm:$0xff]  ;;  %v425_v62 = vld [vmem:[%s2896_s29 + $0x480] sm:$0xff]  ;;  %v427_v63 = vld [vmem:[%s2896_s29 + $0x490] sm:$0xff] }
  0xb1   : > { %708 = vmatpush2.msra.mxu0 %v465_v22  ;;  %869 = vmatpush2.msra.mxu1 %v467_v23  ;;  %v422_v0 = vld [vmem:[%s2896_s29 + $0x448] sm:$0xff]  ;;  %v424_v1 = vld [vmem:[%s2896_s29 + $0x458] sm:$0xff]  ;;  %v421_v2 = vld [vmem:[%s2896_s29 + $0x440] sm:$0xff] }
  0xb2   : > { %709 = vmatprep.subr.mxu0 %v462_v24  ;;  %870 = vmatprep.subr.mxu1 %v464_v25  ;;  %v423_v3 = vld [vmem:[%s2896_s29 + $0x450] sm:$0xff]  ;;  %v418_v4 = vld [vmem:[%s2896_s29 + $0x408] sm:$0xff]  ;;  %v420_v5 = vld [vmem:[%s2896_s29 + $0x418] sm:$0xff] }
  0xb3   : > { %710 = vmatpush2.msra.mxu0 %v461_v26  ;;  %871 = vmatpush2.msra.mxu1 %v463_v27  ;;  %v417_v6 = vld [vmem:[%s2896_s29 + $0x400] sm:$0xff]  ;;  %v419_v7 = vld [vmem:[%s2896_s29 + $0x410] sm:$0xff]  ;;  %v619_v9 = vld [vmem:[%s2869_s16 + $0x18] sm:$0xff] }
  0xb4   : > { %711 = vmatprep.subr.mxu0 %v458_v28  ;;  %872 = vmatprep.subr.mxu1 %v460_v29  ;;  %v616_v8 = vld [vmem:[%s2869_s16] sm:$0xff]  ;;  %v519_v10 = vld [vmem:[%s3033_s8 + $0xf8] sm:$0xff]  ;;  %v518_v12 = vld [vmem:[%s3033_s8 + $0xf0] sm:$0xff] }
  0xb5   : > { %712 = vmatpush2.msra.mxu0 %v457_v30  ;;  %873 = vmatpush2.msra.mxu1 %v459_v31  ;;  %v583_v11 = vld [vmem:[%s3033_s8 + $0x2f8] sm:$0xff]  ;;  %v582_v13 = vld [vmem:[%s3033_s8 + $0x2f0] sm:$0xff]  ;;  %v621_v15 = vld [vmem:[%s2869_s16 + $0x28] sm:$0xff] }
  0xb6   : > { %713 = vmatprep.subr.mxu0 %v454_v32  ;;  %874 = vmatprep.subr.mxu1 %v456_v33  ;;  %v618_v14 = vld [vmem:[%s2869_s16 + $0x10] sm:$0xff]  ;;  %v517_v16 = vld [vmem:[%s3033_s8 + $0xe8] sm:$0xff]  ;;  %v516_v18 = vld [vmem:[%s3033_s8 + $0xe0] sm:$0xff] }
  0xb7   : > { %714 = vmatpush2.msra.mxu0 %v453_v34  ;;  %875 = vmatpush2.msra.mxu1 %v455_v35  ;;  %v581_v17 = vld [vmem:[%s3033_s8 + $0x2e8] sm:$0xff]  ;;  %v580_v19 = vld [vmem:[%s3033_s8 + $0x2e0] sm:$0xff]  ;;  %v623_v21 = vld [vmem:[%s2869_s16 + $0x38] sm:$0xff] }
  0xb8   : > { %715 = vmatprep.subr.mxu0 %v450_v36  ;;  %876 = vmatprep.subr.mxu1 %v452_v37  ;;  %v620_v20 = vld [vmem:[%s2869_s16 + $0x20] sm:$0xff]  ;;  %v515_v22 = vld [vmem:[%s3033_s8 + $0xd8] sm:$0xff]  ;;  %v514_v24 = vld [vmem:[%s3033_s8 + $0xd0] sm:$0xff] }
  0xb9   : > { %716 = vmatpush2.msra.mxu0 %v449_v38  ;;  %877 = vmatpush2.msra.mxu1 %v451_v39  ;;  %v579_v23 = vld [vmem:[%s3033_s8 + $0x2d8] sm:$0xff]  ;;  %v578_v25 = vld [vmem:[%s3033_s8 + $0x2d0] sm:$0xff]  ;;  %v625_v27 = vld [vmem:[%s2869_s16 + $0x48] sm:$0xff] }
  0xba   : > { %717 = vmatprep.subr.mxu0 %v446_v40  ;;  %878 = vmatprep.subr.mxu1 %v448_v41  ;;  %v622_v26 = vld [vmem:[%s2869_s16 + $0x30] sm:$0xff]  ;;  %v513_v28 = vld [vmem:[%s3033_s8 + $0xc8] sm:$0xff]  ;;  %v512_v30 = vld [vmem:[%s3033_s8 + $0xc0] sm:$0xff] }
  0xbb   : > { %718 = vmatpush2.msra.mxu0 %v445_v42  ;;  %879 = vmatpush2.msra.mxu1 %v447_v43  ;;  %v577_v29 = vld [vmem:[%s3033_s8 + $0x2c8] sm:$0xff]  ;;  %v576_v31 = vld [vmem:[%s3033_s8 + $0x2c0] sm:$0xff]  ;;  %v627_v33 = vld [vmem:[%s2869_s16 + $0x58] sm:$0xff] }
  0xbc   : > { %719 = vmatprep.subr.mxu0 %v442_v44  ;;  %880 = vmatprep.subr.mxu1 %v444_v45  ;;  %v624_v32 = vld [vmem:[%s2869_s16 + $0x40] sm:$0xff]  ;;  %v511_v34 = vld [vmem:[%s3033_s8 + $0xb8] sm:$0xff]  ;;  %v510_v36 = vld [vmem:[%s3033_s8 + $0xb0] sm:$0xff] }
  0xbd   : > { %720 = vmatpush2.msra.mxu0 %v441_v46  ;;  %881 = vmatpush2.msra.mxu1 %v443_v47  ;;  %v575_v35 = vld [vmem:[%s3033_s8 + $0x2b8] sm:$0xff]  ;;  %v574_v37 = vld [vmem:[%s3033_s8 + $0x2b0] sm:$0xff]  ;;  %v629_v39 = vld [vmem:[%s2869_s16 + $0x68] sm:$0xff] }
  0xbe   : > { %721 = vmatprep.subr.mxu0 %v438_v48  ;;  %882 = vmatprep.subr.mxu1 %v440_v49  ;;  %v626_v38 = vld [vmem:[%s2869_s16 + $0x50] sm:$0xff]  ;;  %v509_v40 = vld [vmem:[%s3033_s8 + $0xa8] sm:$0xff]  ;;  %v508_v42 = vld [vmem:[%s3033_s8 + $0xa0] sm:$0xff] }
  0xbf   : > { %722 = vmatpush2.msra.mxu0 %v437_v50  ;;  %883 = vmatpush2.msra.mxu1 %v439_v51  ;;  %v573_v41 = vld [vmem:[%s3033_s8 + $0x2a8] sm:$0xff]  ;;  %v572_v43 = vld [vmem:[%s3033_s8 + $0x2a0] sm:$0xff]  ;;  %v631_v45 = vld [vmem:[%s2869_s16 + $0x78] sm:$0xff] }
  0xc0   : > { %723 = vmatprep.subr.mxu0 %v434_v52  ;;  %884 = vmatprep.subr.mxu1 %v436_v53  ;;  %v628_v44 = vld [vmem:[%s2869_s16 + $0x60] sm:$0xff]  ;;  %v507_v46 = vld [vmem:[%s3033_s8 + $0x98] sm:$0xff]  ;;  %v506_v48 = vld [vmem:[%s3033_s8 + $0x90] sm:$0xff] }
  0xc1   : > { %724 = vmatpush2.msra.mxu0 %v433_v54  ;;  %885 = vmatpush2.msra.mxu1 %v435_v55  ;;  %v571_v47 = vld [vmem:[%s3033_s8 + $0x298] sm:$0xff]  ;;  %v570_v49 = vld [vmem:[%s3033_s8 + $0x290] sm:$0xff]  ;;  %v633_v51 = vld [vmem:[%s2869_s16 + $0x88] sm:$0xff] }
  0xc2   : > { %725 = vmatprep.subr.mxu0 %v430_v56  ;;  %886 = vmatprep.subr.mxu1 %v432_v57  ;;  %v630_v50 = vld [vmem:[%s2869_s16 + $0x70] sm:$0xff]  ;;  %v505_v52 = vld [vmem:[%s3033_s8 + $0x88] sm:$0xff]  ;;  %v504_v54 = vld [vmem:[%s3033_s8 + $0x80] sm:$0xff] }
  0xc3   : > { %726 = vmatpush2.msra.mxu0 %v429_v58  ;;  %887 = vmatpush2.msra.mxu1 %v431_v59  ;;  %v569_v53 = vld [vmem:[%s3033_s8 + $0x288] sm:$0xff]  ;;  %v568_v55 = vld [vmem:[%s3033_s8 + $0x280] sm:$0xff]  ;;  %v635_v57 = vld [vmem:[%s2869_s16 + $0x98] sm:$0xff] }
  0xc4   : > { %727 = vmatprep.subr.mxu0 %v426_v60  ;;  %888 = vmatprep.subr.mxu1 %v428_v61  ;;  %v632_v56 = vld [vmem:[%s2869_s16 + $0x80] sm:$0xff]  ;;  %v503_v58 = vld [vmem:[%s3033_s8 + $0x78] sm:$0xff]  ;;  %v502_v60 = vld [vmem:[%s3033_s8 + $0x70] sm:$0xff] }
  0xc5   : > { %728 = vmatpush2.msra.mxu0 %v425_v62  ;;  %889 = vmatpush2.msra.mxu1 %v427_v63  ;;  %v567_v59 = vld [vmem:[%s3033_s8 + $0x278] sm:$0xff]  ;;  %v566_v61 = vld [vmem:[%s3033_s8 + $0x270] sm:$0xff]  ;;  %v637_v63 = vld [vmem:[%s2869_s16 + $0xa8] sm:$0xff] }
  0xc6   : > { %729 = vmatprep.subr.mxu0 %v422_v0  ;;  %890 = vmatprep.subr.mxu1 %v424_v1  ;;  %v634_v62 = vld [vmem:[%s2869_s16 + $0x90] sm:$0xff]  ;;  %v501_v0 = vld [vmem:[%s3033_s8 + $0x68] sm:$0xff] }
  0xc7   : > { %730 = vmatpush2.msra.mxu0 %v421_v2  ;;  %891 = vmatpush2.msra.mxu1 %v423_v3  ;;  %v565_v1 = vld [vmem:[%s3033_s8 + $0x268] sm:$0xff]  ;;  %v500_v2 = vld [vmem:[%s3033_s8 + $0x60] sm:$0xff] }
  0xc8   : > { %731 = vmatprep.subr.mxu0 %v418_v4  ;;  %892 = vmatprep.subr.mxu1 %v420_v5  ;;  %v564_v3 = vld [vmem:[%s3033_s8 + $0x260] sm:$0xff]  ;;  %v639_v5 = vld [vmem:[%s2869_s16 + $0xb8] sm:$0xff] }
  0xc9   : > { %732 = vmatpush2.msra.mxu0 %v417_v6  ;;  %893 = vmatpush2.msra.mxu1 %v419_v7  ;;  %v636_v4 = vld [vmem:[%s2869_s16 + $0xa0] sm:$0xff]  ;;  %v499_v6 = vld [vmem:[%s3033_s8 + $0x58] sm:$0xff] }
  0xca   : > { %734 = vmatmul.mubr.f32.vlgmr.msra.gmra.mxu0 %v616_v8  ;;  %895 = vmatmul.mubr.f32.vlgmr.msra.gmra.mxu1 %v616_v8  ;;  %v563_v7 = vld [vmem:[%s3033_s8 + $0x258] sm:$0xff]  ;;  %v498_v8 = vld [vmem:[%s3033_s8 + $0x50] sm:$0xff] }
  0xcb   : > { %739 = vmatprep.mubr.f32.mxu0 %v619_v9  ;;  %900 = vmatprep.mubr.f32.mxu1 %v619_v9  ;;  %v562_v9 = vld [vmem:[%s3033_s8 + $0x250] sm:$0xff] }
  0xcc   : > { %1599 = vmatprep.subr.mxu0 %v519_v10  ;;  %1760 = vmatprep.subr.mxu1 %v583_v11  ;;  %v638_v10 = vld [vmem:[%s2869_s16 + $0xb0] sm:$0xff]  ;;  %v641_v11 = vld [vmem:[%s2869_s16 + $0xc8] sm:$0xff] }
  0xcd   : > { %1600 = vmatpush1.msra.mxu0 %v518_v12  ;;  %1761 = vmatpush1.msra.mxu1 %v582_v13  ;;  %v497_v12 = vld [vmem:[%s3033_s8 + $0x48] sm:$0xff] }
  0xce   : > { %740 = vmatmul.mubr.f32.gmra.mxu0 %v618_v14  ;;  %901 = vmatmul.mubr.f32.gmra.mxu1 %v618_v14  ;;  %v561_v13 = vld [vmem:[%s3033_s8 + $0x248] sm:$0xff]  ;;  %v496_v14 = vld [vmem:[%s3033_s8 + $0x40] sm:$0xff] }
  0xcf   : > { %745 = vmatprep.mubr.f32.mxu0 %v621_v15  ;;  %906 = vmatprep.mubr.f32.mxu1 %v621_v15  ;;  %v560_v15 = vld [vmem:[%s3033_s8 + $0x240] sm:$0xff] }
  0xd0   : > { %1601 = vmatprep.subr.mxu0 %v517_v16  ;;  %1762 = vmatprep.subr.mxu1 %v581_v17  ;;  %v640_v16 = vld [vmem:[%s2869_s16 + $0xc0] sm:$0xff]  ;;  %v643_v17 = vld [vmem:[%s2869_s16 + $0xd8] sm:$0xff] }
  0xd1   : > { %1602 = vmatpush1.msra.mxu0 %v516_v18  ;;  %1763 = vmatpush1.msra.mxu1 %v580_v19  ;;  %v495_v18 = vld [vmem:[%s3033_s8 + $0x38] sm:$0xff] }
  0xd2   : > { %746 = vmatmul.mubr.f32.gmra.mxu0 %v620_v20  ;;  %907 = vmatmul.mubr.f32.gmra.mxu1 %v620_v20  ;;  %v559_v19 = vld [vmem:[%s3033_s8 + $0x238] sm:$0xff]  ;;  %v494_v20 = vld [vmem:[%s3033_s8 + $0x30] sm:$0xff] }
  0xd3   : > { %751 = vmatprep.mubr.f32.mxu0 %v623_v21  ;;  %912 = vmatprep.mubr.f32.mxu1 %v623_v21  ;;  %v558_v21 = vld [vmem:[%s3033_s8 + $0x230] sm:$0xff] }
  0xd4   : > { %1603 = vmatprep.subr.mxu0 %v515_v22  ;;  %1764 = vmatprep.subr.mxu1 %v579_v23  ;;  %v642_v22 = vld [vmem:[%s2869_s16 + $0xd0] sm:$0xff]  ;;  %v645_v23 = vld [vmem:[%s2869_s16 + $0xe8] sm:$0xff] }
  0xd5   : > { %1604 = vmatpush1.msra.mxu0 %v514_v24  ;;  %1765 = vmatpush1.msra.mxu1 %v578_v25  ;;  %v493_v24 = vld [vmem:[%s3033_s8 + $0x28] sm:$0xff] }
  0xd6   : > { %752 = vmatmul.mubr.f32.gmra.mxu0 %v622_v26  ;;  %913 = vmatmul.mubr.f32.gmra.mxu1 %v622_v26  ;;  %v557_v25 = vld [vmem:[%s3033_s8 + $0x228] sm:$0xff]  ;;  %v492_v26 = vld [vmem:[%s3033_s8 + $0x20] sm:$0xff] }
  0xd7   : > { %757 = vmatprep.mubr.f32.mxu0 %v625_v27  ;;  %918 = vmatprep.mubr.f32.mxu1 %v625_v27  ;;  %v556_v27 = vld [vmem:[%s3033_s8 + $0x220] sm:$0xff] }
  0xd8   : > { %1605 = vmatprep.subr.mxu0 %v513_v28  ;;  %1766 = vmatprep.subr.mxu1 %v577_v29  ;;  %v644_v28 = vld [vmem:[%s2869_s16 + $0xe0] sm:$0xff]  ;;  %v647_v29 = vld [vmem:[%s2869_s16 + $0xf8] sm:$0xff] }
  0xd9   : > { %1606 = vmatpush1.msra.mxu0 %v512_v30  ;;  %1767 = vmatpush1.msra.mxu1 %v576_v31  ;;  %v491_v30 = vld [vmem:[%s3033_s8 + $0x18] sm:$0xff] }
  0xda   : > { %758 = vmatmul.mubr.f32.gmra.mxu0 %v624_v32  ;;  %919 = vmatmul.mubr.f32.gmra.mxu1 %v624_v32  ;;  %v555_v31 = vld [vmem:[%s3033_s8 + $0x218] sm:$0xff]  ;;  %v490_v32 = vld [vmem:[%s3033_s8 + $0x10] sm:$0xff] }
  0xdb   : > { %763 = vmatprep.mubr.f32.mxu0 %v627_v33  ;;  %924 = vmatprep.mubr.f32.mxu1 %v627_v33  ;;  %v554_v33 = vld [vmem:[%s3033_s8 + $0x210] sm:$0xff] }
  0xdc   : > { %1607 = vmatprep.subr.mxu0 %v511_v34  ;;  %1768 = vmatprep.subr.mxu1 %v575_v35  ;;  %v646_v34 = vld [vmem:[%s2869_s16 + $0xf0] sm:$0xff]  ;;  %v489_v35 = vld [vmem:[%s3033_s8 + $0x8] sm:$0xff] }
  0xdd   : > { %1608 = vmatpush1.msra.mxu0 %v510_v36  ;;  %1769 = vmatpush1.msra.mxu1 %v574_v37  ;;  %v553_v36 = vld [vmem:[%s3033_s8 + $0x208] sm:$0xff]  ;;  %v488_v37 = vld [vmem:[%s3033_s8] sm:$0xff] }
  0xde   : > { %764 = vmatmul.mubr.f32.gmra.mxu0 %v626_v38  ;;  %925 = vmatmul.mubr.f32.gmra.mxu1 %v626_v38  ;;  %v552_v38 = vld [vmem:[%s3033_s8 + $0x200] sm:$0xff] }
  0xdf   : > { %769 = vmatprep.mubr.f32.mxu0 %v629_v39  ;;  %930 = vmatprep.mubr.f32.mxu1 %v629_v39  ;;  %v551_v39 = vld [vmem:[%s3033_s8 + $0x1f8] sm:$0xff] }
  0xe0   : > { %1609 = vmatprep.subr.mxu0 %v509_v40  ;;  %1770 = vmatprep.subr.mxu1 %v573_v41  ;;  %v615_v40 = vld [vmem:[%s3033_s8 + $0x3f8] sm:$0xff]  ;;  %v550_v41 = vld [vmem:[%s3033_s8 + $0x1f0] sm:$0xff] }
  0xe1   : > { %1610 = vmatpush1.msra.mxu0 %v508_v42  ;;  %1771 = vmatpush1.msra.mxu1 %v572_v43  ;;  %v614_v42 = vld [vmem:[%s3033_s8 + $0x3f0] sm:$0xff]  ;;  %v549_v43 = vld [vmem:[%s3033_s8 + $0x1e8] sm:$0xff] }
  0xe2   : > { %770 = vmatmul.mubr.f32.gmra.mxu0 %v628_v44  ;;  %931 = vmatmul.mubr.f32.gmra.mxu1 %v628_v44  ;;  %v613_v44 = vld [vmem:[%s3033_s8 + $0x3e8] sm:$0xff] }
  0xe3   : > { %775 = vmatprep.mubr.f32.mxu0 %v631_v45  ;;  %936 = vmatprep.mubr.f32.mxu1 %v631_v45  ;;  %v548_v45 = vld [vmem:[%s3033_s8 + $0x1e0] sm:$0xff] }
  0xe4   : > { %1611 = vmatprep.subr.mxu0 %v507_v46  ;;  %1772 = vmatprep.subr.mxu1 %v571_v47  ;;  %v612_v46 = vld [vmem:[%s3033_s8 + $0x3e0] sm:$0xff]  ;;  %v547_v47 = vld [vmem:[%s3033_s8 + $0x1d8] sm:$0xff] }
  0xe5   : > { %1612 = vmatpush1.msra.mxu0 %v506_v48  ;;  %1773 = vmatpush1.msra.mxu1 %v570_v49  ;;  %v611_v48 = vld [vmem:[%s3033_s8 + $0x3d8] sm:$0xff]  ;;  %v546_v49 = vld [vmem:[%s3033_s8 + $0x1d0] sm:$0xff] }
  0xe6   : > { %776 = vmatmul.mubr.f32.gmra.mxu0 %v630_v50  ;;  %937 = vmatmul.mubr.f32.gmra.mxu1 %v630_v50  ;;  %v610_v50 = vld [vmem:[%s3033_s8 + $0x3d0] sm:$0xff] }
  0xe7   : > { %781 = vmatprep.mubr.f32.mxu0 %v633_v51  ;;  %942 = vmatprep.mubr.f32.mxu1 %v633_v51  ;;  %v545_v51 = vld [vmem:[%s3033_s8 + $0x1c8] sm:$0xff] }
  0xe8   : > { %1613 = vmatprep.subr.mxu0 %v505_v52  ;;  %1774 = vmatprep.subr.mxu1 %v569_v53  ;;  %v609_v52 = vld [vmem:[%s3033_s8 + $0x3c8] sm:$0xff]  ;;  %v544_v53 = vld [vmem:[%s3033_s8 + $0x1c0] sm:$0xff] }
  0xe9   : > { %1614 = vmatpush1.msra.mxu0 %v504_v54  ;;  %1775 = vmatpush1.msra.mxu1 %v568_v55  ;;  %v608_v54 = vld [vmem:[%s3033_s8 + $0x3c0] sm:$0xff]  ;;  %v543_v55 = vld [vmem:[%s3033_s8 + $0x1b8] sm:$0xff] }
  0xea   : > { %782 = vmatmul.mubr.f32.gmra.mxu0 %v632_v56  ;;  %943 = vmatmul.mubr.f32.gmra.mxu1 %v632_v56  ;;  %v607_v56 = vld [vmem:[%s3033_s8 + $0x3b8] sm:$0xff] }
  0xeb   : > { %787 = vmatprep.mubr.f32.mxu0 %v635_v57  ;;  %948 = vmatprep.mubr.f32.mxu1 %v635_v57  ;;  %v542_v57 = vld [vmem:[%s3033_s8 + $0x1b0] sm:$0xff] }
  0xec   : > { %1615 = vmatprep.subr.mxu0 %v503_v58  ;;  %1776 = vmatprep.subr.mxu1 %v567_v59  ;;  %v606_v58 = vld [vmem:[%s3033_s8 + $0x3b0] sm:$0xff]  ;;  %v541_v59 = vld [vmem:[%s3033_s8 + $0x1a8] sm:$0xff] }
  0xed   : > { %1616 = vmatpush1.msra.mxu0 %v502_v60  ;;  %1777 = vmatpush1.msra.mxu1 %v566_v61  ;;  %v605_v60 = vld [vmem:[%s3033_s8 + $0x3a8] sm:$0xff]  ;;  %v540_v61 = vld [vmem:[%s3033_s8 + $0x1a0] sm:$0xff] }
  0xee   : > { %788 = vmatmul.mubr.f32.gmra.mxu0 %v634_v62  ;;  %949 = vmatmul.mubr.f32.gmra.mxu1 %v634_v62  ;;  %v604_v62 = vld [vmem:[%s3033_s8 + $0x3a0] sm:$0xff] }
  0xef   : > { %793 = vmatprep.mubr.f32.mxu0 %v637_v63  ;;  %954 = vmatprep.mubr.f32.mxu1 %v637_v63  ;;  %v539_v63 = vld [vmem:[%s3033_s8 + $0x198] sm:$0xff] }
  0xf0   : > { %1617 = vmatprep.subr.mxu0 %v501_v0  ;;  %1778 = vmatprep.subr.mxu1 %v565_v1  ;;  %v603_v0 = vld [vmem:[%s3033_s8 + $0x398] sm:$0xff]  ;;  %v538_v1 = vld [vmem:[%s3033_s8 + $0x190] sm:$0xff] }
  0xf1   : > { %1618 = vmatpush1.msra.mxu0 %v500_v2  ;;  %1779 = vmatpush1.msra.mxu1 %v564_v3  ;;  %v602_v2 = vld [vmem:[%s3033_s8 + $0x390] sm:$0xff]  ;;  %v537_v3 = vld [vmem:[%s3033_s8 + $0x188] sm:$0xff] }
  0xf2   : > { %794 = vmatmul.mubr.f32.gmra.mxu0 %v636_v4  ;;  %955 = vmatmul.mubr.f32.gmra.mxu1 %v636_v4  ;;  %v601_v4 = vld [vmem:[%s3033_s8 + $0x388] sm:$0xff] }
  0xf3   : > { %799 = vmatprep.mubr.f32.mxu0 %v639_v5  ;;  %960 = vmatprep.mubr.f32.mxu1 %v639_v5  ;;  %v536_v5 = vld [vmem:[%s3033_s8 + $0x180] sm:$0xff] }
  0xf4   : > { %1619 = vmatprep.subr.mxu0 %v499_v6  ;;  %1780 = vmatprep.subr.mxu1 %v563_v7  ;;  %v600_v6 = vld [vmem:[%s3033_s8 + $0x380] sm:$0xff]  ;;  %v535_v7 = vld [vmem:[%s3033_s8 + $0x178] sm:$0xff] }
  0xf5   : > { %1620 = vmatpush1.msra.mxu0 %v498_v8  ;;  %1781 = vmatpush1.msra.mxu1 %v562_v9  ;;  %v599_v8 = vld [vmem:[%s3033_s8 + $0x378] sm:$0xff]  ;;  %v534_v9 = vld [vmem:[%s3033_s8 + $0x170] sm:$0xff] }
  0xf6   : > { %800 = vmatmul.mubr.f32.gmra.mxu0 %v638_v10  ;;  %961 = vmatmul.mubr.f32.gmra.mxu1 %v638_v10  ;;  %v598_v10 = vld [vmem:[%s3033_s8 + $0x370] sm:$0xff] }
  0xf7   : > { %805 = vmatprep.mubr.f32.mxu0 %v641_v11  ;;  %966 = vmatprep.mubr.f32.mxu1 %v641_v11  ;;  %v533_v11 = vld [vmem:[%s3033_s8 + $0x168] sm:$0xff] }
  0xf8   : > { %1621 = vmatprep.subr.mxu0 %v497_v12  ;;  %1782 = vmatprep.subr.mxu1 %v561_v13  ;;  %v597_v12 = vld [vmem:[%s3033_s8 + $0x368] sm:$0xff]  ;;  %v532_v13 = vld [vmem:[%s3033_s8 + $0x160] sm:$0xff] }
  0xf9   : > { %1622 = vmatpush1.msra.mxu0 %v496_v14  ;;  %1783 = vmatpush1.msra.mxu1 %v560_v15  ;;  %v596_v14 = vld [vmem:[%s3033_s8 + $0x360] sm:$0xff]  ;;  %v531_v15 = vld [vmem:[%s3033_s8 + $0x158] sm:$0xff] }
  0xfa   : > { %806 = vmatmul.mubr.f32.gmra.mxu0 %v640_v16  ;;  %967 = vmatmul.mubr.f32.gmra.mxu1 %v640_v16  ;;  %v595_v16 = vld [vmem:[%s3033_s8 + $0x358] sm:$0xff] }
  0xfb   : > { %811 = vmatprep.mubr.f32.mxu0 %v643_v17  ;;  %972 = vmatprep.mubr.f32.mxu1 %v643_v17  ;;  %v530_v17 = vld [vmem:[%s3033_s8 + $0x150] sm:$0xff] }
  0xfc   : > { %1623 = vmatprep.subr.mxu0 %v495_v18  ;;  %1784 = vmatprep.subr.mxu1 %v559_v19  ;;  %v594_v18 = vld [vmem:[%s3033_s8 + $0x350] sm:$0xff]  ;;  %v529_v19 = vld [vmem:[%s3033_s8 + $0x148] sm:$0xff] }
  0xfd   : > { %1624 = vmatpush1.msra.mxu0 %v494_v20  ;;  %1785 = vmatpush1.msra.mxu1 %v558_v21  ;;  %v593_v20 = vld [vmem:[%s3033_s8 + $0x348] sm:$0xff]  ;;  %v528_v21 = vld [vmem:[%s3033_s8 + $0x140] sm:$0xff] }
  0xfe   : > { %812 = vmatmul.mubr.f32.gmra.mxu0 %v642_v22  ;;  %973 = vmatmul.mubr.f32.gmra.mxu1 %v642_v22  ;;  %v592_v22 = vld [vmem:[%s3033_s8 + $0x340] sm:$0xff] }
  0xff   : > { %817 = vmatprep.mubr.f32.mxu0 %v645_v23  ;;  %978 = vmatprep.mubr.f32.mxu1 %v645_v23  ;;  %v527_v23 = vld [vmem:[%s3033_s8 + $0x138] sm:$0xff] }
 0x100   : > { %1625 = vmatprep.subr.mxu0 %v493_v24  ;;  %1786 = vmatprep.subr.mxu1 %v557_v25  ;;  %v591_v24 = vld [vmem:[%s3033_s8 + $0x338] sm:$0xff]  ;;  %v526_v25 = vld [vmem:[%s3033_s8 + $0x130] sm:$0xff] }
 0x101   : > { %1626 = vmatpush1.msra.mxu0 %v492_v26  ;;  %1787 = vmatpush1.msra.mxu1 %v556_v27  ;;  %v590_v26 = vld [vmem:[%s3033_s8 + $0x330] sm:$0xff]  ;;  %v525_v27 = vld [vmem:[%s3033_s8 + $0x128] sm:$0xff] }
 0x102   : > { %818 = vmatmul.mubr.f32.gmra.mxu0 %v644_v28  ;;  %979 = vmatmul.mubr.f32.gmra.mxu1 %v644_v28  ;;  %v589_v28 = vld [vmem:[%s3033_s8 + $0x328] sm:$0xff] }
 0x103   : > { %823 = vmatprep.mubr.f32.mxu0 %v647_v29  ;;  %984 = vmatprep.mubr.f32.mxu1 %v647_v29  ;;  %v524_v29 = vld [vmem:[%s3033_s8 + $0x120] sm:$0xff] }
 0x104   : > { %1627 = vmatprep.subr.mxu0 %v491_v30  ;;  %1788 = vmatprep.subr.mxu1 %v555_v31  ;;  %v588_v30 = vld [vmem:[%s3033_s8 + $0x320] sm:$0xff]  ;;  %v523_v31 = vld [vmem:[%s3033_s8 + $0x118] sm:$0xff] }
 0x105   : > { %1628 = vmatpush1.msra.mxu0 %v490_v32  ;;  %1789 = vmatpush1.msra.mxu1 %v554_v33  ;;  %v587_v32 = vld [vmem:[%s3033_s8 + $0x318] sm:$0xff]  ;;  %v522_v33 = vld [vmem:[%s3033_s8 + $0x110] sm:$0xff] }
 0x106   : > { %824 = vmatmul.mubr.f32.gmra.mxu0 %v646_v34  ;;  %985 = vmatmul.mubr.f32.gmra.mxu1 %v646_v34  ;;  %v586_v34 = vld [vmem:[%s3033_s8 + $0x310] sm:$0xff] }
 0x107   : > { %1629 = vmatprep.subr.mxu0 %v489_v35  ;;  %1790 = vmatprep.subr.mxu1 %v553_v36  ;;  %v521_v35 = vld [vmem:[%s3033_s8 + $0x108] sm:$0xff] }
 0x108   : > { %1630 = vmatpush1.msra.mxu0 %v488_v37  ;;  %1791 = vmatpush1.msra.mxu1 %v552_v38  ;;  %v585_v36 = vld [vmem:[%s3033_s8 + $0x308] sm:$0xff]  ;;  %v520_v37 = vld [vmem:[%s3033_s8 + $0x100] sm:$0xff] }
 0x109   : > { %1631 = vmatprep.subr.mxu0 %v551_v39  ;;  %1792 = vmatprep.subr.mxu1 %v615_v40  ;;  %v584_v38 = vld [vmem:[%s3033_s8 + $0x300] sm:$0xff]  ;;  %v649_v39 = vlaneseq }
 0x10a   : > { %1632 = vmatpush2.msra.mxu0 %v550_v41  ;;  %1793 = vmatpush2.msra.mxu1 %v614_v42 }
 0x10b   : > { %1633 = vmatprep.subr.mxu0 %v549_v43  ;;  %1794 = vmatprep.subr.mxu1 %v613_v44  ;;  %v650_v40 = vshrl.u32 %v649_v39, 7  ;;  %v482_v43 = vld [vmem:[%s481_s11] sm:$0xf] }
 0x10c   : > { %1634 = vmatpush2.msra.mxu0 %v548_v45  ;;  %1795 = vmatpush2.msra.mxu1 %v612_v46 }
 0x10d   : > { %1635 = vmatprep.subr.mxu0 %v547_v47  ;;  %1796 = vmatprep.subr.mxu1 %v611_v48  ;;  %v651_v41 = vsub.s32 0, %v650_v40  ;;  %v659_v42 = vsub.s32 2, %v650_v40  ;;  %v655_v44 = vsub.s32 1, %v650_v40  ;;  %v663_v45 = vsub.s32 3, %v650_v40 }
 0x10e   : > { %1636 = vmatpush2.msra.mxu0 %v546_v49  ;;  %1797 = vmatpush2.msra.mxu1 %v610_v50 }
 0x10f   : > { %1637 = vmatprep.subr.mxu0 %v545_v51  ;;  %1798 = vmatprep.subr.mxu1 %v609_v52  ;;  %v3193_v46 = vrot.slane %v482_v43, %v651_v41  ;;  %v3195_v47 = vrot.slane %v482_v43, %v659_v42  ;;  %v3197_v50 = vrot.slane %v482_v43, %v655_v44 }
 0x110   : > { %1638 = vmatpush2.msra.mxu0 %v544_v53  ;;  %1799 = vmatpush2.msra.mxu1 %v608_v54  ;;  %v3199_v51 = vrot.slane %v482_v43, %v663_v45 }
 0x111   : > { %1639 = vmatprep.subr.mxu0 %v543_v55  ;;  %1800 = vmatprep.subr.mxu1 %v607_v56 }
 0x112   : > { %1640 = vmatpush2.msra.mxu0 %v542_v57  ;;  %1801 = vmatpush2.msra.mxu1 %v606_v58 }
 0x113   : > { %1641 = vmatprep.subr.mxu0 %v541_v59  ;;  %1802 = vmatprep.subr.mxu1 %v605_v60 }
 0x114   : > { %1642 = vmatpush2.msra.mxu0 %v540_v61  ;;  %1803 = vmatpush2.msra.mxu1 %v604_v62 }
 0x115   : > { %1643 = vmatprep.subr.mxu0 %v539_v63  ;;  %1804 = vmatprep.subr.mxu1 %v603_v0 }
 0x116   : > { %1644 = vmatpush2.msra.mxu0 %v538_v1  ;;  %1805 = vmatpush2.msra.mxu1 %v602_v2 }
 0x117   : > { %1645 = vmatprep.subr.mxu0 %v537_v3  ;;  %1806 = vmatprep.subr.mxu1 %v601_v4 }
 0x118   : > { %1646 = vmatpush2.msra.mxu0 %v536_v5  ;;  %1807 = vmatpush2.msra.mxu1 %v600_v6 }
 0x119   : > { %1647 = vmatprep.subr.mxu0 %v535_v7  ;;  %1808 = vmatprep.subr.mxu1 %v599_v8 }
 0x11a   : > { %1648 = vmatpush2.msra.mxu0 %v534_v9  ;;  %1809 = vmatpush2.msra.mxu1 %v598_v10 }
 0x11b   : > { %1649 = vmatprep.subr.mxu0 %v533_v11  ;;  %1810 = vmatprep.subr.mxu1 %v597_v12 }
 0x11c   : > { %1650 = vmatpush2.msra.mxu0 %v532_v13  ;;  %1811 = vmatpush2.msra.mxu1 %v596_v14 }
 0x11d   : > { %1651 = vmatprep.subr.mxu0 %v531_v15  ;;  %1812 = vmatprep.subr.mxu1 %v595_v16 }
 0x11e   : > { %1652 = vmatpush2.msra.mxu0 %v530_v17  ;;  %1813 = vmatpush2.msra.mxu1 %v594_v18 }
 0x11f   : > { %1653 = vmatprep.subr.mxu0 %v529_v19  ;;  %1814 = vmatprep.subr.mxu1 %v593_v20 }
 0x120   : > { %1654 = vmatpush2.msra.mxu0 %v528_v21  ;;  %1815 = vmatpush2.msra.mxu1 %v592_v22 }
 0x121   : > { %1655 = vmatprep.subr.mxu0 %v527_v23  ;;  %1816 = vmatprep.subr.mxu1 %v591_v24 }
 0x122   : > { %1656 = vmatpush2.msra.mxu0 %v526_v25  ;;  %1817 = vmatpush2.msra.mxu1 %v590_v26 }
 0x123   : > { %1657 = vmatprep.subr.mxu0 %v525_v27  ;;  %1818 = vmatprep.subr.mxu1 %v589_v28 }
 0x124   : > { %1658 = vmatpush2.msra.mxu0 %v524_v29  ;;  %1819 = vmatpush2.msra.mxu1 %v588_v30 }
 0x125   : > { %1659 = vmatprep.subr.mxu0 %v523_v31  ;;  %1820 = vmatprep.subr.mxu1 %v587_v32 }
 0x126   : > { %1660 = vmatpush2.msra.mxu0 %v522_v33  ;;  %1821 = vmatpush2.msra.mxu1 %v586_v34 }
 0x127   : > { %1661 = vmatprep.subr.mxu0 %v521_v35  ;;  %1822 = vmatprep.subr.mxu1 %v585_v36 }
 0x128   : > { %1662 = vmatpush2.msra.mxu0 %v520_v37  ;;  %1823 = vmatpush2.msra.mxu1 %v584_v38 }
 0x18a   : > { %v735_v48 = vpop.f32.mrf.mxu0  ;;  %v896_v49 = vpop.f32.mrf.mxu1 }
 0x18b   : > { %v736_v52 = vadd.f32 %v735_v48, %v3193_v46  ;;  %v897_v53 = vadd.f32 %v896_v49, %v3195_v47 }
 0x18c   : > { %v737_v54 = vpop.f32.mrf.mxu0  ;;  %v898_v55 = vpop.f32.mrf.mxu1 }
 0x18d   : > { %v1055_v56 = vmul.f32 0.044715, %v736_v52  ;;  %v1057_v57 = vmul.f32 0.044715, %v897_v53  ;;  %v3204_v58 = vadd.f32 %v737_v54, %v3197_v50  ;;  %v3207_v59 = vadd.f32 %v898_v55, %v3199_v51 }
 0x18e   : > { %v741_v60 = vpop.f32.mrf.mxu0  ;;  %v902_v61 = vpop.f32.mrf.mxu1  ;;  %v3223_v14 = vmul.f32 0.5, %v736_v52  ;;  %v3235_v23 = vmul.f32 0.5, %v897_v53 }
 0x18f   : > { %v1119_v62 = vmul.f32 %v1055_v56, %v736_v52  ;;  %v1121_v63 = vmul.f32 %v1057_v57, %v897_v53  ;;  %v3210_v0 = vadd.f32 %v741_v60, %v3193_v46  ;;  %v1056_v5 = vmul.f32 0.044715, %v3204_v58 }
 0x190   : > { %v743_v1 = vpop.f32.mrf.mxu0  ;;  %v904_v2 = vpop.f32.mrf.mxu1  ;;  %v1058_v6 = vmul.f32 0.044715, %v3207_v59  ;;  %v3215_v7 = vadd.f32 %v902_v61, %v3195_v47  ;;  %v3246_v32 = vmul.f32 0.5, %v3204_v58  ;;  %v3253_v37 = vmul.f32 0.5, %v3207_v59 }
 0x191   : > { %v1183_v3 = vmul.f32 %v1119_v62, %v736_v52  ;;  %v1185_v4 = vmul.f32 %v1121_v63, %v897_v53  ;;  %v3218_v12 = vadd.f32 %v743_v1, %v3197_v50  ;;  %v3221_v13 = vadd.f32 %v904_v2, %v3199_v51 }
 0x192   : > { %v747_v8 = vpop.f32.mrf.mxu0  ;;  %v908_v9 = vpop.f32.mrf.mxu1  ;;  %v1059_v15 = vmul.f32 0.044715, %v3210_v0  ;;  %v1120_v24 = vmul.f32 %v1056_v5, %v3204_v58  ;;  %v1122_v25 = vmul.f32 %v1058_v6, %v3207_v59  ;;  %v1061_v26 = vmul.f32 0.044715, %v3215_v7 }
 0x193   : > { %v1247_v10 = vadd.f32 %v1183_v3, %v736_v52  ;;  %v1249_v11 = vadd.f32 %v1185_v4, %v897_v53  ;;  %v3227_v16 = vadd.f32 %v747_v8, %v3193_v46  ;;  %v3230_v21 = vadd.f32 %v908_v9, %v3195_v47 }
 0x194   : > { %v749_v17 = vpop.f32.mrf.mxu0  ;;  %v910_v18 = vpop.f32.mrf.mxu1  ;;  %v1060_v29 = vmul.f32 0.044715, %v3218_v12  ;;  %v1062_v30 = vmul.f32 0.044715, %v3221_v13  ;;  %v3256_v38 = vmul.f32 %v1059_v15, %v3210_v0  ;;  %v3261_v41 = vmul.f32 %v1061_v26, %v3215_v7 }
 0x195   : > { %v1311_v19 = vmul.f32 0.7978846, %v1247_v10  ;;  %v1313_v20 = vmul.f32 0.7978846, %v1249_v11  ;;  %v3233_v22 = vadd.f32 %v749_v17, %v3197_v50  ;;  %v3243_v31 = vadd.f32 %v910_v18, %v3199_v51 }
 0x196   : > { %v753_v27 = vpop.f32.mrf.mxu0  ;;  %v914_v28 = vpop.f32.mrf.mxu1  ;;  %v1063_v33 = vmul.f32 0.044715, %v3227_v16  ;;  %v1065_v39 = vmul.f32 0.044715, %v3230_v21  ;;  %v1184_v45 = vmul.f32 %v1120_v24, %v3204_v58  ;;  %v1186_v48 = vmul.f32 %v1122_v25, %v3207_v59 }
 0x197   : > { %2335 = vtanh.f32 %v1311_v19  ;;  %v3250_v34 = vadd.f32 %v753_v27, %v3193_v46  ;;  %v1064_v40 = vmul.f32 0.044715, %v3233_v22  ;;  %v3264_v42 = vadd.f32 %v914_v28, %v3195_v47 }
 0x198   : > { %v755_v35 = vpop.f32.mrf.mxu0  ;;  %v916_v36 = vpop.f32.mrf.mxu1  ;;  %2337 = vtanh.f32 %v1313_v20  ;;  %v1124_v49 = vmul.f32 %v1060_v29, %v3218_v12  ;;  %v3270_v52 = vmul.f32 %v1062_v30, %v3221_v13  ;;  %v1066_v53 = vmul.f32 0.044715, %v3243_v31 }
 0x199   : > { %v3274_v54 = vadd.f32 %v755_v35, %v3197_v50  ;;  %v3277_v55 = vmul.f32 %v1063_v33, %v3227_v16  ;;  %v1067_v56 = vmul.f32 0.044715, %v3250_v34  ;;  %v1248_v61 = vadd.f32 %v1184_v45, %v3204_v58 }
 0x19a   : > { %v759_v43 = vpop.f32.mrf.mxu0  ;;  %v920_v44 = vpop.f32.mrf.mxu1  ;;  %v1250_v62 = vadd.f32 %v1186_v48, %v3207_v59  ;;  %v3283_v63 = vmul.f32 %v1065_v39, %v3230_v21  ;;  %v3286_v1 = vmul.f32 %v1064_v40, %v3233_v22  ;;  %v3289_v2 = vadd.f32 %v916_v36, %v3199_v51 }
 0x19b   : > { %v3292_v3 = vadd.f32 %v759_v43, %v3193_v46  ;;  %v1069_v4 = vmul.f32 0.044715, %v3264_v42  ;;  %v3296_v5 = vadd.f32 %v920_v44, %v3195_v47  ;;  %v1312_v59 = vmul.f32 0.7978846, %v1248_v61 }
 0x19c   : > { %v761_v57 = vpop.f32.mrf.mxu0  ;;  %v922_v60 = vpop.f32.mrf.mxu1  ;;  %v1314_v8 = vmul.f32 0.7978846, %v1250_v62  ;;  %v3299_v9 = vmul.f32 %v1066_v53, %v3243_v31  ;;  %v1068_v10 = vmul.f32 0.044715, %v3274_v54  ;;  %v3309_v17 = vmul.f32 %v1067_v56, %v3250_v34 }
 0x19d   : > { %4127 = vst [vmem:[#allocation16_spill] sm:$0xff] %v3292_v3  ;;  %4128 = vst [vmem:[#allocation17_spill] sm:$0xff] %v3296_v5  ;;  %v3303_v11 = vadd.f32 %v761_v57, %v3197_v50  ;;  %v3306_v15 = vadd.f32 %v922_v60, %v3199_v51  ;;  %2339 = vtanh.f32 %v1312_v59  ;;  %v1070_v25 = vmul.f32 0.044715, %v3289_v2 }
 0x19e   : > { %v765_v58 = vpop.f32.mrf.mxu0  ;;  %v926_v6 = vpop.f32.mrf.mxu1  ;;  %v1071_v26 = vmul.f32 0.044715, %v3292_v3  ;;  %v3326_v29 = vmul.f32 %v1069_v4, %v3264_v42  ;;  %v1073_v30 = vmul.f32 0.044715, %v3296_v5  ;;  %2341 = vtanh.f32 %v1314_v8 }
 0x19f   : > { %v3312_v18 = vadd.f32 %v765_v58, %v3193_v46  ;;  %v3315_v19 = vadd.f32 %v926_v6, %v3195_v47  ;;  %v1188_v36 = vmul.f32 %v1124_v49, %v3218_v12  ;;  %v3331_v39 = vmul.f32 %v1068_v10, %v3274_v54 }
 0x1a0   : > { %v767_v20 = vpop.f32.mrf.mxu0  ;;  %v928_v24 = vpop.f32.mrf.mxu1  ;;  %v1072_v40 = vmul.f32 0.044715, %v3303_v11  ;;  %v1074_v43 = vmul.f32 0.044715, %v3306_v15  ;;  %v3345_v61 = vmul.f32 %v1070_v25, %v3289_v2  ;;  %v3348_v62 = vmul.f32 %v1071_v26, %v3292_v3 }
 0x1a1   : > { %4129 = vst [vmem:[#allocation18_spill] sm:$0xff] %v3312_v18  ;;  %4130 = vst [vmem:[#allocation19_spill] sm:$0xff] %v3315_v19  ;;  %v3320_v27 = vadd.f32 %v767_v20, %v3197_v50  ;;  %v3323_v28 = vadd.f32 %v928_v24, %v3199_v51  ;;  %v1075_v45 = vmul.f32 0.044715, %v3312_v18  ;;  %v1077_v48 = vmul.f32 0.044715, %v3315_v19 }
 0x1a2   : > { %v771_v33 = vpop.f32.mrf.mxu0  ;;  %v932_v35 = vpop.f32.mrf.mxu1  ;;  %4135 = vst [vmem:[#allocation24_spill] sm:$0xff] %v3348_v62  ;;  %v3353_v59 = vmul.f32 %v1073_v30, %v3296_v5  ;;  %v3359_v24 = vmul.f32 0.5, %v3218_v12  ;;  %v1252_v25 = vadd.f32 %v1188_v36, %v3218_v12  ;;  %v3363_v26 = vmul.f32 %v1072_v40, %v3303_v11 }
 0x1a3   : > { %4131 = vst [vmem:[#allocation20_spill] sm:$0xff] %v3320_v27  ;;  %4132 = vst [vmem:[#allocation21_spill] sm:$0xff] %v3323_v28  ;;  %v3336_v44 = vadd.f32 %v771_v33, %v3193_v46  ;;  %v1076_v53 = vmul.f32 0.044715, %v3320_v27  ;;  %v3342_v56 = vadd.f32 %v932_v35, %v3195_v47  ;;  %v1078_v4 = vmul.f32 0.044715, %v3323_v28 }
 0x1a4   : > { %v773_v49 = vpop.f32.mrf.mxu0  ;;  %v934_v57 = vpop.f32.mrf.mxu1  ;;  %4136 = vst [vmem:[#allocation25_spill] sm:$0xff] %v3353_v59  ;;  %v3366_v33 = vmul.f32 %v1074_v43, %v3306_v15  ;;  %v3376_v59 = vmul.f32 %v1077_v48, %v3315_v19  ;;  %v3382_v40 = vmul.f32 0.5, %v3221_v13  ;;  %v1316_v19 = vmul.f32 0.7978846, %v1252_v25 }
 0x1a5   : > { %4133 = vst [vmem:[#allocation22_spill] sm:$0xff] %v3336_v44  ;;  %4134 = vst [vmem:[#allocation23_spill] sm:$0xff] %v3342_v56  ;;  %v2336_v60 = vpop.eup %2335  ;;  %v1079_v58 = vmul.f32 0.044715, %v3336_v44  ;;  %v3356_v8 = vadd.f32 %v773_v49, %v3197_v50  ;;  %v1081_v35 = vmul.f32 0.044715, %v3342_v56  ;;  %v3370_v30 = vadd.f32 %v934_v57, %v3199_v51 }
 0x1a6   : > { %v2338_v6 = vpop.eup %2337  ;;  %v777_v10 = vpop.f32.mrf.mxu0  ;;  %v3373_v49 = vmul.f32 %v1075_v45, %v3312_v18  ;;  %4139 = vst [vmem:[#allocation28_spill] sm:$0xff] %v3376_v59  ;;  %v3379_v5 = vmul.f32 %v1076_v53, %v3320_v27  ;;  %v3385_v43 = vmul.f32 %v1078_v4, %v3323_v28  ;;  %v1439_v62 = vadd.f32 1.0, %v2336_v60 }
 0x1a7   : > { %4137 = vst [vmem:[#allocation26_spill] sm:$0xff] %v3356_v8  ;;  %v938_v20 = vpop.f32.mrf.mxu1  ;;  %v3388_v57 = vmul.f32 %v1079_v58, %v3336_v44  ;;  %v1441_v45 = vadd.f32 1.0, %v2338_v6  ;;  %v3392_v48 = vadd.f32 %v777_v10, %v3193_v46  ;;  %v1190_v18 = vmul.f32 %v3270_v52, %v3221_v13 }
 0x1a8   : > { %4138 = vst [vmem:[#allocation27_spill] sm:$0xff] %v3373_v49  ;;  %4140 = vst [vmem:[#allocation29_spill] sm:$0xff] %v3379_v5  ;;  %v779_v12 = vpop.f32.mrf.mxu0  ;;  %v1080_v49 = vmul.f32 0.044715, %v3356_v8  ;;  %v3397_v5 = vmul.f32 %v1081_v35, %v3342_v56  ;;  %v1082_v4 = vmul.f32 0.044715, %v3370_v30  ;;  %v3401_v58 = vadd.f32 %v938_v20, %v3195_v47 }
 0x1a9   : > { %v940_v36 = vpop.f32.mrf.mxu1  ;;  %4141 = vst [vmem:[#allocation30_spill] sm:$0xff] %v3385_v43  ;;  %4142 = vst [vmem:[#allocation31_spill] sm:$0xff] %v3388_v57  ;;  %v3404_v60 = vadd.f32 %v779_v12, %v3197_v50  ;;  %2343 = vtanh.f32 %v1316_v19  ;;  %v1254_v52 = vadd.f32 %v1190_v18, %v3221_v13  ;;  %v1503_v12 = vmul.f32 %v1439_v62, %v3223_v14 }
 0x1aa   : > { %v783_v53 = vpop.f32.mrf.mxu0  ;;  %4143 = vst [vmem:[#allocation32_spill] sm:$0xff] %v3397_v5  ;;  %v3407_v6 = vadd.f32 %v940_v36, %v3199_v51  ;;  %v2340_v35 = vpop.eup %2339  ;;  %v1505_v36 = vmul.f32 %v1441_v45, %v3235_v23  ;;  %v1083_v56 = vmul.f32 0.044715, %v3392_v48 }
 0x1ab   : > { %v944_v59 = vpop.f32.mrf.mxu1  ;;  %v3410_v10 = vadd.f32 %v783_v53, %v3193_v46  ;;  %v1440_v53 = vadd.f32 1.0, %v2340_v35  ;;  %v1318_v13 = vmul.f32 0.7978846, %v1254_v52  ;;  %v2342_v18 = vpop.eup %2341  ;;  %v1084_v28 = vmul.f32 0.044715, %v3404_v60 }
 0x1ac   : > { %v785_v25 = vpop.f32.mrf.mxu0  ;;  %v3414_v5 = vadd.f32 %v944_v59, %v3195_v47  ;;  %v3426_v59 = vmul.f32 %v1080_v49, %v3356_v8  ;;  %v1086_v23 = vmul.f32 0.044715, %v3407_v6  ;;  %v1442_v45 = vadd.f32 1.0, %v2342_v18 }
 0x1ad   : > { %v946_v57 = vpop.f32.mrf.mxu1  ;;  %v3417_v20 = vadd.f32 %v785_v25, %v3197_v50  ;;  %v1085_v25 = vmul.f32 0.044715, %v3401_v58  ;;  %v1087_v62 = vmul.f32 0.044715, %v3410_v10  ;;  %v3437_v52 = vmul.f32 %v1082_v4, %v3370_v30 }
 0x1ae   : > { %4144 = vst [vmem:[#allocation33_spill] sm:$0xff] %v3414_v5  ;;  %v3423_v44 = vadd.f32 %v946_v57, %v3199_v51  ;;  %v789_v19 = vpop.f32.mrf.mxu0  ;;  %4145 = vst [vmem:[#allocation34_spill] sm:$0xff] %v3426_v59  ;;  %v1504_v57 = vmul.f32 %v1440_v53, %v3246_v32  ;;  %v1089_v49 = vmul.f32 0.044715, %v3414_v5  ;;  %2345 = vtanh.f32 %v1318_v13 }
 0x1af   : > { %v950_v43 = vpop.f32.mrf.mxu1  ;;  %v3431_v14 = vadd.f32 %v789_v19, %v3193_v46  ;;  %v1088_v59 = vmul.f32 0.044715, %v3417_v20  ;;  %v3442_v19 = vmul.f32 %v1083_v56, %v3392_v48  ;;  %v1506_v27 = vmul.f32 %v1442_v45, %v3253_v37 }
 0x1b0   : > { %v791_v35 = vpop.f32.mrf.mxu0  ;;  %1663 = vmatprep.mubr.f32.mxu0 %v1504_v57  ;;  %v1090_v3 = vmul.f32 0.044715, %v3423_v44  ;;  %v3447_v32 = vadd.f32 %v950_v43, %v3195_v47  ;;  %v3450_v4 = vmul.f32 %v1085_v25, %v3401_v58  ;;  %v3453_v53 = vmul.f32 %v1084_v28, %v3404_v60 }
 0x1b1   : > { %4146 = vst [vmem:[#allocation35_spill] sm:$0xff] %v3431_v14  ;;  %v952_v8 = vpop.f32.mrf.mxu1  ;;  %1664 = vmatmul.mubr.f32.vlgmr.msra.gmra.mxu0 %v1503_v12  ;;  %v1091_v13 = vmul.f32 0.044715, %v3431_v14  ;;  %v1187_v56 = vmul.f32 %v3256_v38, %v3210_v0  ;;  %v3459_v18 = vmul.f32 %v1086_v23, %v3407_v6  ;;  %v3462_v37 = vmul.f32 %v1087_v62, %v3410_v10 }
 0x1b2   : > { %1824 = vmatprep.mubr.f32.mxu1 %v1506_v27  ;;  %v3465_v43 = vadd.f32 %v791_v35, %v3197_v50  ;;  %v1189_v28 = vmul.f32 %v3261_v41, %v3215_v7  ;;  %v795_v25 = vpop.f32.mrf.mxu0  ;;  %v3470_v12 = vmul.f32 %v1089_v49, %v3414_v5  ;;  %v3473_v57 = vmul.f32 %v1088_v59, %v3417_v20 }
 0x1b3   : > { %4147 = vst [vmem:[#allocation36_spill] sm:$0xff] %v3462_v37  ;;  %1825 = vmatmul.mubr.f32.vlgmr.msra.gmra.mxu1 %v1505_v36  ;;  %v3476_v38 = vadd.f32 %v952_v8, %v3199_v51  ;;  %v1251_v23 = vadd.f32 %v1187_v56, %v3210_v0  ;;  %v956_v27 = vpop.f32.mrf.mxu1  ;;  %v3480_v62 = vmul.f32 %v1090_v3, %v3423_v44  ;;  %v1093_v45 = vmul.f32 0.044715, %v3447_v32 }
 0x1b4   : > { %4148 = vst [vmem:[#allocation37_spill] sm:$0xff] %v3470_v12  ;;  %v1253_v41 = vadd.f32 %v1189_v28, %v3215_v7  ;;  %v1192_v35 = vmul.f32 %v3286_v1, %v3233_v22  ;;  %v3487_v59 = vmul.f32 %v1091_v13, %v3431_v14  ;;  %v3490_v36 = vmul.f32 0.5, %v3210_v0  ;;  %v797_v5 = vpop.f32.mrf.mxu0 }
 0x1b5   : > { %v1315_v8 = vmul.f32 0.7978846, %v1251_v23  ;;  %v1194_v49 = vmul.f32 %v3299_v9, %v3243_v31  ;;  %v1092_v3 = vmul.f32 0.044715, %v3465_v43  ;;  %v3496_v56 = vmul.f32 0.5, %v3215_v7 }
 0x1b6   : > { %4149 = vst [vmem:[#allocation38_spill] sm:$0xff] %v3487_v59  ;;  %v1317_v12 = vmul.f32 0.7978846, %v1253_v41  ;;  %v1256_v28 = vadd.f32 %v1192_v35, %v3233_v22  ;;  %v2344_v1 = vpop.eup %2343  ;;  %v1094_v13 = vmul.f32 0.044715, %v3476_v38  ;;  %v3501_v0 = vadd.f32 %v795_v25, %v3193_v46  ;;  %v958_v59 = vpop.f32.mrf.mxu1 }
 0x1b7   : > { %2347 = vtanh.f32 %v1315_v8  ;;  %v1258_v23 = vadd.f32 %v1194_v49, %v3243_v31  ;;  %v1444_v9 = vadd.f32 1.0, %v2344_v1  ;;  %v3505_v14 = vadd.f32 %v956_v27, %v3195_v47  ;;  %v801_v27 = vpop.f32.mrf.mxu0 }
 0x1b8   : > { %2349 = vtanh.f32 %v1317_v12  ;;  %v1320_v7 = vmul.f32 0.7978846, %v1256_v28  ;;  %v3508_v41 = vmul.f32 %v1093_v45, %v3447_v32  ;;  %v3511_v35 = vmul.f32 0.5, %v3233_v22 }
 0x1b9   : > { %4150 = vst [vmem:[#allocation39_spill] sm:$0xff] %v3505_v14  ;;  %v1322_v37 = vmul.f32 0.7978846, %v1258_v23  ;;  %v1191_v25 = vmul.f32 %v3277_v55, %v3227_v16  ;;  %v1508_v8 = vmul.f32 %v1444_v9, %v3359_v24  ;;  %v3517_v49 = vmul.f32 %v1092_v3, %v3465_v43  ;;  %v962_v55 = vpop.f32.mrf.mxu1 }
 0x1ba   : > { %4151 = vst [vmem:[#allocation40_spill] sm:$0xff] %v3508_v41  ;;  %2351 = vtanh.f32 %v1320_v7  ;;  %v3520_v12 = vadd.f32 %v797_v5, %v3197_v50  ;;  %v3523_v45 = vmul.f32 %v1094_v13, %v3476_v38  ;;  %v1193_v28 = vmul.f32 %v3283_v63, %v3230_v21 }
 0x1bb   : > { %2353 = vtanh.f32 %v1322_v37  ;;  %v1255_v22 = vadd.f32 %v1191_v25, %v3227_v16  ;;  %v2346_v1 = vpop.eup %2345  ;;  %1669 = vmatprep.mubr.f32.mxu0 %v1508_v8  ;;  %v1095_v24 = vmul.f32 0.044715, %v3501_v0  ;;  %v1097_v3 = vmul.f32 0.044715, %v3505_v14 }
 0x1bc   : > { %v3531_v5 = vadd.f32 %v958_v59, %v3199_v51  ;;  %v1196_v13 = vmul.f32 %v3331_v39, %v3274_v54  ;;  %v1446_v23 = vadd.f32 1.0, %v2346_v1  ;;  %v1257_v9 = vadd.f32 %v1193_v28, %v3230_v21 }
 0x1bd   : > { %v1319_v37 = vmul.f32 0.7978846, %v1255_v22  ;;  %v3537_v7 = vadd.f32 %v801_v27, %v3193_v46  ;;  %v3540_v63 = vmul.f32 0.5, %v3243_v31  ;;  %v1096_v25 = vmul.f32 0.044715, %v3520_v12 }
 0x1be   : > { %v3544_v8 = vadd.f32 %v962_v55, %v3195_v47  ;;  %v1260_v59 = vadd.f32 %v1196_v13, %v3274_v54  ;;  %v1510_v41 = vmul.f32 %v1446_v23, %v3382_v40  ;;  %v1321_v39 = vmul.f32 0.7978846, %v1257_v9  ;;  %v803_v55 = vpop.f32.mrf.mxu0  ;;  %v964_v9 = vpop.f32.mrf.mxu1 }
 0x1bf   : > { %4152 = vst [vmem:[#allocation41_spill] sm:$0xff] %v3537_v7  ;;  %2355 = vtanh.f32 %v1319_v37  ;;  %v1198_v22 = vmul.f32 %v3345_v61, %v3289_v2  ;;  %v3551_v27 = vmul.f32 %v1095_v24, %v3501_v0  ;;  %v3554_v31 = vmul.f32 %v1097_v3, %v3505_v14 }
 0x1c0   : > { %4153 = vst [vmem:[#allocation42_spill] sm:$0xff] %v3544_v8  ;;  %v1098_v28 = vmul.f32 0.044715, %v3531_v5  ;;  %v1324_v1 = vmul.f32 0.7978846, %v1260_v59  ;;  %1830 = vmatprep.mubr.f32.mxu1 %v1510_v41  ;;  %v3558_v13 = vmul.f32 0.5, %v3227_v16  ;;  %2357 = vtanh.f32 %v1321_v39 }
 0x1c1   : > { %4154 = vst [vmem:[#allocation43_spill] sm:$0xff] %v3551_v27  ;;  %4155 = vst [vmem:[#allocation44_spill] sm:$0xff] %v3554_v31  ;;  %v1099_v40 = vmul.f32 0.044715, %v3537_v7  ;;  %v1262_v23 = vadd.f32 %v1198_v22, %v3289_v2  ;;  %v3563_v61 = vmul.f32 %v1096_v25, %v3520_v12  ;;  %v3566_v24 = vmul.f32 0.5, %v3230_v21  ;;  %v807_v31 = vpop.f32.mrf.mxu0 }
 0x1c2   : > { %2359 = vtanh.f32 %v1324_v1  ;;  %v1195_v3 = vmul.f32 %v3309_v17, %v3250_v34  ;;  %v1101_v41 = vmul.f32 0.044715, %v3544_v8  ;;  %v3572_v16 = vadd.f32 %v803_v55, %v3197_v50 }
 0x1c3   : > { %v1326_v37 = vmul.f32 0.7978846, %v1262_v23  ;;  %v1197_v59 = vmul.f32 %v3326_v29, %v3264_v42  ;;  %v3577_v25 = vmul.f32 %v1098_v28, %v3531_v5  ;;  %v3580_v21 = vmul.f32 0.5, %v3274_v54 }
 0x1c4   : > { %v2348_v39 = vpop.eup %2347  ;;  %v3583_v22 = vmul.f32 0.5, %v3289_v2  ;;  %v1259_v17 = vadd.f32 %v1195_v3, %v3250_v34  ;;  %v3587_v55 = vmul.f32 %v1099_v40, %v3537_v7  ;;  %v3591_v28 = vadd.f32 %v964_v9, %v3199_v51 }
 0x1c5   : > { %v2350_v1 = vpop.eup %2349  ;;  %v1443_v23 = vadd.f32 1.0, %v2348_v39  ;;  %2361 = vtanh.f32 %v1326_v37  ;;  %v1261_v29 = vadd.f32 %v1197_v59, %v3264_v42  ;;  %v1200_v2 = vmul.f32 %v3363_v26, %v3303_v11 }
 0x1c6   : > { %4156 = vst [vmem:[#allocation45_spill] sm:$0xff] %v3587_v55  ;;  %v1445_v14 = vadd.f32 1.0, %v2350_v1  ;;  %v1323_v54 = vmul.f32 0.7978846, %v1259_v17  ;;  %v3597_v39 = vmul.f32 %v1101_v41, %v3544_v8  ;;  %v1100_v40 = vmul.f32 0.044715, %v3572_v16  ;;  %v968_v55 = vpop.f32.mrf.mxu1 }
 0x1c7   : > { %v2352_v27 = vpop.eup %2351  ;;  %v1507_v3 = vmul.f32 %v1443_v23, %v3490_v36  ;;  %v1325_v37 = vmul.f32 0.7978846, %v1261_v29  ;;  %v3602_v9 = vadd.f32 %v807_v31, %v3193_v46  ;;  %v3605_v17 = vmul.f32 0.5, %v3250_v34  ;;  %v809_v29 = vpop.f32.mrf.mxu0 }
 0x1c8   : > { %4157 = vst [vmem:[#allocation46_spill] sm:$0xff] %v3597_v39  ;;  %v2354_v59 = vpop.eup %2353  ;;  %v1509_v1 = vmul.f32 %v1445_v14, %v3496_v56  ;;  %v1448_v7 = vadd.f32 1.0, %v2352_v27  ;;  %2363 = vtanh.f32 %v1323_v54  ;;  %v1264_v36 = vadd.f32 %v1200_v2, %v3303_v11  ;;  %v970_v54 = vpop.f32.mrf.mxu1  ;;  %v4160_v2 = vld [vmem:[#allocation16_spill] sm:$0xff] }
 0x1c9   : > { %4158 = vst [vmem:[#allocation47_spill] sm:$0xff] %v3602_v9  ;;  %1670 = vmatmul.mubr.f32.gmra.mxu0 %v1507_v3  ;;  %v1450_v26 = vadd.f32 1.0, %v2354_v59  ;;  %2365 = vtanh.f32 %v1325_v37  ;;  %v1102_v23 = vmul.f32 0.044715, %v3591_v28  ;;  %v3611_v14 = vmul.f32 0.5, %v3264_v42  ;;  %v4161_v3 = vld [vmem:[#allocation24_spill] sm:$0xff]  ;;  %v813_v8 = vpop.f32.mrf.mxu0 }
 0x1ca   : > { %1831 = vmatmul.mubr.f32.gmra.mxu1 %v1509_v1  ;;  %v1512_v41 = vmul.f32 %v1448_v7, %v3511_v35  ;;  %v1202_v56 = vmul.f32 %v3366_v33, %v3306_v15  ;;  %v3617_v31 = vmul.f32 %v1100_v40, %v3572_v16  ;;  %v1328_v34 = vmul.f32 0.7978846, %v1264_v36  ;;  %v4163_v1 = vld [vmem:[#allocation17_spill] sm:$0xff] }
 0x1cb   : > { %v1514_v27 = vmul.f32 %v1450_v26, %v3540_v63  ;;  %v1199_v37 = vmul.f32 %v4161_v3, %v4160_v2  ;;  %v1103_v7 = vmul.f32 0.044715, %v3602_v9  ;;  %v3623_v42 = vadd.f32 %v968_v55, %v3195_v47  ;;  %v4164_v26 = vld [vmem:[#allocation25_spill] sm:$0xff] }
 0x1cc   : > { %4159 = vst [vmem:[#allocation48_spill] sm:$0xff] %v3617_v31  ;;  %v2356_v35 = vpop.eup %2355  ;;  %1675 = vmatprep.mubr.f32.mxu0 %v1512_v41  ;;  %v3626_v33 = vmul.f32 0.5, %v3303_v11  ;;  %v1266_v63 = vadd.f32 %v1202_v56, %v3306_v15  ;;  %2367 = vtanh.f32 %v1328_v34  ;;  %v1201_v36 = vmul.f32 %v4164_v26, %v4163_v1 }
 0x1cd   : > { %4162 = vst [vmem:[#allocation16_spill] sm:$0xff] %v3623_v42  ;;  %1836 = vmatprep.mubr.f32.mxu1 %v1514_v27  ;;  %v1447_v40 = vadd.f32 1.0, %v2356_v35  ;;  %v1263_v59 = vadd.f32 %v1199_v37, %v4160_v2  ;;  %v2358_v3 = vpop.eup %2357  ;;  %v3633_v41 = vmul.f32 %v1102_v23, %v3591_v28  ;;  %v3636_v55 = vadd.f32 %v809_v29, %v3197_v50 }
 0x1ce   : > { %v1330_v39 = vmul.f32 0.7978846, %v1266_v63  ;;  %v3639_v11 = vadd.f32 %v970_v54, %v3199_v51  ;;  %v1449_v34 = vadd.f32 1.0, %v2358_v3  ;;  %v1265_v37 = vadd.f32 %v1201_v36, %v4163_v1  ;;  %v974_v63 = vpop.f32.mrf.mxu1 }
 0x1cf   : > { %4165 = vst [vmem:[#allocation24_spill] sm:$0xff] %v3633_v41  ;;  %4166 = vst [vmem:[#allocation17_spill] sm:$0xff] %v3636_v55  ;;  %v2360_v56 = vpop.eup %2359  ;;  %v1511_v27 = vmul.f32 %v1447_v40, %v3558_v13  ;;  %v1327_v35 = vmul.f32 0.7978846, %v1263_v59  ;;  %v1105_v31 = vmul.f32 0.044715, %v3623_v42  ;;  %v3649_v54 = vmul.f32 %v1103_v7, %v3602_v9 }
 0x1d0   : > { %v1452_v26 = vadd.f32 1.0, %v2360_v56  ;;  %v3645_v23 = vmul.f32 0.5, %v3306_v15  ;;  %2369 = vtanh.f32 %v1330_v39  ;;  %v1513_v29 = vmul.f32 %v1449_v34, %v3566_v24  ;;  %v4169_v15 = vld [vmem:[#allocation20_spill] sm:$0xff]  ;;  %v4170_v56 = vld [vmem:[#allocation29_spill] sm:$0xff]  ;;  %v4172_v34 = vld [vmem:[#allocation30_spill] sm:$0xff] }
 0x1d1   : > { %1676 = vmatmul.mubr.f32.gmra.mxu0 %v1511_v27  ;;  %4167 = vst [vmem:[#allocation25_spill] sm:$0xff] %v3649_v54  ;;  %2371 = vtanh.f32 %v1327_v35  ;;  %v1329_v13 = vmul.f32 0.7978846, %v1265_v37  ;;  %v1104_v36 = vmul.f32 0.044715, %v3636_v55  ;;  %v3654_v3 = vadd.f32 %v813_v8, %v3193_v46  ;;  %v4171_v7 = vld [vmem:[#allocation21_spill] sm:$0xff] }
 0x1d2   : > { %v2362_v40 = vpop.eup %2361  ;;  %v1516_v59 = vmul.f32 %v1452_v26, %v3580_v21  ;;  %v1204_v39 = vmul.f32 %v4170_v56, %v4169_v15  ;;  %1837 = vmatmul.mubr.f32.gmra.mxu1 %v1513_v29  ;;  %v1106_v24 = vmul.f32 0.044715, %v3639_v11  ;;  %v1206_v35 = vmul.f32 %v4172_v34, %v4171_v7  ;;  %v4175_v34 = vld [vmem:[#allocation18_spill] sm:$0xff] }
 0x1d3   : > { %4168 = vst [vmem:[#allocation49_spill] sm:$0xff] %v3654_v3  ;;  %v1454_v27 = vadd.f32 1.0, %v2362_v40  ;;  %2373 = vtanh.f32 %v1329_v13  ;;  %v3662_v37 = vmul.f32 %v1105_v31, %v3623_v42  ;;  %v3665_v21 = vmul.f32 0.5, %v4160_v2  ;;  %v4176_v31 = vld [vmem:[#allocation27_spill] sm:$0xff] }
 0x1d4   : > { %1681 = vmatprep.mubr.f32.mxu0 %v1516_v59  ;;  %v3668_v8 = vadd.f32 %v974_v63, %v3195_v47  ;;  %v1268_v26 = vadd.f32 %v1204_v39, %v4169_v15  ;;  %v3673_v13 = vmul.f32 0.5, %v4163_v1  ;;  %v1270_v56 = vadd.f32 %v1206_v35, %v4171_v7  ;;  %v815_v59 = vpop.f32.mrf.mxu0 }
 0x1d5   : > { %4173 = vst [vmem:[#allocation20_spill] sm:$0xff] %v3662_v37  ;;  %v2364_v29 = vpop.eup %2363  ;;  %v1518_v40 = vmul.f32 %v1454_v27, %v3583_v22  ;;  %v1203_v37 = vmul.f32 %v4176_v31, %v4175_v34  ;;  %v3679_v54 = vmul.f32 %v1104_v36, %v3636_v55  ;;  %v1107_v63 = vmul.f32 0.044715, %v3654_v3  ;;  %v976_v27 = vpop.f32.mrf.mxu1  ;;  %v4179_v36 = vld [vmem:[#allocation28_spill] sm:$0xff] }
 0x1d6   : > { %4174 = vst [vmem:[#allocation29_spill] sm:$0xff] %v3668_v8  ;;  %v2366_v42 = vpop.eup %2365  ;;  %v1451_v2 = vadd.f32 1.0, %v2364_v29  ;;  %v1332_v39 = vmul.f32 0.7978846, %v1268_v26  ;;  %v3683_v22 = vmul.f32 %v1106_v24, %v3639_v11  ;;  %v1334_v1 = vmul.f32 0.7978846, %v1270_v56  ;;  %v819_v26 = vpop.f32.mrf.mxu0 }
 0x1d7   : > { %4177 = vst [vmem:[#allocation21_spill] sm:$0xff] %v3679_v54  ;;  %1842 = vmatprep.mubr.f32.mxu1 %v1518_v40  ;;  %v1453_v9 = vadd.f32 1.0, %v2366_v42  ;;  %v1267_v35 = vadd.f32 %v1203_v37, %v4175_v34  ;;  %v1109_v31 = vmul.f32 0.044715, %v3668_v8  ;;  %v4178_v29 = vld [vmem:[#allocation19_spill] sm:$0xff]  ;;  %v3692_v42 = vadd.f32 %v815_v59, %v3197_v50  ;;  %v4181_v59 = vld [vmem:[#allocation26_spill] sm:$0xff] }
 0x1d8   : > { %v1515_v41 = vmul.f32 %v1451_v2, %v3605_v17  ;;  %2375 = vtanh.f32 %v1332_v39  ;;  %v1205_v54 = vmul.f32 %v4179_v36, %v4178_v29  ;;  %v3695_v37 = vmul.f32 %v1107_v63, %v3654_v3  ;;  %v4182_v39 = vld [vmem:[#allocation34_spill] sm:$0xff]  ;;  %v4186_v3 = vld [vmem:[#allocation31_spill] sm:$0xff] }
 0x1d9   : > { %v1517_v55 = vmul.f32 %v1453_v9, %v3611_v14  ;;  %2377 = vtanh.f32 %v1334_v1  ;;  %v1331_v24 = vmul.f32 0.7978846, %v1267_v35  ;;  %v2368_v40 = vpop.eup %2367  ;;  %v3698_v17 = vmul.f32 0.5, %v4169_v15 }
 0x1da   : > { %1682 = vmatmul.mubr.f32.gmra.mxu0 %v1515_v41  ;;  %4180 = vst [vmem:[#allocation30_spill] sm:$0xff] %v3695_v37  ;;  %v3701_v56 = vadd.f32 %v976_v27, %v3199_v51  ;;  %v1269_v2 = vadd.f32 %v1205_v54, %v4178_v29  ;;  %v1456_v9 = vadd.f32 1.0, %v2368_v40  ;;  %v3705_v14 = vmul.f32 0.5, %v4171_v7  ;;  %v980_v27 = vpop.f32.mrf.mxu1 }
 0x1db   : > { %1843 = vmatmul.mubr.f32.gmra.mxu1 %v1517_v55  ;;  %2379 = vtanh.f32 %v1331_v24  ;;  %v1208_v41 = vmul.f32 %v4182_v39, %v4181_v59  ;;  %v3710_v63 = vmul.f32 %v1109_v31, %v3668_v8  ;;  %v3713_v15 = vadd.f32 %v819_v26, %v3193_v46  ;;  %v821_v31 = vpop.f32.mrf.mxu0 }
 0x1dc   : > { %v1333_v1 = vmul.f32 0.7978846, %v1269_v2  ;;  %v1210_v54 = vmul.f32 %v3437_v52, %v3370_v30  ;;  %v1520_v35 = vmul.f32 %v1456_v9, %v3626_v33  ;;  %v1108_v7 = vmul.f32 0.044715, %v3692_v42  ;;  %v982_v37 = vpop.f32.mrf.mxu1 }
 0x1dd   : > { %4183 = vst [vmem:[#allocation18_spill] sm:$0xff] %v3710_v63  ;;  %4184 = vst [vmem:[#allocation27_spill] sm:$0xff] %v3713_v15  ;;  %v2370_v55 = vpop.eup %2369  ;;  %v3720_v36 = vmul.f32 0.5, %v4175_v34  ;;  %v1272_v24 = vadd.f32 %v1208_v41, %v4181_v59  ;;  %v1110_v26 = vmul.f32 0.044715, %v3701_v56  ;;  %v3725_v39 = vmul.f32 0.5, %v4178_v29 }
 0x1de   : > { %v2372_v40 = vpop.eup %2371  ;;  %v1458_v2 = vadd.f32 1.0, %v2370_v55  ;;  %2381 = vtanh.f32 %v1333_v1  ;;  %1687 = vmatprep.mubr.f32.mxu0 %v1520_v35  ;;  %v3728_v33 = vadd.f32 %v980_v27, %v3195_v47  ;;  %v1274_v34 = vadd.f32 %v1210_v54, %v3370_v30  ;;  %v4185_v29 = vld [vmem:[#allocation22_spill] sm:$0xff] }
 0x1df   : > { %v1455_v52 = vadd.f32 1.0, %v2372_v40  ;;  %v1336_v9 = vmul.f32 0.7978846, %v1272_v24  ;;  %v1111_v8 = vmul.f32 0.044715, %v3713_v15  ;;  %v3734_v55 = vadd.f32 %v821_v31, %v3197_v50 }
 0x1e0   : > { %v2374_v63 = vpop.eup %2373  ;;  %v1522_v41 = vmul.f32 %v1458_v2, %v3645_v23  ;;  %v1207_v1 = vmul.f32 %v4186_v3, %v4185_v29  ;;  %v1338_v27 = vmul.f32 0.7978846, %v1274_v34  ;;  %v3740_v54 = vmul.f32 %v1108_v7, %v3692_v42  ;;  %v4189_v2 = vld [vmem:[#allocation32_spill] sm:$0xff]  ;;  %v825_v7 = vpop.f32.mrf.mxu0 }
 0x1e1   : > { %v1519_v35 = vmul.f32 %v1455_v52, %v3665_v21  ;;  %v1457_v40 = vadd.f32 1.0, %v2374_v63  ;;  %2383 = vtanh.f32 %v1336_v9  ;;  %v3743_v23 = vmul.f32 %v1110_v26, %v3701_v56  ;;  %v4188_v63 = vld [vmem:[#allocation23_spill] sm:$0xff] }
 0x1e2   : > { %1848 = vmatprep.mubr.f32.mxu1 %v1522_v41  ;;  %v3746_v24 = vmul.f32 0.5, %v4181_v59  ;;  %v1271_v31 = vadd.f32 %v1207_v1, %v4185_v29  ;;  %2385 = vtanh.f32 %v1338_v27  ;;  %v3751_v21 = vadd.f32 %v982_v37, %v3199_v51 }
 0x1e3   : > { %4187 = vst [vmem:[#allocation19_spill] sm:$0xff] %v3743_v23  ;;  %1688 = vmatmul.mubr.f32.gmra.mxu0 %v1519_v35  ;;  %v1521_v3 = vmul.f32 %v1457_v40, %v3673_v13  ;;  %v1209_v52 = vmul.f32 %v4189_v2, %v4188_v63  ;;  %v1113_v9 = vmul.f32 0.044715, %v3728_v33  ;;  %v3757_v26 = vmul.f32 0.5, %v3370_v30  ;;  %v986_v35 = vpop.f32.mrf.mxu1 }
 0x1e4   : > { %v1335_v59 = vmul.f32 0.7978846, %v1271_v31  ;;  %v1212_v34 = vmul.f32 %v3453_v53, %v3404_v60  ;;  %v3762_v13 = vmul.f32 %v1111_v8, %v3713_v15  ;;  %v1112_v37 = vmul.f32 0.044715, %v3734_v55 }
 0x1e5   : > { %v2376_v41 = vpop.eup %2375  ;;  %1849 = vmatmul.mubr.f32.gmra.mxu1 %v1521_v3  ;;  %v1273_v1 = vadd.f32 %v1209_v52, %v4188_v63  ;;  %v1214_v40 = vmul.f32 %v3459_v18, %v3407_v6  ;;  %v3769_v31 = vadd.f32 %v825_v7, %v3193_v46  ;;  %v1114_v8 = vmul.f32 0.044715, %v3751_v21 }
 0x1e6   : > { %4190 = vst [vmem:[#allocation28_spill] sm:$0xff] %v3762_v13  ;;  %v2378_v27 = vpop.eup %2377  ;;  %v1460_v30 = vadd.f32 1.0, %v2376_v41  ;;  %2387 = vtanh.f32 %v1335_v59  ;;  %v1276_v53 = vadd.f32 %v1212_v34, %v3404_v60  ;;  %v3776_v23 = vmul.f32 %v1113_v9, %v3728_v33 }
 0x1e7   : > { %v1462_v3 = vadd.f32 1.0, %v2378_v27  ;;  %v1337_v2 = vmul.f32 0.7978846, %v1273_v1  ;;  %v1278_v13 = vadd.f32 %v1214_v40, %v3407_v6  ;;  %v3779_v18 = vadd.f32 %v986_v35, %v3195_v47 }
 0x1e8   : > { %v2380_v15 = vpop.eup %2379  ;;  %v1524_v52 = vmul.f32 %v1460_v30, %v3698_v17  ;;  %v1340_v59 = vmul.f32 0.7978846, %v1276_v53  ;;  %v3783_v41 = vmul.f32 %v1112_v37, %v3734_v55  ;;  %v1015_v1 = vmul.f32 0.5, %v4185_v29  ;;  %v827_v37 = vpop.f32.mrf.mxu0 }
 0x1e9   : > { %v1526_v46 = vmul.f32 %v1462_v3, %v3705_v14  ;;  %v1459_v7 = vadd.f32 1.0, %v2380_v15  ;;  %2389 = vtanh.f32 %v1337_v2  ;;  %v1342_v34 = vmul.f32 0.7978846, %v1278_v13 }
 0x1ea   : > { %1693 = vmatprep.mubr.f32.mxu0 %v1524_v52  ;;  %v1115_v17 = vmul.f32 0.044715, %v3769_v31  ;;  %2391 = vtanh.f32 %v1340_v59  ;;  %v3789_v35 = vmul.f32 %v1114_v8, %v3751_v21  ;;  %v1211_v14 = vmul.f32 %v3442_v19, %v3392_v48 }
 0x1eb   : > { %v2382_v9 = vpop.eup %2381  ;;  %1854 = vmatprep.mubr.f32.mxu1 %v1526_v46  ;;  %v1523_v47 = vmul.f32 %v1459_v7, %v3720_v36  ;;  %2393 = vtanh.f32 %v1342_v34  ;;  %v3794_v13 = vmul.f32 0.5, %v4188_v63  ;;  %v1117_v29 = vmul.f32 0.044715, %v3779_v18  ;;  %v4191_v7 = vld [vmem:[#allocation36_spill] sm:$0xff] }
 0x1ec   : > { %v1461_v15 = vadd.f32 1.0, %v2382_v9  ;;  %v1213_v40 = vmul.f32 %v3450_v4, %v3401_v58  ;;  %v3800_v36 = vmul.f32 0.5, %v3404_v60  ;;  %v3803_v27 = vmul.f32 0.5, %v3407_v6  ;;  %v988_v9 = vpop.f32.mrf.mxu1 }
 0x1ed   : > { %1694 = vmatmul.mubr.f32.gmra.mxu0 %v1523_v47  ;;  %v1275_v30 = vadd.f32 %v1211_v14, %v3392_v48  ;;  %v1216_v19 = vmul.f32 %v3473_v57, %v3417_v20  ;;  %v3810_v3 = vmul.f32 %v1115_v17, %v3769_v31  ;;  %v1218_v60 = vmul.f32 %v3480_v62, %v3423_v44 }
 0x1ee   : > { %v2384_v63 = vpop.eup %2383  ;;  %v1525_v53 = vmul.f32 %v1461_v15, %v3725_v39  ;;  %v1277_v4 = vadd.f32 %v1213_v40, %v3401_v58  ;;  %v3816_v6 = vadd.f32 %v827_v37, %v3197_v50  ;;  %v3820_v57 = vmul.f32 %v1117_v29, %v3779_v18  ;;  %v4192_v15 = vld [vmem:[#allocation33_spill] sm:$0xff] }
 0x1ef   : > { %v1464_v8 = vadd.f32 1.0, %v2384_v63  ;;  %v1339_v2 = vmul.f32 0.7978846, %v1275_v30  ;;  %v1280_v52 = vadd.f32 %v1216_v19, %v3417_v20  ;;  %v2386_v59 = vpop.eup %2385  ;;  %v1282_v46 = vadd.f32 %v1218_v60, %v3423_v44  ;;  %v4193_v37 = vld [vmem:[#allocation37_spill] sm:$0xff] }
 0x1f0   : > { %1855 = vmatmul.mubr.f32.gmra.mxu1 %v1525_v53  ;;  %v1341_v39 = vmul.f32 0.7978846, %v1277_v4  ;;  %v1215_v34 = vmul.f32 %v4191_v7, %v3410_v10  ;;  %v1466_v17 = vadd.f32 1.0, %v2386_v59  ;;  %v1217_v29 = vmul.f32 %v4193_v37, %v4192_v15 }
 0x1f1   : > { %v1528_v62 = vmul.f32 %v1464_v8, %v3746_v24  ;;  %2395 = vtanh.f32 %v1339_v2  ;;  %v1344_v50 = vmul.f32 0.7978846, %v1280_v52  ;;  %v1346_v47 = vmul.f32 0.7978846, %v1282_v46  ;;  %v4195_v46 = vld [vmem:[#allocation38_spill] sm:$0xff] }
 0x1f2   : > { %2397 = vtanh.f32 %v1341_v39  ;;  %v1279_v14 = vadd.f32 %v1215_v34, %v3410_v10  ;;  %v1530_v30 = vmul.f32 %v1466_v17, %v3757_v26  ;;  %v1116_v19 = vmul.f32 0.044715, %v3816_v6  ;;  %v4194_v39 = vld [vmem:[#allocation35_spill] sm:$0xff] }
 0x1f3   : > { %v2388_v40 = vpop.eup %2387  ;;  %1699 = vmatprep.mubr.f32.mxu0 %v1528_v62  ;;  %2399 = vtanh.f32 %v1344_v50  ;;  %v1220_v24 = vmul.f32 %v3517_v49, %v3465_v43  ;;  %v1281_v4 = vadd.f32 %v1217_v29, %v4192_v15  ;;  %v3835_v60 = vadd.f32 %v988_v9, %v3199_v51 }
 0x1f4   : > { %v1463_v63 = vadd.f32 1.0, %v2388_v40  ;;  %2401 = vtanh.f32 %v1346_v47  ;;  %v1343_v53 = vmul.f32 0.7978846, %v1279_v14  ;;  %1860 = vmatprep.mubr.f32.mxu1 %v1530_v30  ;;  %v1019_v8 = vmul.f32 0.5, %v3392_v48 }
 0x1f5   : > { %v1284_v2 = vadd.f32 %v1220_v24, %v3465_v43  ;;  %v1222_v26 = vmul.f32 %v3523_v45, %v3476_v38  ;;  %v1345_v49 = vmul.f32 0.7978846, %v1281_v4  ;;  %v1219_v7 = vmul.f32 %v4195_v46, %v4194_v39 }
 0x1f6   : > { %v2390_v52 = vpop.eup %2389  ;;  %v1527_v59 = vmul.f32 %v1463_v63, %v1015_v1  ;;  %2403 = vtanh.f32 %v1343_v53  ;;  %v1021_v17 = vmul.f32 0.5, %v3401_v58  ;;  %v4196_v1 = vld [vmem:[#allocation40_spill] sm:$0xff]  ;;  %v3851_v58 = vmul.f32 %v1116_v19, %v3816_v6 }
 0x1f7   : > { %v2392_v34 = vpop.eup %2391  ;;  %v1465_v62 = vadd.f32 1.0, %v2390_v52  ;;  %v1348_v51 = vmul.f32 0.7978846, %v1284_v2  ;;  %v1286_v50 = vadd.f32 %v1222_v26, %v3476_v38  ;;  %2405 = vtanh.f32 %v1345_v49  ;;  %v4197_v26 = vld [vmem:[#allocation43_spill] sm:$0xff]  ;;  %v4199_v49 = vld [vmem:[#allocation44_spill] sm:$0xff] }
 0x1f8   : > { %v2394_v48 = vpop.eup %2393  ;;  %1700 = vmatmul.mubr.f32.gmra.mxu0 %v1527_v59  ;;  %v1468_v9 = vadd.f32 1.0, %v2392_v34  ;;  %v1283_v45 = vadd.f32 %v1219_v7, %v4194_v39  ;;  %v1221_v47 = vmul.f32 %v4196_v1, %v3447_v32  ;;  %v3856_v53 = vmul.f32 0.044715, %v3835_v60  ;;  %v4198_v59 = vld [vmem:[#allocation39_spill] sm:$0xff]  ;;  %v4200_v34 = vld [vmem:[#allocation48_spill] sm:$0xff] }
 0x1f9   : > { %v1529_v14 = vmul.f32 %v1465_v62, %v3794_v13  ;;  %v1470_v37 = vadd.f32 1.0, %v2394_v48  ;;  %2407 = vtanh.f32 %v1348_v51  ;;  %v1350_v29 = vmul.f32 0.7978846, %v1286_v50 }
 0x1fa   : > { %v1532_v40 = vmul.f32 %v1468_v9, %v3800_v36  ;;  %v1347_v30 = vmul.f32 0.7978846, %v1283_v45  ;;  %v1285_v24 = vadd.f32 %v1221_v47, %v3447_v32  ;;  %v1224_v13 = vmul.f32 %v3563_v61, %v3520_v12 }
 0x1fb   : > { %1861 = vmatmul.mubr.f32.gmra.mxu1 %v1529_v14  ;;  %v1534_v63 = vmul.f32 %v1470_v37, %v3803_v27  ;;  %2409 = vtanh.f32 %v1350_v29  ;;  %v1024_v4 = vmul.f32 0.5, %v3417_v20  ;;  %v1226_v19 = vmul.f32 %v3577_v25, %v3531_v5 }
 0x1fc   : > { %1705 = vmatprep.mubr.f32.mxu0 %v1532_v40  ;;  %2411 = vtanh.f32 %v1347_v30  ;;  %v1349_v36 = vmul.f32 0.7978846, %v1285_v24  ;;  %v1026_v2 = vmul.f32 0.5, %v3423_v44  ;;  %v1288_v27 = vadd.f32 %v1224_v13, %v3520_v12 }
 0x1fd   : > { %1866 = vmatprep.mubr.f32.mxu1 %v1534_v63  ;;  %v1223_v52 = vmul.f32 %v4197_v26, %v3501_v0  ;;  %v1225_v46 = vmul.f32 %v4199_v49, %v4198_v59  ;;  %v1023_v7 = vmul.f32 0.5, %v3410_v10  ;;  %v1290_v20 = vadd.f32 %v1226_v19, %v3531_v5 }
 0x1fe   : > { %v2396_v61 = vpop.eup %2395  ;;  %2413 = vtanh.f32 %v1349_v36  ;;  %v1228_v25 = vmul.f32 %v4200_v34, %v3572_v16  ;;  %v1352_v44 = vmul.f32 0.7978846, %v1288_v27  ;;  %v1025_v1 = vmul.f32 0.5, %v4192_v15  ;;  %v4201_v27 = vld [vmem:[#allocation24_spill] sm:$0xff] }
 0x1ff   : > { %v2398_v62 = vpop.eup %2397  ;;  %v1467_v51 = vadd.f32 1.0, %v2396_v61  ;;  %v1287_v50 = vadd.f32 %v1223_v52, %v3501_v0  ;;  %v1289_v48 = vadd.f32 %v1225_v46, %v4198_v59  ;;  %v1354_v47 = vmul.f32 0.7978846, %v1290_v20  ;;  %v4202_v61 = vld [vmem:[#allocation41_spill] sm:$0xff] }
 0x200   : > { %v2400_v9 = vpop.eup %2399  ;;  %v1469_v45 = vadd.f32 1.0, %v2398_v62  ;;  %v1292_v10 = vadd.f32 %v1228_v25, %v3572_v16  ;;  %2415 = vtanh.f32 %v1352_v44  ;;  %v1230_v15 = vmul.f32 %v4201_v27, %v3591_v28  ;;  %v4205_v44 = vld [vmem:[#allocation46_spill] sm:$0xff] }
 0x201   : > { %v2402_v14 = vpop.eup %2401  ;;  %v1531_v37 = vmul.f32 %v1467_v51, %v1019_v8  ;;  %v1472_v29 = vadd.f32 1.0, %v2400_v9  ;;  %v1351_v40 = vmul.f32 0.7978846, %v1287_v50  ;;  %2417 = vtanh.f32 %v1354_v47  ;;  %v4204_v51 = vld [vmem:[#allocation42_spill] sm:$0xff] }
 0x202   : > { %v1533_v30 = vmul.f32 %v1469_v45, %v1021_v17  ;;  %v1474_v24 = vadd.f32 1.0, %v2402_v14  ;;  %v1353_v63 = vmul.f32 0.7978846, %v1289_v48  ;;  %v1356_v19 = vmul.f32 0.7978846, %v1292_v10  ;;  %v4207_v45 = vld [vmem:[#allocation21_spill] sm:$0xff] }
 0x203   : > { %v2404_v13 = vpop.eup %2403  ;;  %1706 = vmatmul.mubr.f32.gmra.mxu0 %v1531_v37  ;;  %v1536_v36 = vmul.f32 %v1472_v29, %v1024_v4  ;;  %2419 = vtanh.f32 %v1351_v40  ;;  %v1028_v8 = vmul.f32 0.5, %v3465_v43  ;;  %v1030_v17 = vmul.f32 0.5, %v3476_v38  ;;  %v4203_v4 = vld [vmem:[#allocation45_spill] sm:$0xff] }
 0x204   : > { %1867 = vmatmul.mubr.f32.gmra.mxu1 %v1533_v30  ;;  %v1538_v26 = vmul.f32 %v1474_v24, %v1026_v2  ;;  %v1471_v52 = vadd.f32 1.0, %v2404_v13  ;;  %2421 = vtanh.f32 %v1353_v63  ;;  %v2406_v49 = vpop.eup %2405  ;;  %v1294_v46 = vadd.f32 %v1230_v15, %v3591_v28  ;;  %v4206_v38 = vld [vmem:[#allocation17_spill] sm:$0xff]  ;;  %v4208_v15 = vld [vmem:[#allocation47_spill] sm:$0xff] }
 0x205   : > { %1711 = vmatprep.mubr.f32.mxu0 %v1536_v36  ;;  %2423 = vtanh.f32 %v1356_v19  ;;  %v1227_v20 = vmul.f32 %v4203_v4, %v4202_v61  ;;  %v1473_v62 = vadd.f32 1.0, %v2406_v49  ;;  %v1027_v2 = vmul.f32 0.5, %v4194_v39 }
 0x206   : > { %v2408_v34 = vpop.eup %2407  ;;  %1872 = vmatprep.mubr.f32.mxu1 %v1538_v26  ;;  %v1535_v25 = vmul.f32 %v1471_v52, %v1023_v7  ;;  %v1229_v43 = vmul.f32 %v4205_v44, %v4204_v51  ;;  %v1358_v48 = vmul.f32 0.7978846, %v1294_v46  ;;  %v1232_v47 = vmul.f32 %v4207_v45, %v4206_v38 }
 0x207   : > { %v1476_v50 = vadd.f32 1.0, %v2408_v34  ;;  %v1291_v9 = vadd.f32 %v1227_v20, %v4202_v61  ;;  %v1537_v14 = vmul.f32 %v1473_v62, %v1025_v1  ;;  %v1029_v37 = vmul.f32 0.5, %v3447_v32  ;;  %v4210_v34 = vld [vmem:[#allocation16_spill] sm:$0xff] }
 0x208   : > { %v2410_v10 = vpop.eup %2409  ;;  %1712 = vmatmul.mubr.f32.gmra.mxu0 %v1535_v25  ;;  %v1293_v7 = vadd.f32 %v1229_v43, %v4204_v51  ;;  %v1234_v39 = vmul.f32 %v3683_v22, %v3639_v11  ;;  %2425 = vtanh.f32 %v1358_v48  ;;  %v1296_v36 = vadd.f32 %v1232_v47, %v4206_v38  ;;  %v4209_v22 = vld [vmem:[#allocation25_spill] sm:$0xff]  ;;  %v4211_v25 = vld [vmem:[#allocation20_spill] sm:$0xff] }
 0x209   : > { %v2412_v29 = vpop.eup %2411  ;;  %v1540_v40 = vmul.f32 %v1476_v50, %v1028_v8  ;;  %v1478_v30 = vadd.f32 1.0, %v2410_v10  ;;  %v1355_v24 = vmul.f32 0.7978846, %v1291_v9  ;;  %1873 = vmatmul.mubr.f32.gmra.mxu1 %v1537_v14  ;;  %v1032_v27 = vmul.f32 0.5, %v3520_v12  ;;  %v4212_v14 = vld [vmem:[#allocation19_spill] sm:$0xff] }
 0x20a   : > { %v1475_v63 = vadd.f32 1.0, %v2412_v29  ;;  %v1357_v13 = vmul.f32 0.7978846, %v1293_v7  ;;  %v1298_v19 = vadd.f32 %v1234_v39, %v3639_v11  ;;  %v1231_v26 = vmul.f32 %v4209_v22, %v4208_v15 }
 0x20b   : > { %v2414_v1 = vpop.eup %2413  ;;  %1717 = vmatprep.mubr.f32.mxu0 %v1540_v40  ;;  %v1542_v32 = vmul.f32 %v1478_v30, %v1030_v17  ;;  %2427 = vtanh.f32 %v1355_v24  ;;  %v1360_v49 = vmul.f32 0.7978846, %v1296_v36  ;;  %v1034_v46 = vmul.f32 0.5, %v3531_v5 }
 0x20c   : > { %v1539_v52 = vmul.f32 %v1475_v63, %v1027_v2  ;;  %v1477_v8 = vadd.f32 1.0, %v2414_v1  ;;  %2429 = vtanh.f32 %v1357_v13  ;;  %v1362_v4 = vmul.f32 0.7978846, %v1298_v19 }
 0x20d   : > { %1878 = vmatprep.mubr.f32.mxu1 %v1542_v32  ;;  %v1295_v20 = vadd.f32 %v1231_v26, %v4208_v15  ;;  %v1233_v62 = vmul.f32 %v4211_v25, %v4210_v34  ;;  %v2416_v17 = vpop.eup %2415  ;;  %v1031_v44 = vmul.f32 0.5, %v3501_v0  ;;  %2431 = vtanh.f32 %v1360_v49  ;;  %v4213_v32 = vld [vmem:[#allocation49_spill] sm:$0xff] }
 0x20e   : > { %1718 = vmatmul.mubr.f32.gmra.mxu0 %v1539_v52  ;;  %v1541_v12 = vmul.f32 %v1477_v8, %v1029_v37  ;;  %v1236_v2 = vmul.f32 %v3740_v54, %v3692_v42  ;;  %v2418_v43 = vpop.eup %2417  ;;  %v1480_v50 = vadd.f32 1.0, %v2416_v17  ;;  %2433 = vtanh.f32 %v1362_v4  ;;  %v4215_v49 = vld [vmem:[#allocation29_spill] sm:$0xff] }
 0x20f   : > { %v1359_v48 = vmul.f32 0.7978846, %v1295_v20  ;;  %v1297_v5 = vadd.f32 %v1233_v62, %v4210_v34  ;;  %v1482_v45 = vadd.f32 1.0, %v2418_v43  ;;  %v1033_v47 = vmul.f32 0.5, %v4198_v59 }
 0x210   : > { %v2420_v9 = vpop.eup %2419  ;;  %1879 = vmatmul.mubr.f32.gmra.mxu1 %v1541_v12  ;;  %v1300_v10 = vadd.f32 %v1236_v2, %v3692_v42  ;;  %v1238_v0 = vmul.f32 %v4212_v14, %v3701_v56  ;;  %v1544_v7 = vmul.f32 %v1480_v50, %v1032_v27  ;;  %v1036_v59 = vmul.f32 0.5, %v3572_v16  ;;  %v4214_v27 = vld [vmem:[#allocation30_spill] sm:$0xff]  ;;  %v4217_v50 = vld [vmem:[#allocation27_spill] sm:$0xff] }
 0x211   : > { %v2422_v37 = vpop.eup %2421  ;;  %v1479_v39 = vadd.f32 1.0, %v2420_v9  ;;  %2435 = vtanh.f32 %v1359_v48  ;;  %v1361_v54 = vmul.f32 0.7978846, %v1297_v5  ;;  %v1546_v40 = vmul.f32 %v1482_v45, %v1034_v46  ;;  %v4216_v46 = vld [vmem:[#allocation18_spill] sm:$0xff]  ;;  %v4218_v48 = vld [vmem:[#allocation28_spill] sm:$0xff] }
 0x212   : > { %v2424_v29 = vpop.eup %2423  ;;  %v1481_v30 = vadd.f32 1.0, %v2422_v37  ;;  %v1364_v24 = vmul.f32 0.7978846, %v1300_v10  ;;  %v1302_v63 = vadd.f32 %v1238_v0, %v3701_v56  ;;  %1723 = vmatprep.mubr.f32.mxu0 %v1544_v7  ;;  %v1235_v22 = vmul.f32 %v4214_v27, %v4213_v32 }
 0x213   : > { %v1543_v13 = vmul.f32 %v1479_v39, %v1031_v44  ;;  %v1484_v36 = vadd.f32 1.0, %v2424_v29  ;;  %2437 = vtanh.f32 %v1361_v54  ;;  %1884 = vmatprep.mubr.f32.mxu1 %v1546_v40  ;;  %v1182_v26 = vmul.f32 %v3856_v53, %v3835_v60 }
 0x214   : > { %v1545_v19 = vmul.f32 %v1481_v30, %v1033_v47  ;;  %2439 = vtanh.f32 %v1364_v24  ;;  %v1366_v1 = vmul.f32 0.7978846, %v1302_v63  ;;  %v1038_v8 = vmul.f32 0.5, %v3591_v28 }
 0x215   : > { %1724 = vmatmul.mubr.f32.gmra.mxu0 %v1543_v13  ;;  %v1548_v52 = vmul.f32 %v1484_v36, %v1036_v59  ;;  %v1237_v4 = vmul.f32 %v4216_v46, %v4215_v49  ;;  %v2426_v16 = vpop.eup %2425  ;;  %v1035_v20 = vmul.f32 0.5, %v4202_v61  ;;  %v1299_v25 = vadd.f32 %v1235_v22, %v4213_v32 }
 0x216   : > { %1885 = vmatmul.mubr.f32.gmra.mxu1 %v1545_v19  ;;  %2441 = vtanh.f32 %v1366_v1  ;;  %v1240_v62 = vmul.f32 %v3783_v41, %v3734_v55  ;;  %v1486_v17 = vadd.f32 1.0, %v2426_v16  ;;  %v1037_v53 = vmul.f32 0.5, %v4204_v51 }
 0x217   : > { %1729 = vmatprep.mubr.f32.mxu0 %v1548_v52  ;;  %v1301_v12 = vadd.f32 %v1237_v4, %v4215_v49  ;;  %v1242_v28 = vmul.f32 %v3789_v35, %v3751_v21  ;;  %v1040_v2 = vmul.f32 0.5, %v4206_v38  ;;  %v1363_v43 = vmul.f32 0.7978846, %v1299_v25 }
 0x218   : > { %v2428_v44 = vpop.eup %2427  ;;  %v1304_v61 = vadd.f32 %v1240_v62, %v3734_v55  ;;  %v1239_v5 = vmul.f32 %v4218_v48, %v4217_v50  ;;  %v1550_v41 = vmul.f32 %v1486_v17, %v1038_v8  ;;  %v1241_v7 = vmul.f32 %v3776_v23, %v3728_v33 }
 0x219   : > { %v2430_v9 = vpop.eup %2429  ;;  %v1483_v45 = vadd.f32 1.0, %v2428_v44  ;;  %v1365_v47 = vmul.f32 0.7978846, %v1301_v12  ;;  %v1306_v51 = vadd.f32 %v1242_v28, %v3751_v21  ;;  %2443 = vtanh.f32 %v1363_v43 }
 0x21a   : > { %v1485_v10 = vadd.f32 1.0, %v2430_v9  ;;  %v1368_v14 = vmul.f32 0.7978846, %v1304_v61  ;;  %v1303_v35 = vadd.f32 %v1239_v5, %v4217_v50  ;;  %v2432_v0 = vpop.eup %2431  ;;  %1890 = vmatprep.mubr.f32.mxu1 %v1550_v41  ;;  %v1042_v30 = vmul.f32 0.5, %v3639_v11 }
 0x21b   : > { %v1547_v38 = vmul.f32 %v1483_v45, %v1035_v20  ;;  %2445 = vtanh.f32 %v1365_v47  ;;  %v1370_v37 = vmul.f32 0.7978846, %v1306_v51  ;;  %v2434_v39 = vpop.eup %2433  ;;  %v1488_v29 = vadd.f32 1.0, %v2432_v0 }
 0x21c   : > { %v1549_v54 = vmul.f32 %v1485_v10, %v1037_v53  ;;  %2447 = vtanh.f32 %v1368_v14  ;;  %v1367_v40 = vmul.f32 0.7978846, %v1303_v35  ;;  %v1490_v24 = vadd.f32 1.0, %v2434_v39 }
 0x21d   : > { %1730 = vmatmul.mubr.f32.gmra.mxu0 %v1547_v38  ;;  %2449 = vtanh.f32 %v1370_v37  ;;  %v1305_v63 = vadd.f32 %v1241_v7, %v3728_v33  ;;  %v1552_v59 = vmul.f32 %v1488_v29, %v1040_v2  ;;  %v1039_v36 = vmul.f32 0.5, %v4208_v15 }
 0x21e   : > { %v2436_v13 = vpop.eup %2435  ;;  %1891 = vmatmul.mubr.f32.gmra.mxu1 %v1549_v54  ;;  %2451 = vtanh.f32 %v1367_v40  ;;  %v1244_v23 = vmul.f32 %v3851_v58, %v3816_v6  ;;  %v1554_v19 = vmul.f32 %v1490_v24, %v1042_v30  ;;  %v1246_v22 = vmul.f32 %v1182_v26, %v3835_v60 }
 0x21f   : > { %v1487_v1 = vadd.f32 1.0, %v2436_v13  ;;  %v1369_v27 = vmul.f32 0.7978846, %v1305_v63  ;;  %1735 = vmatprep.mubr.f32.mxu0 %v1552_v59  ;;  %v1041_v11 = vmul.f32 0.5, %v4210_v34  ;;  %v1044_v8 = vmul.f32 0.5, %v3692_v42 }
 0x220   : > { %v2438_v52 = vpop.eup %2437  ;;  %v1308_v46 = vadd.f32 %v1244_v23, %v3816_v6  ;;  %v1243_v15 = vmul.f32 %v3810_v3, %v3769_v31  ;;  %1896 = vmatprep.mubr.f32.mxu1 %v1554_v19  ;;  %v1310_v20 = vadd.f32 %v1246_v22, %v3835_v60  ;;  %v1245_v34 = vmul.f32 %v3820_v57, %v3779_v18 }
 0x221   : > { %v2440_v4 = vpop.eup %2439  ;;  %v1551_v16 = vmul.f32 %v1487_v1, %v1039_v36  ;;  %v1489_v58 = vadd.f32 1.0, %v2438_v52  ;;  %2453 = vtanh.f32 %v1369_v27  ;;  %v1046_v53 = vmul.f32 0.5, %v3701_v56 }
 0x222   : > { %v1492_v25 = vadd.f32 1.0, %v2440_v4  ;;  %v1372_v26 = vmul.f32 0.7978846, %v1308_v46  ;;  %v1307_v62 = vadd.f32 %v1243_v15, %v3769_v31  ;;  %v1374_v3 = vmul.f32 0.7978846, %v1310_v20  ;;  %v1567_v46 = vld [vmem:[#allocation2 + $0xb0] sm:$0xff] }
 0x223   : > { %v2442_v42 = vpop.eup %2441  ;;  %1736 = vmatmul.mubr.f32.gmra.mxu0 %v1551_v16  ;;  %v1553_v17 = vmul.f32 %v1489_v58, %v1041_v11  ;;  %v1309_v2 = vadd.f32 %v1245_v34, %v3779_v18  ;;  %v1043_v5 = vmul.f32 0.5, %v4213_v32  ;;  %v1045_v41 = vmul.f32 0.5, %v4215_v49  ;;  %v1568_v16 = vld [vmem:[#allocation2] sm:$0xff] }
 0x224   : > { %v1556_v12 = vmul.f32 %v1492_v25, %v1044_v8  ;;  %v1494_v28 = vadd.f32 1.0, %v2442_v42  ;;  %2455 = vtanh.f32 %v1372_v26  ;;  %v1371_v44 = vmul.f32 0.7978846, %v1307_v62  ;;  %v1569_v62 = vld [vmem:[#allocation2 + $0xd8] sm:$0xff] }
 0x225   : > { %1897 = vmatmul.mubr.f32.gmra.mxu1 %v1553_v17  ;;  %2457 = vtanh.f32 %v1374_v3  ;;  %v1373_v48 = vmul.f32 0.7978846, %v1309_v2  ;;  %v1048_v10 = vmul.f32 0.5, %v3734_v55  ;;  %v1050_v38 = vmul.f32 0.5, %v3751_v21  ;;  %v1570_v17 = vld [vmem:[#allocation2 + $0x18] sm:$0xff]  ;;  %v1571_v2 = vld [vmem:[#allocation2 + $0x50] sm:$0xff] }
 0x226   : > { %1741 = vmatprep.mubr.f32.mxu0 %v1556_v12  ;;  %v1558_v43 = vmul.f32 %v1494_v28, %v1046_v53  ;;  %2459 = vtanh.f32 %v1371_v44  ;;  %v2444_v61 = vpop.eup %2443  ;;  %v1047_v32 = vmul.f32 0.5, %v4217_v50  ;;  %v1049_v40 = vmul.f32 0.5, %v3728_v33 }
 0x227   : > { %v1491_v9 = vadd.f32 1.0, %v2444_v61  ;;  %2461 = vtanh.f32 %v1373_v48  ;;  %v1052_v21 = vmul.f32 0.5, %v3816_v6  ;;  %v1054_v50 = vmul.f32 0.5, %v3835_v60 }
 0x228   : > { %v2446_v57 = vpop.eup %2445  ;;  %1902 = vmatprep.mubr.f32.mxu1 %v1558_v43  ;;  %v1051_v19 = vmul.f32 0.5, %v3769_v31  ;;  %v1053_v52 = vmul.f32 0.5, %v3779_v18 }
 0x229   : > { %v2448_v56 = vpop.eup %2447  ;;  %v1493_v45 = vadd.f32 1.0, %v2446_v57  ;;  %v1555_v51 = vmul.f32 %v1491_v9, %v1043_v5  ;;  %v1572_v57 = vld [vmem:[#allocation2 + $0x68] sm:$0xff] }
 0x22a   : > { %v2450_v47 = vpop.eup %2449  ;;  %v1496_v14 = vadd.f32 1.0, %v2448_v56 }
 0x22b   : > { %v2452_v35 = vpop.eup %2451  ;;  %v1557_v0 = vmul.f32 %v1493_v45, %v1045_v41  ;;  %v1498_v37 = vadd.f32 1.0, %v2450_v47  ;;  %1742 = vmatmul.mubr.f32.gmra.mxu0 %v1555_v51  ;;  %v1573_v47 = vld [vmem:[#allocation2 + $0x30] sm:$0xff] }
 0x22c   : > { %v1560_v7 = vmul.f32 %v1496_v14, %v1048_v10  ;;  %v1495_v39 = vadd.f32 1.0, %v2452_v35  ;;  %v1574_v35 = vld [vmem:[#allocation2 + $0x48] sm:$0xff] }
 0x22d   : > { %1903 = vmatmul.mubr.f32.gmra.mxu1 %v1557_v0  ;;  %v1562_v54 = vmul.f32 %v1498_v37, %v1050_v38 }
 0x22e   : > { %v2454_v49 = vpop.eup %2453  ;;  %1747 = vmatprep.mubr.f32.mxu0 %v1560_v7  ;;  %v1559_v29 = vmul.f32 %v1495_v39, %v1047_v32  ;;  %v1575_v39 = vld [vmem:[#allocation2 + $0x80] sm:$0xff] }
 0x22f   : > { %1908 = vmatprep.mubr.f32.mxu1 %v1562_v54  ;;  %v1497_v55 = vadd.f32 1.0, %v2454_v49 }
 0x230   : > { %1748 = vmatmul.mubr.f32.gmra.mxu0 %v1559_v29 }
 0x231   : > { %v2456_v30 = vpop.eup %2455  ;;  %v1561_v24 = vmul.f32 %v1497_v55, %v1049_v40  ;;  %v1576_v40 = vld [vmem:[#allocation2 + $0x88] sm:$0xff] }
 0x232   : > { %v2458_v63 = vpop.eup %2457  ;;  %v1500_v13 = vadd.f32 1.0, %v2456_v30 }
 0x233   : > { %v2460_v59 = vpop.eup %2459  ;;  %1909 = vmatmul.mubr.f32.gmra.mxu1 %v1561_v24  ;;  %v1502_v36 = vadd.f32 1.0, %v2458_v63 }
 0x234   : > { %v1564_v23 = vmul.f32 %v1500_v13, %v1052_v21  ;;  %v1499_v1 = vadd.f32 1.0, %v2460_v59  ;;  %v2462_v22 = vpop.eup %2461  ;;  %v1577_v13 = vld [vmem:[#allocation2 + $0xe8] sm:$0xff] }
 0x235   : > { %v1566_v27 = vmul.f32 %v1502_v36, %v1054_v50  ;;  %v1501_v11 = vadd.f32 1.0, %v2462_v22 }
 0x236   : > { %1753 = vmatprep.mubr.f32.mxu0 %v1564_v23  ;;  %v1563_v33 = vmul.f32 %v1499_v1, %v1051_v19  ;;  %v1578_v23 = vld [vmem:[#allocation2 + $0xb8] sm:$0xff] }
 0x237   : > { %1914 = vmatprep.mubr.f32.mxu1 %v1566_v27  ;;  %v1565_v6 = vmul.f32 %v1501_v11, %v1053_v52  ;;  %v1579_v52 = vld [vmem:[#allocation2 + $0x60] sm:$0xff] }
 0x238   : > { %1754 = vmatmul.mubr.f32.gmra.mxu0 %v1563_v33 }
 0x239   : > { %1915 = vmatmul.mubr.f32.gmra.mxu1 %v1565_v6 }
 0x271   : > { %v1665_v8 = vpop.f32.mrf.mxu0 }
 0x273   : > { %v1826_v15 = vpop.f32.mrf.mxu1  ;;  %v1667_v60 = vpop.f32.mrf.mxu0 }
 0x274   : > { %v1827_v4 = vadd.f32 %v1826_v15, %v1665_v8 }
 0x275   : > { %v1828_v58 = vpop.f32.mrf.mxu1 }
 0x276   : > { %v1921_v31 = vadd.f32 %v1827_v4, %v1567_v46  ;;  %v1829_v20 = vadd.f32 %v1828_v58, %v1667_v60  ;;  %v1580_v46 = vld [vmem:[#allocation2 + $0xf0] sm:$0xff] }
 0x278   : > { %1953 = vst [vmem:[#allocation2 + $0xb0] sm:$0xff] %v1921_v31  ;;  %v1922_v25 = vadd.f32 %v1829_v20, %v1568_v16  ;;  %v1581_v31 = vld [vmem:[#allocation2 + $0x8] sm:$0xff] }
 0x27a   : > { %1954 = vst [vmem:[#allocation2] sm:$0xff] %v1922_v25 }
 0x289   : > { %v1671_v26 = vpop.f32.mrf.mxu0 }
 0x28a   : > { %v1832_v34 = vpop.f32.mrf.mxu1 }
 0x28b   : > { %v1833_v18 = vadd.f32 %v1832_v34, %v1671_v26  ;;  %v1673_v42 = vpop.f32.mrf.mxu0 }
 0x28c   : > { %v1834_v53 = vpop.f32.mrf.mxu1 }
 0x28d   : > { %v1923_v3 = vadd.f32 %v1833_v18, %v1569_v62  ;;  %v1835_v12 = vadd.f32 %v1834_v53, %v1673_v42  ;;  %v1582_v62 = vld [vmem:[#allocation2 + $0x78] sm:$0xff] }
 0x28f   : > { %1955 = vst [vmem:[#allocation2 + $0xd8] sm:$0xff] %v1923_v3  ;;  %v1924_v28 = vadd.f32 %v1835_v12, %v1570_v17  ;;  %v1583_v3 = vld [vmem:[#allocation2 + $0x38] sm:$0xff] }
 0x291   : > { %1956 = vst [vmem:[#allocation2 + $0x18] sm:$0xff] %v1924_v28  ;;  %v1677_v44 = vpop.f32.mrf.mxu0 }
 0x292   : > { %v1838_v43 = vpop.f32.mrf.mxu1 }
 0x293   : > { %v1679_v61 = vpop.f32.mrf.mxu0  ;;  %v1839_v48 = vadd.f32 %v1838_v43, %v1677_v44 }
 0x294   : > { %v1840_v5 = vpop.f32.mrf.mxu1 }
 0x295   : > { %v1925_v9 = vadd.f32 %v1839_v48, %v1571_v2  ;;  %v1841_v56 = vadd.f32 %v1840_v5, %v1679_v61  ;;  %v1584_v2 = vld [vmem:[#allocation2 + $0x58] sm:$0xff] }
 0x297   : > { %1957 = vst [vmem:[#allocation2 + $0x50] sm:$0xff] %v1925_v9  ;;  %v1926_v41 = vadd.f32 %v1841_v56, %v1572_v57  ;;  %v1585_v9 = vld [vmem:[#allocation2 + $0x40] sm:$0xff] }
 0x299   : > { %1958 = vst [vmem:[#allocation2 + $0x68] sm:$0xff] %v1926_v41 }
 0x29a   : > { %v1683_v45 = vpop.f32.mrf.mxu0 }
 0x29b   : > { %v1844_v51 = vpop.f32.mrf.mxu1 }
 0x29c   : > { %v1845_v10 = vadd.f32 %v1844_v51, %v1683_v45  ;;  %v1685_v14 = vpop.f32.mrf.mxu0 }
 0x29d   : > { %v1846_v0 = vpop.f32.mrf.mxu1 }
 0x29e   : > { %v1927_v38 = vadd.f32 %v1845_v10, %v1573_v47  ;;  %v1847_v37 = vadd.f32 %v1846_v0, %v1685_v14  ;;  %v1586_v47 = vld [vmem:[#allocation2 + $0xc8] sm:$0xff] }
 0x2a0   : > { %1959 = vst [vmem:[#allocation2 + $0x30] sm:$0xff] %v1927_v38  ;;  %v1928_v7 = vadd.f32 %v1847_v37, %v1574_v35  ;;  %v1587_v38 = vld [vmem:[#allocation2 + $0xe0] sm:$0xff] }
 0x2a2   : > { %1960 = vst [vmem:[#allocation2 + $0x48] sm:$0xff] %v1928_v7 }
 0x2a3   : > { %v1689_v32 = vpop.f32.mrf.mxu0 }
 0x2a5   : > { %v1850_v54 = vpop.f32.mrf.mxu1  ;;  %v1691_v49 = vpop.f32.mrf.mxu0 }
 0x2a6   : > { %v1851_v29 = vadd.f32 %v1850_v54, %v1689_v32 }
 0x2a7   : > { %v1852_v55 = vpop.f32.mrf.mxu1 }
 0x2a8   : > { %v1929_v30 = vadd.f32 %v1851_v29, %v1575_v39  ;;  %v1853_v24 = vadd.f32 %v1852_v55, %v1691_v49  ;;  %v1588_v39 = vld [vmem:[#allocation2 + $0x90] sm:$0xff] }
 0x2aa   : > { %1961 = vst [vmem:[#allocation2 + $0x80] sm:$0xff] %v1929_v30  ;;  %v1930_v63 = vadd.f32 %v1853_v24, %v1576_v40  ;;  %v1589_v30 = vld [vmem:[#allocation2 + $0x70] sm:$0xff] }
 0x2ac   : > { %1962 = vst [vmem:[#allocation2 + $0x88] sm:$0xff] %v1930_v63 }
 0x2ad   : > { %v1695_v21 = vpop.f32.mrf.mxu0 }
 0x2af   : > { %v1697_v50 = vpop.f32.mrf.mxu0 }
 0x2b0   : > { %v1856_v59 = vpop.f32.mrf.mxu1 }
 0x2b1   : > { %v1857_v36 = vadd.f32 %v1856_v59, %v1695_v21 }
 0x2b2   : > { %v1858_v19 = vpop.f32.mrf.mxu1 }
 0x2b3   : > { %v1931_v1 = vadd.f32 %v1857_v36, %v1577_v13  ;;  %v1859_v27 = vadd.f32 %v1858_v19, %v1697_v50  ;;  %v1590_v13 = vld [vmem:[#allocation2 + $0xc0] sm:$0xff] }
 0x2b5   : > { %1963 = vst [vmem:[#allocation2 + $0xe8] sm:$0xff] %v1931_v1  ;;  %v1932_v22 = vadd.f32 %v1859_v27, %v1578_v23  ;;  %v1591_v1 = vld [vmem:[#allocation2 + $0xa8] sm:$0xff] }
 0x2b7   : > { %1964 = vst [vmem:[#allocation2 + $0xb8] sm:$0xff] %v1932_v22 }
 0x2b8   : > { %v1701_v33 = vpop.f32.mrf.mxu0 }
 0x2ba   : > { %v1703_v6 = vpop.f32.mrf.mxu0 }
 0x2bb   : > { %v1862_v11 = vpop.f32.mrf.mxu1 }
 0x2bc   : > { %v1863_v8 = vadd.f32 %v1862_v11, %v1701_v33 }
 0x2bd   : > { %v1864_v15 = vpop.f32.mrf.mxu1 }
 0x2be   : > { %v1933_v60 = vadd.f32 %v1863_v8, %v1579_v52  ;;  %v1865_v4 = vadd.f32 %v1864_v15, %v1703_v6  ;;  %v1592_v52 = vld [vmem:[#allocation2 + $0xd0] sm:$0xff] }
 0x2c0   : > { %1965 = vst [vmem:[#allocation2 + $0x60] sm:$0xff] %v1933_v60  ;;  %v1934_v16 = vadd.f32 %v1865_v4, %v1580_v46  ;;  %v1593_v60 = vld [vmem:[#allocation2 + $0x10] sm:$0xff] }
 0x2c2   : > { %1966 = vst [vmem:[#allocation2 + $0xf0] sm:$0xff] %v1934_v16 }
 0x2c3   : > { %v1707_v58 = vpop.f32.mrf.mxu0 }
 0x2c4   : > { %v1868_v20 = vpop.f32.mrf.mxu1 }
 0x2c5   : > { %v1869_v25 = vadd.f32 %v1868_v20, %v1707_v58  ;;  %v1709_v26 = vpop.f32.mrf.mxu0 }
 0x2c6   : > { %v1870_v34 = vpop.f32.mrf.mxu1 }
 0x2c7   : > { %v1935_v18 = vadd.f32 %v1869_v25, %v1581_v31  ;;  %v1871_v42 = vadd.f32 %v1870_v34, %v1709_v26  ;;  %v1594_v31 = vld [vmem:[#allocation2 + $0x28] sm:$0xff] }
 0x2c8   : > { %v1713_v17 = vpop.f32.mrf.mxu0 }
 0x2c9   : > { %1967 = vst [vmem:[#allocation2 + $0x8] sm:$0xff] %v1935_v18  ;;  %v1936_v53 = vadd.f32 %v1871_v42, %v1582_v62  ;;  %v1874_v12 = vpop.f32.mrf.mxu1  ;;  %v1595_v18 = vld [vmem:[#allocation2 + $0xa0] sm:$0xff] }
 0x2ca   : > { %v1715_v28 = vpop.f32.mrf.mxu0  ;;  %v1875_v44 = vadd.f32 %v1874_v12, %v1713_v17 }
 0x2cb   : > { %1968 = vst [vmem:[#allocation2 + $0x78] sm:$0xff] %v1936_v53  ;;  %v1876_v43 = vpop.f32.mrf.mxu1 }
 0x2cc   : > { %v1937_v61 = vadd.f32 %v1875_v44, %v1583_v3  ;;  %v1877_v48 = vadd.f32 %v1876_v43, %v1715_v28  ;;  %v1596_v3 = vld [vmem:[#allocation2 + $0xf8] sm:$0xff] }
 0x2ce   : > { %v1719_v57 = vpop.f32.mrf.mxu0  ;;  %1969 = vst [vmem:[#allocation2 + $0x38] sm:$0xff] %v1937_v61  ;;  %v1938_v5 = vadd.f32 %v1877_v48, %v1584_v2  ;;  %v1597_v61 = vld [vmem:[#allocation2 + $0x20] sm:$0xff] }
 0x2d0   : > { %v1880_v56 = vpop.f32.mrf.mxu1  ;;  %v1721_v41 = vpop.f32.mrf.mxu0  ;;  %1970 = vst [vmem:[#allocation2 + $0x58] sm:$0xff] %v1938_v5 }
 0x2d1   : > { %v1881_v45 = vadd.f32 %v1880_v56, %v1719_v57 }
 0x2d2   : > { %v1882_v51 = vpop.f32.mrf.mxu1 }
 0x2d3   : > { %v1939_v10 = vadd.f32 %v1881_v45, %v1585_v9  ;;  %v1883_v14 = vadd.f32 %v1882_v51, %v1721_v41  ;;  %v1598_v9 = vld [vmem:[#allocation2 + $0x98] sm:$0xff] }
 0x2d5   : > { %1971 = vst [vmem:[#allocation2 + $0x40] sm:$0xff] %v1939_v10  ;;  %v1940_v35 = vadd.f32 %v1883_v14, %v1586_v47  ;;  %v1725_v0 = vpop.f32.mrf.mxu0 }
 0x2d6   : > { %v1886_v37 = vpop.f32.mrf.mxu1 }
 0x2d7   : > { %1972 = vst [vmem:[#allocation2 + $0xc8] sm:$0xff] %v1940_v35  ;;  %v1887_v7 = vadd.f32 %v1886_v37, %v1725_v0  ;;  %v1727_v32 = vpop.f32.mrf.mxu0 }
 0x2d8   : > { %v1888_v54 = vpop.f32.mrf.mxu1 }
 0x2d9   : > { %v1941_v49 = vadd.f32 %v1887_v7, %v1587_v38  ;;  %v1889_v29 = vadd.f32 %v1888_v54, %v1727_v32 }
 0x2db   : > { %1973 = vst [vmem:[#allocation2 + $0xe0] sm:$0xff] %v1941_v49  ;;  %v1942_v40 = vadd.f32 %v1889_v29, %v1588_v39 }
 0x2dd   : > { %1974 = vst [vmem:[#allocation2 + $0x90] sm:$0xff] %v1942_v40  ;;  %v1731_v55 = vpop.f32.mrf.mxu0 }
 0x2de   : > { %v1892_v24 = vpop.f32.mrf.mxu1 }
 0x2df   : > { %v1893_v63 = vadd.f32 %v1892_v24, %v1731_v55  ;;  %v1733_v21 = vpop.f32.mrf.mxu0 }
 0x2e0   : > { %v1894_v59 = vpop.f32.mrf.mxu1 }
 0x2e1   : > { %v1943_v50 = vadd.f32 %v1893_v63, %v1589_v30  ;;  %v1895_v36 = vadd.f32 %v1894_v59, %v1733_v21 }
 0x2e3   : > { %1975 = vst [vmem:[#allocation2 + $0x70] sm:$0xff] %v1943_v50  ;;  %v1944_v23 = vadd.f32 %v1895_v36, %v1590_v13  ;;  %v1737_v19 = vpop.f32.mrf.mxu0 }
 0x2e5   : > { %1976 = vst [vmem:[#allocation2 + $0xc0] sm:$0xff] %v1944_v23  ;;  %v1898_v27 = vpop.f32.mrf.mxu1  ;;  %v1739_v22 = vpop.f32.mrf.mxu0 }
 0x2e6   : > { %v1899_v33 = vadd.f32 %v1898_v27, %v1737_v19 }
 0x2e7   : > { %v1900_v11 = vpop.f32.mrf.mxu1 }
 0x2e8   : > { %v1945_v6 = vadd.f32 %v1899_v33, %v1591_v1  ;;  %v1901_v8 = vadd.f32 %v1900_v11, %v1739_v22 }
 0x2ea   : > { %1977 = vst [vmem:[#allocation2 + $0xa8] sm:$0xff] %v1945_v6  ;;  %v1946_v46 = vadd.f32 %v1901_v8, %v1592_v52 }
 0x2eb   : > { %v1743_v15 = vpop.f32.mrf.mxu0 }
 0x2ec   : > { %1978 = vst [vmem:[#allocation2 + $0xd0] sm:$0xff] %v1946_v46 }
 0x2ed   : > { %v1904_v4 = vpop.f32.mrf.mxu1  ;;  %v1745_v58 = vpop.f32.mrf.mxu0 }
 0x2ee   : > { %v1905_v16 = vadd.f32 %v1904_v4, %v1743_v15 }
 0x2ef   : > { %v1906_v20 = vpop.f32.mrf.mxu1 }
 0x2f0   : > { %v1947_v25 = vadd.f32 %v1905_v16, %v1593_v60  ;;  %v1907_v26 = vadd.f32 %v1906_v20, %v1745_v58  ;;  %v1749_v62 = vpop.f32.mrf.mxu0 }
 0x2f2   : > { %1979 = vst [vmem:[#allocation2 + $0x10] sm:$0xff] %v1947_v25  ;;  %v1948_v34 = vadd.f32 %v1907_v26, %v1594_v31  ;;  %v1751_v17 = vpop.f32.mrf.mxu0 }
 0x2f3   : > { %v1910_v42 = vpop.f32.mrf.mxu1 }
 0x2f4   : > { %1980 = vst [vmem:[#allocation2 + $0x28] sm:$0xff] %v1948_v34  ;;  %v1911_v53 = vadd.f32 %v1910_v42, %v1749_v62 }
 0x2f5   : > { %v1912_v12 = vpop.f32.mrf.mxu1 }
 0x2f6   : > { %v1949_v28 = vadd.f32 %v1911_v53, %v1595_v18  ;;  %v1913_v44 = vadd.f32 %v1912_v12, %v1751_v17 }
 0x2f8   : > { %1981 = vst [vmem:[#allocation2 + $0xa0] sm:$0xff] %v1949_v28  ;;  %v1950_v2 = vadd.f32 %v1913_v44, %v1596_v3  ;;  %v1755_v43 = vpop.f32.mrf.mxu0 }
 0x2f9   : > { %v1916_v48 = vpop.f32.mrf.mxu1 }
 0x2fa   : > { %1982 = vst [vmem:[#allocation2 + $0xf8] sm:$0xff] %v1950_v2  ;;  %v1757_v57 = vpop.f32.mrf.mxu0  ;;  %v1917_v5 = vadd.f32 %v1916_v48, %v1755_v43 }
 0x2fb   : > { %v1918_v56 = vpop.f32.mrf.mxu1 }
 0x2fc   : > { %v1951_v41 = vadd.f32 %v1917_v5, %v1597_v61  ;;  %v1919_v45 = vadd.f32 %v1918_v56, %v1757_v57  ;;  %1988 = sbr.rel (%p2208_p2) target bundleno = 786 (0x312), region = 64 }
 0x2fe   : > { %1983 = vst [vmem:[#allocation2 + $0x20] sm:$0xff] %v1951_v41  ;;  %v1952_v47 = vadd.f32 %v1919_v45, %v1598_v9 }
 0x300   : > { %1984 = vst [vmem:[#allocation2 + $0x98] sm:$0xff] %v1952_v47 }
 0x301   : > { %v1989_v51 = vld [vmem:[#allocation2 + $0xb0] sm:$0xff]  ;;  %v1990_v10 = vld [vmem:[#allocation2] sm:$0xff]  ;;  %v1991_v14 = vld [vmem:[#allocation2 + $0xd8] sm:$0xff] }
 0x302   : > { %2021 = vst [vmem:[%s2883_s2] sm:$0xff] %v1989_v51  ;;  %2022 = vst [vmem:[%s2883_s2 + $0x8] sm:$0xff] %v1990_v10  ;;  %v1992_v35 = vld [vmem:[#allocation2 + $0x18] sm:$0xff]  ;;  %v1993_v0 = vld [vmem:[#allocation2 + $0x50] sm:$0xff] }
 0x303   : > { %2023 = vst [vmem:[%s2883_s2 + $0x10] sm:$0xff] %v1991_v14  ;;  %v1994_v38 = vld [vmem:[#allocation2 + $0x68] sm:$0xff]  ;;  %2024 = vst [vmem:[%s2883_s2 + $0x18] sm:$0xff] %v1992_v35  ;;  %v1995_v37 = vld [vmem:[#allocation2 + $0x30] sm:$0xff] }
 0x304   : > { %2025 = vst [vmem:[%s2883_s2 + $0x20] sm:$0xff] %v1993_v0  ;;  %2026 = vst [vmem:[%s2883_s2 + $0x28] sm:$0xff] %v1994_v38  ;;  %v1996_v7 = vld [vmem:[#allocation2 + $0x48] sm:$0xff]  ;;  %v1997_v32 = vld [vmem:[#allocation2 + $0x80] sm:$0xff] }
 0x305   : > { %2027 = vst [vmem:[%s2883_s2 + $0x30] sm:$0xff] %v1995_v37  ;;  %2028 = vst [vmem:[%s2883_s2 + $0x38] sm:$0xff] %v1996_v7  ;;  %v1998_v39 = vld [vmem:[#allocation2 + $0x88] sm:$0xff]  ;;  %v2000_v49 = vld [vmem:[#allocation2 + $0xb8] sm:$0xff] }
 0x306   : > { %2029 = vst [vmem:[%s2883_s2 + $0x40] sm:$0xff] %v1997_v32  ;;  %v1999_v54 = vld [vmem:[#allocation2 + $0xe8] sm:$0xff]  ;;  %2030 = vst [vmem:[%s2883_s2 + $0x48] sm:$0xff] %v1998_v39  ;;  %v2001_v29 = vld [vmem:[#allocation2 + $0x60] sm:$0xff] }
 0x307   : > { %2031 = vst [vmem:[%s2883_s2 + $0x50] sm:$0xff] %v1999_v54  ;;  %2032 = vst [vmem:[%s2883_s2 + $0x58] sm:$0xff] %v2000_v49  ;;  %v2002_v40 = vld [vmem:[#allocation2 + $0xf0] sm:$0xff]  ;;  %v2003_v55 = vld [vmem:[#allocation2 + $0x8] sm:$0xff] }
 0x308   : > { %2033 = vst [vmem:[%s2883_s2 + $0x60] sm:$0xff] %v2001_v29  ;;  %2034 = vst [vmem:[%s2883_s2 + $0x68] sm:$0xff] %v2002_v40  ;;  %v2004_v30 = vld [vmem:[#allocation2 + $0x78] sm:$0xff]  ;;  %v2007_v21 = vld [vmem:[#allocation2 + $0x40] sm:$0xff] }
 0x309   : > { %2035 = vst [vmem:[%s2883_s2 + $0x70] sm:$0xff] %v2003_v55  ;;  %v2005_v24 = vld [vmem:[#allocation2 + $0x38] sm:$0xff]  ;;  %2036 = vst [vmem:[%s2883_s2 + $0x78] sm:$0xff] %v2004_v30  ;;  %v2008_v13 = vld [vmem:[#allocation2 + $0xc8] sm:$0xff] }
 0x30a   : > { %v2006_v63 = vld [vmem:[#allocation2 + $0x58] sm:$0xff]  ;;  %2037 = vst [vmem:[%s2883_s2 + $0x80] sm:$0xff] %v2005_v24  ;;  %v2009_v59 = vld [vmem:[#allocation2 + $0xe0] sm:$0xff]  ;;  %2039 = vst [vmem:[%s2883_s2 + $0x90] sm:$0xff] %v2007_v21 }
 0x30b   : > { %2038 = vst [vmem:[%s2883_s2 + $0x88] sm:$0xff] %v2006_v63  ;;  %2040 = vst [vmem:[%s2883_s2 + $0x98] sm:$0xff] %v2008_v13  ;;  %v2010_v50 = vld [vmem:[#allocation2 + $0x90] sm:$0xff]  ;;  %v2012_v23 = vld [vmem:[#allocation2 + $0xc0] sm:$0xff] }
 0x30c   : > { %2041 = vst [vmem:[%s2883_s2 + $0xa0] sm:$0xff] %v2009_v59  ;;  %v2011_v36 = vld [vmem:[#allocation2 + $0x70] sm:$0xff]  ;;  %2042 = vst [vmem:[%s2883_s2 + $0xa8] sm:$0xff] %v2010_v50  ;;  %v2013_v19 = vld [vmem:[#allocation2 + $0xa8] sm:$0xff] }
 0x30d   : > { %2043 = vst [vmem:[%s2883_s2 + $0xb0] sm:$0xff] %v2011_v36  ;;  %2044 = vst [vmem:[%s2883_s2 + $0xb8] sm:$0xff] %v2012_v23  ;;  %v2014_v1 = vld [vmem:[#allocation2 + $0xd0] sm:$0xff]  ;;  %v2016_v22 = vld [vmem:[#allocation2 + $0x28] sm:$0xff] }
 0x30e   : > { %v2015_v27 = vld [vmem:[#allocation2 + $0x10] sm:$0xff]  ;;  %2045 = vst [vmem:[%s2883_s2 + $0xc0] sm:$0xff] %v2013_v19  ;;  %2046 = vst [vmem:[%s2883_s2 + $0xc8] sm:$0xff] %v2014_v1  ;;  %v2017_v33 = vld [vmem:[#allocation2 + $0xa0] sm:$0xff] }
 0x30f   : > { %2047 = vst [vmem:[%s2883_s2 + $0xd0] sm:$0xff] %v2015_v27  ;;  %v2018_v52 = vld [vmem:[#allocation2 + $0xf8] sm:$0xff]  ;;  %2048 = vst [vmem:[%s2883_s2 + $0xd8] sm:$0xff] %v2016_v22  ;;  %v2019_v11 = vld [vmem:[#allocation2 + $0x20] sm:$0xff] }
 0x310   : > { %2049 = vst [vmem:[%s2883_s2 + $0xe0] sm:$0xff] %v2017_v33  ;;  %2050 = vst [vmem:[%s2883_s2 + $0xe8] sm:$0xff] %v2018_v52  ;;  %v2020_v6 = vld [vmem:[#allocation2 + $0x98] sm:$0xff] }
 0x311   : > { %2051 = vst [vmem:[%s2883_s2 + $0xf0] sm:$0xff] %v2019_v11  ;;  %2052 = vst [vmem:[%s2883_s2 + $0xf8] sm:$0xff] %v2020_v6 }
 0x312 PF: > { %s2219_s21 = sshll.u32 %s2661_s22, 12  ;;  %s2068_s3 = sshll.u32 %s2883_s2, 4  ;;  %s4003_s3 = int_to_ptr.vmem [resolvable:$true] %s2068_s3 }
 0x313   : > { %s4000_s16 = scalar_lea.hbm %s4061_s5, %s2219_s21  ;;  %s2054_s30 = scalar_lea.sflag [#allocation5], %s2865_s14 }
 0x314   : > { %s2569_s28 = scalar_lea.vmem %s4003_s3, 4096  ;;  %s2683_s7 = smov [#allocation11]  }
 0x315   : > { %p2570_p7 = scmp.ne.s32.totalorder %s4003_s3, %s2569_s28  ;;  %s2573_s12 = sshll.u32 %s2683_s7, 4  ;;  %s2574_s12 = int_to_ptr.vmem [resolvable:$false] %s2573_s12 }
 0x316   : > { %s2575_s22 = scalar_lea.vmem %s2574_s12, 8192  ;;  %p2576_p12 = scmp.lt.s32.totalorder %s4003_s3, %s2574_s12 }
 0x317   : > { %p2571_p6 = pnand %p2570_p7, %p2832_p13  ;;  %p2577_p1 = scmp.lt.s32.totalorder %s2575_s22, %s2569_s28 }
 0x319   : > { %p2572_p9 = pneg %p2571_p6  ;;  %p2578_p4 = por %p2577_p1, %p2576_p12 }
 0x31b   : > { %p2579_p8 = pnand %p2578_p4, %p2572_p9 }
 0x31d   : > { %2582 = shalt.err (!%p2579_p8)
}
 0x31e   : > { %s2583_s2 = scalar_lea.hbm %s4000_s16, 4096  ;;  %s2587_s15 = scalar_lea.hbm %s4061_s5, 8192 }
 0x31f   : > { %p2584_p11 = scmp.ne.s32.totalorder %s4000_s16, %s2583_s2  ;;  %p2588_p0 = scmp.lt.s32.totalorder %s4000_s16, %s4061_s5 }
 0x320   : > { %p2589_p5 = scmp.lt.s32.totalorder %s2587_s15, %s2583_s2 }
 0x321   : > { %p2585_p3 = pnand %p2584_p11, %p2832_p13 }
 0x322   : > { %p2590_p2 = por %p2589_p5, %p2588_p0 }
 0x323   : > { %p2586_p10 = pneg %p2585_p3 }
 0x325   : > { %p2591_p7 = pnand %p2590_p2, %p2586_p10 }
 0x327   : > { %2594 = shalt.err (!%p2591_p7)
}
 0x328   : > { %s2684_s21 = smov 256   ;;  %s2685_s17 = smov 16  }
 0x329   : > { %2234 = dma.vmem_to_hbm [thread:$0]  (%p2832_p13), %s4003_s3, 4096, %s4000_s16, %s2054_s30, %s2684_s21, %s2684_s21, %s2685_s17  }
 0x32a PF: > { %p2261_p6 = scmp.ge.s32.totalorder %s2673_s25, 2  ;;  %s2083_s13 = sand.u32 1, %s2645_s18  }
 0x32b   : > { %p4219_p9 = scmp.ne.s32.totalorder %s4114_s6, 0  ;;  %s2084_s28 = scalar_lea.sflag [#allocation5], %s2083_s13 }
 0x32d   : > { %p2251_p12 = pnand %p2261_p6, %p4219_p9 }
 0x32f   : > { %p2252_p1 = pneg %p2251_p12 }
 0x331   : > { %2640 = dma.done.wait (%p2252_p1), %s2084_s28, 4096  }
 0x332   : > { %2642 = vsyncadd (%p2252_p1), %s2084_s28, 4294963200  ;;  %s23_s25 = sadd.s32 1, %s2673_s25   ;;  %s4220_s18 = smov %s2649_s19 }
 0x333   : > { %p20_p4 = scmp.ge.s32.totalorder %s23_s25, 6   ;;  %s4221_s19 = smov %s2653_s20 }
 0x334   : > { %s4222_s20 = smov %s2847_s1  ;;  %s4223_s21 = smov %s2665_s23 }
 0x335   : > { %s4224_s22 = smov %s2669_s24  ;;  %s4225_s23 = smov %s4228_s26 }
 0x336   : > { %s4226_s24 = smov %s4232_s27  ;;  %22 = sbr.rel (!%p20_p4) target bundleno = 13 (0xd), region = 108 }
 0x33b   :  { %2089 = vsyncpa [#allocation4], 1 }
 0x33c   :  { %2091 = vsyncpa [#allocation4 + $0x1], 1 }
 0x33d   :  { %2092 = vsyncpa [#allocation7], 1 }
 0x33e   :  { %2093 = vsyncpa [#allocation10], 1 }
 0x33f   :  { %2094 = vsyncpa [#allocation5], 1 }
 0x340   :  { %2096 = vsyncpa [#allocation5 + $0x1], 1 }

</bundles_post_ra>
